<compile_context>
chip_gen: v5e
topology: v5e:2x2
jax: 0.10.0
libtpu: 0.0.40
codegen_flags: <defaults>
</compile_context>

<pallas_src>
import numpy as np
import jax
import jax.numpy as jnp
from jax import lax
from jax.experimental import pallas as pl
from jax.experimental.pallas import tpu as pltpu

_INV_SQRT2 = 0.7071067811865476
_OUT_LANES = 128          # lane-dense padded width of the head output


# ------------------------------- patchify ----------------------------------

def img_to_patch(x, p):
    B, C, H, W = x.shape
    x = x.reshape(B, C, H // p, p, W // p, p)
    x = jnp.transpose(x, (0, 2, 4, 1, 3, 5))            # [B, H', W', C, p, p]
    return x.reshape(B, (H // p) * (W // p), C * p * p)  # [B, T, C*p*p]


# ----------------------------- parameter init ------------------------------

def init_params(key, embed_dim, hidden_dim, num_channels, num_layers,
                patch_size, num_patches):
    patch_dim = num_channels * patch_size ** 2
    E, Hd, L = embed_dim, hidden_dim, num_layers
    keys = jax.random.split(key, 3 + num_layers)

    def dense(k, fan_in, fan_out):
        kw, kb = jax.random.split(k)
        lim = 1.0 / np.sqrt(fan_in)
        w = jax.random.uniform(kw, (fan_in, fan_out), jnp.float32, -lim, lim)
        b = jax.random.uniform(kb, (fan_out,), jnp.float32, -lim, lim)
        return w, b

    p = {}
    w, b = dense(keys[0], patch_dim, E)
    p['in_w'], p['in_b'] = w, b
    p['pos_emb'] = jax.random.normal(keys[1], (1, 1 + num_patches, E), jnp.float32)
    p['mask_token'] = jnp.zeros((patch_dim,), jnp.float32)       # torch.zeros init
    p['head_ln_g'] = jnp.ones((E,), jnp.float32)
    p['head_ln_b'] = jnp.zeros((E,), jnp.float32)
    w, b = dense(keys[2], E, patch_dim)
    p['head_w'], p['head_b'] = w, b

    wqkv, bqkv, wo, bo, w1, b1, w2, b2 = ([] for _ in range(8))
    for l in range(L):
        lk = jax.random.split(keys[3 + l], 4)
        w, b = dense(lk[0], E, 3 * E)            # fused in_proj (Q|K|V)
        wqkv.append(w); bqkv.append(b)
        w, b = dense(lk[1], E, E)
        wo.append(w); bo.append(b)
        w, b = dense(lk[2], E, Hd)
        w1.append(w); b1.append(b)
        w, b = dense(lk[3], Hd, E)
        w2.append(w); b2.append(b)
    p['wqkv'] = jnp.stack(wqkv); p['bqkv'] = jnp.stack(bqkv)
    p['wo'] = jnp.stack(wo);     p['bo'] = jnp.stack(bo)
    p['w1'] = jnp.stack(w1);     p['b1'] = jnp.stack(b1)
    p['w2'] = jnp.stack(w2);     p['b2'] = jnp.stack(b2)
    p['ln1_g'] = jnp.ones((L, E), jnp.float32)
    p['ln1_b'] = jnp.zeros((L, E), jnp.float32)
    p['ln2_g'] = jnp.ones((L, E), jnp.float32)
    p['ln2_b'] = jnp.zeros((L, E), jnp.float32)
    return p


# ------------------------- host-side param packing --------------------------

def pack_params(params, *, B, T, num_heads):
    """Fold LN affines + 1/sqrt(Dh) scale into adjacent weights, pre-split the
    QKV / out-proj weights per head, and pack every operand into one [R, 128]
    f32 slab (8-row-aligned sections, lane offset 0) -> single DMA."""
    E = params['in_w'].shape[1]
    L = params['wqkv'].shape[0]
    Dh = E // num_heads
    scale = 1.0 / np.sqrt(Dh)

    blocks, layout = [], {}
    cursor = 0

    def add(name, mat, ncols=None):
        nonlocal cursor
        mat = jnp.asarray(mat, jnp.float32)
        if mat.ndim == 1:
            mat = mat.reshape(1, -1)
        nr, nc = mat.shape
        reg_nc = nc if ncols is None else ncols
        assert nc <= reg_nc <= 128
        nr_pad = -(-nr // 8) * 8
        blk = jnp.zeros((nr_pad, 128), jnp.float32).at[:nr, :nc].set(mat)
        blocks.append(blk)
        layout[name] = (cursor, nr, reg_nc)
        cursor += nr_pad

    # input projection; in_b folded into the pre-broadcast positional term
    add('in_w', params['in_w'])                                            # [Pd, E]
    pos_b = jnp.tile(params['pos_emb'][0, :T, :], (B, 1)) + params['in_b'][None, :]
    add('pos_b', pos_b)                                                    # [B*T, E]

    for l in range(L):
        g1, b1ln = params['ln1_g'][l], params['ln1_b'][l]
        wqkv = params['wqkv'][l] * g1[:, None]                 # fold LN1 gamma
        bqkv = b1ln @ params['wqkv'][l] + params['bqkv'][l]    # fold LN1 beta
        wqkv = wqkv.at[:, :E].multiply(scale)                  # fold attn scale (Q cols)
        bqkv = bqkv.at[:E].multiply(scale)
        for h in range(num_heads):
            c = h * Dh
            add(f'wq_{l}_{h}', wqkv[:, c:c + Dh])
            add(f'wk_{l}_{h}', wqkv[:, E + c:E + c + Dh])
            add(f'wv_{l}_{h}', wqkv[:, 2 * E + c:2 * E + c + Dh])
            add(f'bq_{l}_{h}', bqkv[c:c + Dh])
            add(f'bk_{l}_{h}', bqkv[E + c:E + c + Dh])
            add(f'bv_{l}_{h}', bqkv[2 * E + c:2 * E + c + Dh])
            add(f'wo_{l}_{h}', params['wo'][l][c:c + Dh, :])   # per-head out-proj rows
        add(f'bo_{l}', params['bo'][l])

        g2, b2ln = params['ln2_g'][l], params['ln2_b'][l]
        add(f'w1_{l}', params['w1'][l] * g2[:, None])          # fold LN2 gamma
        add(f'b1_{l}', b2ln @ params['w1'][l] + params['b1'][l])
        add(f'w2_{l}', params['w2'][l])
        add(f'b2_{l}', params['b2'][l])

    gh, bh = params['head_ln_g'], params['head_ln_b']
    # lane-dense head: register width 128 so the final matmul + store is unmasked
    add('head_w', params['head_w'] * gh[:, None], ncols=_OUT_LANES)
    add('head_b', bh @ params['head_w'] + params['head_b'], ncols=_OUT_LANES)

    wslab = jnp.concatenate(blocks, axis=0)                    # [R, 128]
    return wslab, layout


# ------------------------------ fused kernel --------------------------------

def _make_kernel(layout, *, B, T, E, num_heads, head_dim, num_layers):
    M = B * T

    def kernel(xm_ref, w_ref, out_ref):
        def Wv(name):                       # static, lane-offset-0 slab slice
            r0, nr, nc = layout[name]
            return w_ref[r0:r0 + nr, 0:nc]

        def ln(z):                          # affine-free LayerNorm (eps = 1e-5)
            mu = jnp.mean(z, axis=-1, keepdims=True)
            var = jnp.mean(jnp.square(z - mu), axis=-1, keepdims=True)
            return (z - mu) * lax.rsqrt(var + 1e-5)

        # input projection + (pos + in_b); dropout(p=0) == identity
        x = jnp.dot(xm_ref[...], Wv('in_w'),
                    preferred_element_type=jnp.float32) + Wv('pos_b')

        for l in range(num_layers):
            n1 = ln(x)
            acc = None
            for h in range(num_heads):      # static loop; no lane slices / concats
                q = jnp.dot(n1, Wv(f'wq_{l}_{h}'),
                            preferred_element_type=jnp.float32) + Wv(f'bq_{l}_{h}')
                k = jnp.dot(n1, Wv(f'wk_{l}_{h}'),
                            preferred_element_type=jnp.float32) + Wv(f'bk_{l}_{h}')
                v = jnp.dot(n1, Wv(f'wv_{l}_{h}'),
                            preferred_element_type=jnp.float32) + Wv(f'bv_{l}_{h}')
                q3 = q.reshape(B, T, head_dim)
                k3 = k.reshape(B, T, head_dim)
                v3 = v.reshape(B, T, head_dim)
                s = jnp.einsum('bqd,bkd->bqk', q3, k3,
                               preferred_element_type=jnp.float32)  # scale pre-folded
                s = s - jnp.max(s, axis=-1, keepdims=True)
                p = jnp.exp(s)
                p = p * pl.reciprocal(jnp.sum(p, axis=-1, keepdims=True), approx=True)
                o = jnp.einsum('bqk,bkd->bqd', p, v3,
                               preferred_element_type=jnp.float32)
                c = jnp.dot(o.reshape(M, head_dim), Wv(f'wo_{l}_{h}'),
                            preferred_element_type=jnp.float32)     # per-head out-proj
                acc = c if acc is None else acc + c
            x = x + acc + Wv(f'bo_{l}')                              # residual 1

            n2 = ln(x)
            m = jnp.dot(n2, Wv(f'w1_{l}'),
                        preferred_element_type=jnp.float32) + Wv(f'b1_{l}')
            m = 0.5 * m * (1.0 + lax.erf(m * _INV_SQRT2))            # exact GELU
            m = jnp.dot(m, Wv(f'w2_{l}'),
                        preferred_element_type=jnp.float32) + Wv(f'b2_{l}')
            x = x + m                                                # residual 2

        hn = ln(x)
        out = jnp.dot(hn, Wv('head_w'),
                      preferred_element_type=jnp.float32) + Wv('head_b')  # [M, 128]
        out_ref[...] = out.astype(out_ref.dtype)

    return kernel


# ------------------------------- forward glue --------------------------------

def build_forward(layout, slab_rows, *, B, T, patch_dim, embed_dim, num_heads,
                  num_layers, patch_size):
    head_dim = embed_dim // num_heads
    M = B * T
    kernel = _make_kernel(layout, B=B, T=T, E=embed_dim, num_heads=num_heads,
                          head_dim=head_dim, num_layers=num_layers)

    def forward_all(x, mask, mask_token, wslab):
        # patchify + mask-select: one tiny XLA fusion feeding the pallas_call
        patches = img_to_patch(x, patch_size)                       # [B, T, Pd]
        pm = jnp.where(mask[:, :, None], mask_token.reshape(1, 1, patch_dim), patches)
        xm = pm.reshape(M, patch_dim)
        return pl.pallas_call(
            kernel,
            out_shape=jax.ShapeDtypeStruct((M, _OUT_LANES), jnp.float32),
            grid=(1,),
            in_specs=[pl.BlockSpec((M, patch_dim), lambda i: (0, 0)),
                      pl.BlockSpec((slab_rows, 128), lambda i: (0, 0))],
            out_specs=pl.BlockSpec((M, _OUT_LANES), lambda i: (0, 0)),
            compiler_params=pltpu.CompilerParams(
                dimension_semantics=("arbitrary",)),
        )(xm, wslab)

    return jax.jit(forward_all)


def small_beit_mask_forward(forward_fn, wslab, mask_token, x, mask_key, *,
                            B, T, patch_dim):
    """Full model: jitted device forward + host-side masked-token gather."""
    # torch.rand(B, T) < 0.4 analogue (different RNG stream, same distribution)
    mask = jax.random.uniform(mask_key, (B, T)) < 0.4
    out_all = forward_fn(x, mask, mask_token, wslab)                 # [B*T, 128]

    # Single host sync AFTER the forward (dynamic-shape gather can't be jitted).
    mask_np = np.asarray(mask)
    mb, mp = np.nonzero(mask_np)
    out_np = np.asarray(out_all).reshape(B, T, _OUT_LANES)[mb, mp, :patch_dim]
    return jnp.asarray(out_np), (jnp.asarray(mb), jnp.asarray(mp))


# ---------------------------------- main -------------------------------------

if __name__ == "__main__":
    embed_dim, hidden_dim = 32, 64
    num_channels, num_heads, num_layers = 3, 4, 2
    patch_size = 4
    H = W = 16
    num_patches = (H // patch_size) * (W // patch_size)              # 16
    B = 2
    T = num_patches
    patch_dim = num_channels * patch_size ** 2                       # 48

    key = jax.random.PRNGKey(0)
    k_param, k_x, k_mask = jax.random.split(key, 3)

    params = init_params(k_param, embed_dim, hidden_dim, num_channels,
                         num_layers, patch_size, num_patches)
    wslab, layout = pack_params(params, B=B, T=T, num_heads=num_heads)
    forward_fn = build_forward(layout, wslab.shape[0], B=B, T=T,
                               patch_dim=patch_dim, embed_dim=embed_dim,
                               num_heads=num_heads, num_layers=num_layers,
                               patch_size=patch_size)

    x = jax.random.normal(k_x, (B, num_channels, H, W), jnp.float32)
    mask_token = params['mask_token'].reshape(patch_dim)

    out, (mb, mp) = small_beit_mask_forward(forward_fn, wslab, mask_token, x,
                                            k_mask, B=B, T=T, patch_dim=patch_dim)
    jax.block_until_ready(out)
    assert out.shape == (int(mb.shape[0]), patch_dim)
    print("KERNEL_OK")
</pallas_src>

<mosaic_0001>
module attributes {stable_mosaic.version = 11 : i64} {
  func.func @kernel(%arg0: i32, %arg1: memref<32x48xf32, #tpu.memory_space<vmem>>, %arg2: memref<1384x128xf32, #tpu.memory_space<vmem>>, %arg3: memref<32x128xf32, #tpu.memory_space<vmem>>) attributes {dimension_semantics = [#tpu.dimension_semantics<arbitrary>], iteration_bounds = array<i64: 1>, scalar_prefetch = 0 : i64, scratch_operands = 0 : i64, tpu.core_type = #tpu.core_type<tc>, window_params = [{pipeline_mode = #tpu.pipeline_mode<synchronous>, transform_indices = @transform_0, window_bounds = array<i64: 32, 48>}, {pipeline_mode = #tpu.pipeline_mode<synchronous>, transform_indices = @transform_1, window_bounds = array<i64: 1384, 128>}, {pipeline_mode = #tpu.pipeline_mode<synchronous>, transform_indices = @transform_2, window_bounds = array<i64: 32, 128>}]} {
    %c0 = arith.constant 0 : index
    %c0_0 = arith.constant 0 : index
    %0 = vector.load %arg1[%c0, %c0_0] : memref<32x48xf32, #tpu.memory_space<vmem>>, vector<32x48xf32>
    %c0_1 = arith.constant 0 : index
    %c0_2 = arith.constant 0 : index
    %1 = vector.load %arg2[%c0_1, %c0_2] : memref<1384x128xf32, #tpu.memory_space<vmem>>, vector<48x32xf32>
    %cst = arith.constant dense<0.000000e+00> : vector<32x32xf32>
    %2 = tpu.matmul %0, %1, %cst {dimension_numbers = #tpu.dot_dimension_numbers<[1], [0], [0], [1], [0, 0, 1, 1], [], []>} : vector<32x48xf32>, vector<48x32xf32>, vector<32x32xf32> -> vector<32x32xf32>
    %c48 = arith.constant 48 : index
    %c0_3 = arith.constant 0 : index
    %3 = vector.load %arg2[%c48, %c0_3] : memref<1384x128xf32, #tpu.memory_space<vmem>>, vector<32x32xf32>
    %4 = arith.addf %2, %3 : vector<32x32xf32>
    %cst_4 = arith.constant dense<0.000000e+00> : vector<32xf32>
    %5 = vector.multi_reduction <add>, %4, %cst_4 [1] : vector<32x32xf32> to vector<32xf32>
    %6 = vector.shape_cast %5 : vector<32xf32> to vector<32x1xf32>
    %cst_5 = arith.constant 3.200000e+01 : f32
    %7 = vector.broadcast %cst_5 : f32 to vector<32x1xf32>
    %8 = arith.divf %6, %7 : vector<32x1xf32>
    %9 = vector.broadcast %8 : vector<32x1xf32> to vector<32x32xf32>
    %10 = arith.subf %4, %9 : vector<32x32xf32>
    %11 = arith.mulf %10, %10 : vector<32x32xf32>
    %cst_6 = arith.constant dense<0.000000e+00> : vector<32xf32>
    %12 = vector.multi_reduction <add>, %11, %cst_6 [1] : vector<32x32xf32> to vector<32xf32>
    %13 = vector.shape_cast %12 : vector<32xf32> to vector<32x1xf32>
    %cst_7 = arith.constant 3.200000e+01 : f32
    %14 = vector.broadcast %cst_7 : f32 to vector<32x1xf32>
    %15 = arith.divf %13, %14 : vector<32x1xf32>
    %16 = vector.broadcast %8 : vector<32x1xf32> to vector<32x32xf32>
    %17 = arith.subf %4, %16 : vector<32x32xf32>
    %cst_8 = arith.constant 9.99999974E-6 : f32
    %18 = vector.broadcast %cst_8 : f32 to vector<32x1xf32>
    %19 = arith.addf %15, %18 : vector<32x1xf32>
    %20 = math.rsqrt %19 : vector<32x1xf32>
    %21 = vector.broadcast %20 : vector<32x1xf32> to vector<32x32xf32>
    %22 = arith.mulf %17, %21 : vector<32x32xf32>
    %c80 = arith.constant 80 : index
    %c0_9 = arith.constant 0 : index
    %23 = vector.load %arg2[%c80, %c0_9] : memref<1384x128xf32, #tpu.memory_space<vmem>>, vector<32x8xf32>
    %cst_10 = arith.constant dense<0.000000e+00> : vector<32x8xf32>
    %24 = tpu.matmul %22, %23, %cst_10 {dimension_numbers = #tpu.dot_dimension_numbers<[1], [0], [0], [1], [0, 0, 1, 1], [], []>} : vector<32x32xf32>, vector<32x8xf32>, vector<32x8xf32> -> vector<32x8xf32>
    %c176 = arith.constant 176 : index
    %c0_11 = arith.constant 0 : index
    %25 = vector.load %arg2[%c176, %c0_11] : memref<1384x128xf32, #tpu.memory_space<vmem>>, vector<1x8xf32>
    %26 = vector.broadcast %25 : vector<1x8xf32> to vector<32x8xf32>
    %27 = arith.addf %24, %26 : vector<32x8xf32>
    %c112 = arith.constant 112 : index
    %c0_12 = arith.constant 0 : index
    %28 = vector.load %arg2[%c112, %c0_12] : memref<1384x128xf32, #tpu.memory_space<vmem>>, vector<32x8xf32>
    %cst_13 = arith.constant dense<0.000000e+00> : vector<32x8xf32>
    %29 = tpu.matmul %22, %28, %cst_13 {dimension_numbers = #tpu.dot_dimension_numbers<[1], [0], [0], [1], [0, 0, 1, 1], [], []>} : vector<32x32xf32>, vector<32x8xf32>, vector<32x8xf32> -> vector<32x8xf32>
    %c184 = arith.constant 184 : index
    %c0_14 = arith.constant 0 : index
    %30 = vector.load %arg2[%c184, %c0_14] : memref<1384x128xf32, #tpu.memory_space<vmem>>, vector<1x8xf32>
    %31 = vector.broadcast %30 : vector<1x8xf32> to vector<32x8xf32>
    %32 = arith.addf %29, %31 : vector<32x8xf32>
    %c144 = arith.constant 144 : index
    %c0_15 = arith.constant 0 : index
    %33 = vector.load %arg2[%c144, %c0_15] : memref<1384x128xf32, #tpu.memory_space<vmem>>, vector<32x8xf32>
    %cst_16 = arith.constant dense<0.000000e+00> : vector<32x8xf32>
    %34 = tpu.matmul %22, %33, %cst_16 {dimension_numbers = #tpu.dot_dimension_numbers<[1], [0], [0], [1], [0, 0, 1, 1], [], []>} : vector<32x32xf32>, vector<32x8xf32>, vector<32x8xf32> -> vector<32x8xf32>
    %c192 = arith.constant 192 : index
    %c0_17 = arith.constant 0 : index
    %35 = vector.load %arg2[%c192, %c0_17] : memref<1384x128xf32, #tpu.memory_space<vmem>>, vector<1x8xf32>
    %36 = vector.broadcast %35 : vector<1x8xf32> to vector<32x8xf32>
    %37 = arith.addf %34, %36 : vector<32x8xf32>
    %38 = vector.shape_cast %27 : vector<32x8xf32> to vector<2x16x8xf32>
    %39 = vector.shape_cast %32 : vector<32x8xf32> to vector<2x16x8xf32>
    %40 = vector.shape_cast %37 : vector<32x8xf32> to vector<2x16x8xf32>
    "tpu.trace_start"() <{level = 10 : i32, message = "bqd,bkd->bqk"}> : () -> ()
    %cst_18 = arith.constant dense<0.000000e+00> : vector<2x16x16xf32>
    %41 = tpu.matmul %38, %39, %cst_18 {dimension_numbers = #tpu.dot_dimension_numbers<[2], [2], [1], [1], [0, 0, 0, 1, 1, 1], [0], [0]>} : vector<2x16x8xf32>, vector<2x16x8xf32>, vector<2x16x16xf32> -> vector<2x16x16xf32>
    "tpu.trace_stop"() : () -> ()
    %cst_19 = arith.constant dense<0xFF800000> : vector<2x16xf32>
    %42 = vector.multi_reduction <maximumf>, %41, %cst_19 [2] : vector<2x16x16xf32> to vector<2x16xf32>
    %43 = vector.shape_cast %42 : vector<2x16xf32> to vector<2x16x1xf32>
    %44 = vector.broadcast %43 : vector<2x16x1xf32> to vector<2x16x16xf32>
    %45 = arith.subf %41, %44 : vector<2x16x16xf32>
    %46 = math.exp %45 : vector<2x16x16xf32>
    %cst_20 = arith.constant dense<0.000000e+00> : vector<2x16xf32>
    %47 = vector.multi_reduction <add>, %46, %cst_20 [2] : vector<2x16x16xf32> to vector<2x16xf32>
    %48 = vector.shape_cast %47 : vector<2x16xf32> to vector<2x16x1xf32>
    %49 = tpu.reciprocal %48 {approx = true} : vector<2x16x1xf32> -> vector<2x16x1xf32>
    %50 = vector.broadcast %49 : vector<2x16x1xf32> to vector<2x16x16xf32>
    %51 = arith.mulf %46, %50 : vector<2x16x16xf32>
    "tpu.trace_start"() <{level = 10 : i32, message = "bqk,bkd->bqd"}> : () -> ()
    %cst_21 = arith.constant dense<0.000000e+00> : vector<2x16x8xf32>
    %52 = tpu.matmul %51, %40, %cst_21 {dimension_numbers = #tpu.dot_dimension_numbers<[2], [1], [1], [2], [0, 0, 0, 1, 1, 2], [0], [0]>} : vector<2x16x16xf32>, vector<2x16x8xf32>, vector<2x16x8xf32> -> vector<2x16x8xf32>
    "tpu.trace_stop"() : () -> ()
    %53 = vector.shape_cast %52 : vector<2x16x8xf32> to vector<32x8xf32>
    %c200 = arith.constant 200 : index
    %c0_22 = arith.constant 0 : index
    %54 = vector.load %arg2[%c200, %c0_22] : memref<1384x128xf32, #tpu.memory_space<vmem>>, vector<8x32xf32>
    %cst_23 = arith.constant dense<0.000000e+00> : vector<32x32xf32>
    %55 = tpu.matmul %53, %54, %cst_23 {dimension_numbers = #tpu.dot_dimension_numbers<[1], [0], [0], [1], [0, 0, 1, 1], [], []>} : vector<32x8xf32>, vector<8x32xf32>, vector<32x32xf32> -> vector<32x32xf32>
    %c208 = arith.constant 208 : index
    %c0_24 = arith.constant 0 : index
    %56 = vector.load %arg2[%c208, %c0_24] : memref<1384x128xf32, #tpu.memory_space<vmem>>, vector<32x8xf32>
    %cst_25 = arith.constant dense<0.000000e+00> : vector<32x8xf32>
    %57 = tpu.matmul %22, %56, %cst_25 {dimension_numbers = #tpu.dot_dimension_numbers<[1], [0], [0], [1], [0, 0, 1, 1], [], []>} : vector<32x32xf32>, vector<32x8xf32>, vector<32x8xf32> -> vector<32x8xf32>
    %c304 = arith.constant 304 : index
    %c0_26 = arith.constant 0 : index
    %58 = vector.load %arg2[%c304, %c0_26] : memref<1384x128xf32, #tpu.memory_space<vmem>>, vector<1x8xf32>
    %59 = vector.broadcast %58 : vector<1x8xf32> to vector<32x8xf32>
    %60 = arith.addf %57, %59 : vector<32x8xf32>
    %c240 = arith.constant 240 : index
    %c0_27 = arith.constant 0 : index
    %61 = vector.load %arg2[%c240, %c0_27] : memref<1384x128xf32, #tpu.memory_space<vmem>>, vector<32x8xf32>
    %cst_28 = arith.constant dense<0.000000e+00> : vector<32x8xf32>
    %62 = tpu.matmul %22, %61, %cst_28 {dimension_numbers = #tpu.dot_dimension_numbers<[1], [0], [0], [1], [0, 0, 1, 1], [], []>} : vector<32x32xf32>, vector<32x8xf32>, vector<32x8xf32> -> vector<32x8xf32>
    %c312 = arith.constant 312 : index
    %c0_29 = arith.constant 0 : index
    %63 = vector.load %arg2[%c312, %c0_29] : memref<1384x128xf32, #tpu.memory_space<vmem>>, vector<1x8xf32>
    %64 = vector.broadcast %63 : vector<1x8xf32> to vector<32x8xf32>
    %65 = arith.addf %62, %64 : vector<32x8xf32>
    %c272 = arith.constant 272 : index
    %c0_30 = arith.constant 0 : index
    %66 = vector.load %arg2[%c272, %c0_30] : memref<1384x128xf32, #tpu.memory_space<vmem>>, vector<32x8xf32>
    %cst_31 = arith.constant dense<0.000000e+00> : vector<32x8xf32>
    %67 = tpu.matmul %22, %66, %cst_31 {dimension_numbers = #tpu.dot_dimension_numbers<[1], [0], [0], [1], [0, 0, 1, 1], [], []>} : vector<32x32xf32>, vector<32x8xf32>, vector<32x8xf32> -> vector<32x8xf32>
    %c320 = arith.constant 320 : index
    %c0_32 = arith.constant 0 : index
    %68 = vector.load %arg2[%c320, %c0_32] : memref<1384x128xf32, #tpu.memory_space<vmem>>, vector<1x8xf32>
    %69 = vector.broadcast %68 : vector<1x8xf32> to vector<32x8xf32>
    %70 = arith.addf %67, %69 : vector<32x8xf32>
    %71 = vector.shape_cast %60 : vector<32x8xf32> to vector<2x16x8xf32>
    %72 = vector.shape_cast %65 : vector<32x8xf32> to vector<2x16x8xf32>
    %73 = vector.shape_cast %70 : vector<32x8xf32> to vector<2x16x8xf32>
    "tpu.trace_start"() <{level = 10 : i32, message = "bqd,bkd->bqk"}> : () -> ()
    %cst_33 = arith.constant dense<0.000000e+00> : vector<2x16x16xf32>
    %74 = tpu.matmul %71, %72, %cst_33 {dimension_numbers = #tpu.dot_dimension_numbers<[2], [2], [1], [1], [0, 0, 0, 1, 1, 1], [0], [0]>} : vector<2x16x8xf32>, vector<2x16x8xf32>, vector<2x16x16xf32> -> vector<2x16x16xf32>
    "tpu.trace_stop"() : () -> ()
    %cst_34 = arith.constant dense<0xFF800000> : vector<2x16xf32>
    %75 = vector.multi_reduction <maximumf>, %74, %cst_34 [2] : vector<2x16x16xf32> to vector<2x16xf32>
    %76 = vector.shape_cast %75 : vector<2x16xf32> to vector<2x16x1xf32>
    %77 = vector.broadcast %76 : vector<2x16x1xf32> to vector<2x16x16xf32>
    %78 = arith.subf %74, %77 : vector<2x16x16xf32>
    %79 = math.exp %78 : vector<2x16x16xf32>
    %cst_35 = arith.constant dense<0.000000e+00> : vector<2x16xf32>
    %80 = vector.multi_reduction <add>, %79, %cst_35 [2] : vector<2x16x16xf32> to vector<2x16xf32>
    %81 = vector.shape_cast %80 : vector<2x16xf32> to vector<2x16x1xf32>
    %82 = tpu.reciprocal %81 {approx = true} : vector<2x16x1xf32> -> vector<2x16x1xf32>
    %83 = vector.broadcast %82 : vector<2x16x1xf32> to vector<2x16x16xf32>
    %84 = arith.mulf %79, %83 : vector<2x16x16xf32>
    "tpu.trace_start"() <{level = 10 : i32, message = "bqk,bkd->bqd"}> : () -> ()
    %cst_36 = arith.constant dense<0.000000e+00> : vector<2x16x8xf32>
    %85 = tpu.matmul %84, %73, %cst_36 {dimension_numbers = #tpu.dot_dimension_numbers<[2], [1], [1], [2], [0, 0, 0, 1, 1, 2], [0], [0]>} : vector<2x16x16xf32>, vector<2x16x8xf32>, vector<2x16x8xf32> -> vector<2x16x8xf32>
    "tpu.trace_stop"() : () -> ()
    %86 = vector.shape_cast %85 : vector<2x16x8xf32> to vector<32x8xf32>
    %c328 = arith.constant 328 : index
    %c0_37 = arith.constant 0 : index
    %87 = vector.load %arg2[%c328, %c0_37] : memref<1384x128xf32, #tpu.memory_space<vmem>>, vector<8x32xf32>
    %cst_38 = arith.constant dense<0.000000e+00> : vector<32x32xf32>
    %88 = tpu.matmul %86, %87, %cst_38 {dimension_numbers = #tpu.dot_dimension_numbers<[1], [0], [0], [1], [0, 0, 1, 1], [], []>} : vector<32x8xf32>, vector<8x32xf32>, vector<32x32xf32> -> vector<32x32xf32>
    %89 = arith.addf %55, %88 : vector<32x32xf32>
    %c336 = arith.constant 336 : index
    %c0_39 = arith.constant 0 : index
    %90 = vector.load %arg2[%c336, %c0_39] : memref<1384x128xf32, #tpu.memory_space<vmem>>, vector<32x8xf32>
    %cst_40 = arith.constant dense<0.000000e+00> : vector<32x8xf32>
    %91 = tpu.matmul %22, %90, %cst_40 {dimension_numbers = #tpu.dot_dimension_numbers<[1], [0], [0], [1], [0, 0, 1, 1], [], []>} : vector<32x32xf32>, vector<32x8xf32>, vector<32x8xf32> -> vector<32x8xf32>
    %c432 = arith.constant 432 : index
    %c0_41 = arith.constant 0 : index
    %92 = vector.load %arg2[%c432, %c0_41] : memref<1384x128xf32, #tpu.memory_space<vmem>>, vector<1x8xf32>
    %93 = vector.broadcast %92 : vector<1x8xf32> to vector<32x8xf32>
    %94 = arith.addf %91, %93 : vector<32x8xf32>
    %c368 = arith.constant 368 : index
    %c0_42 = arith.constant 0 : index
    %95 = vector.load %arg2[%c368, %c0_42] : memref<1384x128xf32, #tpu.memory_space<vmem>>, vector<32x8xf32>
    %cst_43 = arith.constant dense<0.000000e+00> : vector<32x8xf32>
    %96 = tpu.matmul %22, %95, %cst_43 {dimension_numbers = #tpu.dot_dimension_numbers<[1], [0], [0], [1], [0, 0, 1, 1], [], []>} : vector<32x32xf32>, vector<32x8xf32>, vector<32x8xf32> -> vector<32x8xf32>
    %c440 = arith.constant 440 : index
    %c0_44 = arith.constant 0 : index
    %97 = vector.load %arg2[%c440, %c0_44] : memref<1384x128xf32, #tpu.memory_space<vmem>>, vector<1x8xf32>
    %98 = vector.broadcast %97 : vector<1x8xf32> to vector<32x8xf32>
    %99 = arith.addf %96, %98 : vector<32x8xf32>
    %c400 = arith.constant 400 : index
    %c0_45 = arith.constant 0 : index
    %100 = vector.load %arg2[%c400, %c0_45] : memref<1384x128xf32, #tpu.memory_space<vmem>>, vector<32x8xf32>
    %cst_46 = arith.constant dense<0.000000e+00> : vector<32x8xf32>
    %101 = tpu.matmul %22, %100, %cst_46 {dimension_numbers = #tpu.dot_dimension_numbers<[1], [0], [0], [1], [0, 0, 1, 1], [], []>} : vector<32x32xf32>, vector<32x8xf32>, vector<32x8xf32> -> vector<32x8xf32>
    %c448 = arith.constant 448 : index
    %c0_47 = arith.constant 0 : index
    %102 = vector.load %arg2[%c448, %c0_47] : memref<1384x128xf32, #tpu.memory_space<vmem>>, vector<1x8xf32>
    %103 = vector.broadcast %102 : vector<1x8xf32> to vector<32x8xf32>
    %104 = arith.addf %101, %103 : vector<32x8xf32>
    %105 = vector.shape_cast %94 : vector<32x8xf32> to vector<2x16x8xf32>
    %106 = vector.shape_cast %99 : vector<32x8xf32> to vector<2x16x8xf32>
    %107 = vector.shape_cast %104 : vector<32x8xf32> to vector<2x16x8xf32>
    "tpu.trace_start"() <{level = 10 : i32, message = "bqd,bkd->bqk"}> : () -> ()
    %cst_48 = arith.constant dense<0.000000e+00> : vector<2x16x16xf32>
    %108 = tpu.matmul %105, %106, %cst_48 {dimension_numbers = #tpu.dot_dimension_numbers<[2], [2], [1], [1], [0, 0, 0, 1, 1, 1], [0], [0]>} : vector<2x16x8xf32>, vector<2x16x8xf32>, vector<2x16x16xf32> -> vector<2x16x16xf32>
    "tpu.trace_stop"() : () -> ()
    %cst_49 = arith.constant dense<0xFF800000> : vector<2x16xf32>
    %109 = vector.multi_reduction <maximumf>, %108, %cst_49 [2] : vector<2x16x16xf32> to vector<2x16xf32>
    %110 = vector.shape_cast %109 : vector<2x16xf32> to vector<2x16x1xf32>
    %111 = vector.broadcast %110 : vector<2x16x1xf32> to vector<2x16x16xf32>
    %112 = arith.subf %108, %111 : vector<2x16x16xf32>
    %113 = math.exp %112 : vector<2x16x16xf32>
    %cst_50 = arith.constant dense<0.000000e+00> : vector<2x16xf32>
    %114 = vector.multi_reduction <add>, %113, %cst_50 [2] : vector<2x16x16xf32> to vector<2x16xf32>
    %115 = vector.shape_cast %114 : vector<2x16xf32> to vector<2x16x1xf32>
    %116 = tpu.reciprocal %115 {approx = true} : vector<2x16x1xf32> -> vector<2x16x1xf32>
    %117 = vector.broadcast %116 : vector<2x16x1xf32> to vector<2x16x16xf32>
    %118 = arith.mulf %113, %117 : vector<2x16x16xf32>
    "tpu.trace_start"() <{level = 10 : i32, message = "bqk,bkd->bqd"}> : () -> ()
    %cst_51 = arith.constant dense<0.000000e+00> : vector<2x16x8xf32>
    %119 = tpu.matmul %118, %107, %cst_51 {dimension_numbers = #tpu.dot_dimension_numbers<[2], [1], [1], [2], [0, 0, 0, 1, 1, 2], [0], [0]>} : vector<2x16x16xf32>, vector<2x16x8xf32>, vector<2x16x8xf32> -> vector<2x16x8xf32>
    "tpu.trace_stop"() : () -> ()
    %120 = vector.shape_cast %119 : vector<2x16x8xf32> to vector<32x8xf32>
    %c456 = arith.constant 456 : index
    %c0_52 = arith.constant 0 : index
    %121 = vector.load %arg2[%c456, %c0_52] : memref<1384x128xf32, #tpu.memory_space<vmem>>, vector<8x32xf32>
    %cst_53 = arith.constant dense<0.000000e+00> : vector<32x32xf32>
    %122 = tpu.matmul %120, %121, %cst_53 {dimension_numbers = #tpu.dot_dimension_numbers<[1], [0], [0], [1], [0, 0, 1, 1], [], []>} : vector<32x8xf32>, vector<8x32xf32>, vector<32x32xf32> -> vector<32x32xf32>
    %123 = arith.addf %89, %122 : vector<32x32xf32>
    %c464 = arith.constant 464 : index
    %c0_54 = arith.constant 0 : index
    %124 = vector.load %arg2[%c464, %c0_54] : memref<1384x128xf32, #tpu.memory_space<vmem>>, vector<32x8xf32>
    %cst_55 = arith.constant dense<0.000000e+00> : vector<32x8xf32>
    %125 = tpu.matmul %22, %124, %cst_55 {dimension_numbers = #tpu.dot_dimension_numbers<[1], [0], [0], [1], [0, 0, 1, 1], [], []>} : vector<32x32xf32>, vector<32x8xf32>, vector<32x8xf32> -> vector<32x8xf32>
    %c560 = arith.constant 560 : index
    %c0_56 = arith.constant 0 : index
    %126 = vector.load %arg2[%c560, %c0_56] : memref<1384x128xf32, #tpu.memory_space<vmem>>, vector<1x8xf32>
    %127 = vector.broadcast %126 : vector<1x8xf32> to vector<32x8xf32>
    %128 = arith.addf %125, %127 : vector<32x8xf32>
    %c496 = arith.constant 496 : index
    %c0_57 = arith.constant 0 : index
    %129 = vector.load %arg2[%c496, %c0_57] : memref<1384x128xf32, #tpu.memory_space<vmem>>, vector<32x8xf32>
    %cst_58 = arith.constant dense<0.000000e+00> : vector<32x8xf32>
    %130 = tpu.matmul %22, %129, %cst_58 {dimension_numbers = #tpu.dot_dimension_numbers<[1], [0], [0], [1], [0, 0, 1, 1], [], []>} : vector<32x32xf32>, vector<32x8xf32>, vector<32x8xf32> -> vector<32x8xf32>
    %c568 = arith.constant 568 : index
    %c0_59 = arith.constant 0 : index
    %131 = vector.load %arg2[%c568, %c0_59] : memref<1384x128xf32, #tpu.memory_space<vmem>>, vector<1x8xf32>
    %132 = vector.broadcast %131 : vector<1x8xf32> to vector<32x8xf32>
    %133 = arith.addf %130, %132 : vector<32x8xf32>
    %c528 = arith.constant 528 : index
    %c0_60 = arith.constant 0 : index
    %134 = vector.load %arg2[%c528, %c0_60] : memref<1384x128xf32, #tpu.memory_space<vmem>>, vector<32x8xf32>
    %cst_61 = arith.constant dense<0.000000e+00> : vector<32x8xf32>
    %135 = tpu.matmul %22, %134, %cst_61 {dimension_numbers = #tpu.dot_dimension_numbers<[1], [0], [0], [1], [0, 0, 1, 1], [], []>} : vector<32x32xf32>, vector<32x8xf32>, vector<32x8xf32> -> vector<32x8xf32>
    %c576 = arith.constant 576 : index
    %c0_62 = arith.constant 0 : index
    %136 = vector.load %arg2[%c576, %c0_62] : memref<1384x128xf32, #tpu.memory_space<vmem>>, vector<1x8xf32>
    %137 = vector.broadcast %136 : vector<1x8xf32> to vector<32x8xf32>
    %138 = arith.addf %135, %137 : vector<32x8xf32>
    %139 = vector.shape_cast %128 : vector<32x8xf32> to vector<2x16x8xf32>
    %140 = vector.shape_cast %133 : vector<32x8xf32> to vector<2x16x8xf32>
    %141 = vector.shape_cast %138 : vector<32x8xf32> to vector<2x16x8xf32>
    "tpu.trace_start"() <{level = 10 : i32, message = "bqd,bkd->bqk"}> : () -> ()
    %cst_63 = arith.constant dense<0.000000e+00> : vector<2x16x16xf32>
    %142 = tpu.matmul %139, %140, %cst_63 {dimension_numbers = #tpu.dot_dimension_numbers<[2], [2], [1], [1], [0, 0, 0, 1, 1, 1], [0], [0]>} : vector<2x16x8xf32>, vector<2x16x8xf32>, vector<2x16x16xf32> -> vector<2x16x16xf32>
    "tpu.trace_stop"() : () -> ()
    %cst_64 = arith.constant dense<0xFF800000> : vector<2x16xf32>
    %143 = vector.multi_reduction <maximumf>, %142, %cst_64 [2] : vector<2x16x16xf32> to vector<2x16xf32>
    %144 = vector.shape_cast %143 : vector<2x16xf32> to vector<2x16x1xf32>
    %145 = vector.broadcast %144 : vector<2x16x1xf32> to vector<2x16x16xf32>
    %146 = arith.subf %142, %145 : vector<2x16x16xf32>
    %147 = math.exp %146 : vector<2x16x16xf32>
    %cst_65 = arith.constant dense<0.000000e+00> : vector<2x16xf32>
    %148 = vector.multi_reduction <add>, %147, %cst_65 [2] : vector<2x16x16xf32> to vector<2x16xf32>
    %149 = vector.shape_cast %148 : vector<2x16xf32> to vector<2x16x1xf32>
    %150 = tpu.reciprocal %149 {approx = true} : vector<2x16x1xf32> -> vector<2x16x1xf32>
    %151 = vector.broadcast %150 : vector<2x16x1xf32> to vector<2x16x16xf32>
    %152 = arith.mulf %147, %151 : vector<2x16x16xf32>
    "tpu.trace_start"() <{level = 10 : i32, message = "bqk,bkd->bqd"}> : () -> ()
    %cst_66 = arith.constant dense<0.000000e+00> : vector<2x16x8xf32>
    %153 = tpu.matmul %152, %141, %cst_66 {dimension_numbers = #tpu.dot_dimension_numbers<[2], [1], [1], [2], [0, 0, 0, 1, 1, 2], [0], [0]>} : vector<2x16x16xf32>, vector<2x16x8xf32>, vector<2x16x8xf32> -> vector<2x16x8xf32>
    "tpu.trace_stop"() : () -> ()
    %154 = vector.shape_cast %153 : vector<2x16x8xf32> to vector<32x8xf32>
    %c584 = arith.constant 584 : index
    %c0_67 = arith.constant 0 : index
    %155 = vector.load %arg2[%c584, %c0_67] : memref<1384x128xf32, #tpu.memory_space<vmem>>, vector<8x32xf32>
    %cst_68 = arith.constant dense<0.000000e+00> : vector<32x32xf32>
    %156 = tpu.matmul %154, %155, %cst_68 {dimension_numbers = #tpu.dot_dimension_numbers<[1], [0], [0], [1], [0, 0, 1, 1], [], []>} : vector<32x8xf32>, vector<8x32xf32>, vector<32x32xf32> -> vector<32x32xf32>
    %157 = arith.addf %123, %156 : vector<32x32xf32>
    %158 = arith.addf %4, %157 : vector<32x32xf32>
    %c592 = arith.constant 592 : index
    %c0_69 = arith.constant 0 : index
    %159 = vector.load %arg2[%c592, %c0_69] : memref<1384x128xf32, #tpu.memory_space<vmem>>, vector<1x32xf32>
    %160 = vector.broadcast %159 : vector<1x32xf32> to vector<32x32xf32>
    %161 = arith.addf %158, %160 : vector<32x32xf32>
    %cst_70 = arith.constant dense<0.000000e+00> : vector<32xf32>
    %162 = vector.multi_reduction <add>, %161, %cst_70 [1] : vector<32x32xf32> to vector<32xf32>
    %163 = vector.shape_cast %162 : vector<32xf32> to vector<32x1xf32>
    %cst_71 = arith.constant 3.200000e+01 : f32
    %164 = vector.broadcast %cst_71 : f32 to vector<32x1xf32>
    %165 = arith.divf %163, %164 : vector<32x1xf32>
    %166 = vector.broadcast %165 : vector<32x1xf32> to vector<32x32xf32>
    %167 = arith.subf %161, %166 : vector<32x32xf32>
    %168 = arith.mulf %167, %167 : vector<32x32xf32>
    %cst_72 = arith.constant dense<0.000000e+00> : vector<32xf32>
    %169 = vector.multi_reduction <add>, %168, %cst_72 [1] : vector<32x32xf32> to vector<32xf32>
    %170 = vector.shape_cast %169 : vector<32xf32> to vector<32x1xf32>
    %cst_73 = arith.constant 3.200000e+01 : f32
    %171 = vector.broadcast %cst_73 : f32 to vector<32x1xf32>
    %172 = arith.divf %170, %171 : vector<32x1xf32>
    %173 = vector.broadcast %165 : vector<32x1xf32> to vector<32x32xf32>
    %174 = arith.subf %161, %173 : vector<32x32xf32>
    %cst_74 = arith.constant 9.99999974E-6 : f32
    %175 = vector.broadcast %cst_74 : f32 to vector<32x1xf32>
    %176 = arith.addf %172, %175 : vector<32x1xf32>
    %177 = math.rsqrt %176 : vector<32x1xf32>
    %178 = vector.broadcast %177 : vector<32x1xf32> to vector<32x32xf32>
    %179 = arith.mulf %174, %178 : vector<32x32xf32>
    %c600 = arith.constant 600 : index
    %c0_75 = arith.constant 0 : index
    %180 = vector.load %arg2[%c600, %c0_75] : memref<1384x128xf32, #tpu.memory_space<vmem>>, vector<32x64xf32>
    %cst_76 = arith.constant dense<0.000000e+00> : vector<32x64xf32>
    %181 = tpu.matmul %179, %180, %cst_76 {dimension_numbers = #tpu.dot_dimension_numbers<[1], [0], [0], [1], [0, 0, 1, 1], [], []>} : vector<32x32xf32>, vector<32x64xf32>, vector<32x64xf32> -> vector<32x64xf32>
    %c632 = arith.constant 632 : index
    %c0_77 = arith.constant 0 : index
    %182 = vector.load %arg2[%c632, %c0_77] : memref<1384x128xf32, #tpu.memory_space<vmem>>, vector<1x64xf32>
    %183 = vector.broadcast %182 : vector<1x64xf32> to vector<32x64xf32>
    %184 = arith.addf %181, %183 : vector<32x64xf32>
    %cst_78 = arith.constant 5.000000e-01 : f32
    %185 = vector.broadcast %cst_78 : f32 to vector<32x64xf32>
    %186 = arith.mulf %185, %184 : vector<32x64xf32>
    %cst_79 = arith.constant 0.707106769 : f32
    %187 = vector.broadcast %cst_79 : f32 to vector<32x64xf32>
    %188 = arith.mulf %184, %187 : vector<32x64xf32>
    %189 = math.erf %188 : vector<32x64xf32>
    %cst_80 = arith.constant 1.000000e+00 : f32
    %190 = vector.broadcast %cst_80 : f32 to vector<32x64xf32>
    %191 = arith.addf %190, %189 : vector<32x64xf32>
    %192 = arith.mulf %186, %191 : vector<32x64xf32>
    %c640 = arith.constant 640 : index
    %c0_81 = arith.constant 0 : index
    %193 = vector.load %arg2[%c640, %c0_81] : memref<1384x128xf32, #tpu.memory_space<vmem>>, vector<64x32xf32>
    %cst_82 = arith.constant dense<0.000000e+00> : vector<32x32xf32>
    %194 = tpu.matmul %192, %193, %cst_82 {dimension_numbers = #tpu.dot_dimension_numbers<[1], [0], [0], [1], [0, 0, 1, 1], [], []>} : vector<32x64xf32>, vector<64x32xf32>, vector<32x32xf32> -> vector<32x32xf32>
    %c704 = arith.constant 704 : index
    %c0_83 = arith.constant 0 : index
    %195 = vector.load %arg2[%c704, %c0_83] : memref<1384x128xf32, #tpu.memory_space<vmem>>, vector<1x32xf32>
    %196 = vector.broadcast %195 : vector<1x32xf32> to vector<32x32xf32>
    %197 = arith.addf %194, %196 : vector<32x32xf32>
    %198 = arith.addf %161, %197 : vector<32x32xf32>
    %cst_84 = arith.constant dense<0.000000e+00> : vector<32xf32>
    %199 = vector.multi_reduction <add>, %198, %cst_84 [1] : vector<32x32xf32> to vector<32xf32>
    %200 = vector.shape_cast %199 : vector<32xf32> to vector<32x1xf32>
    %cst_85 = arith.constant 3.200000e+01 : f32
    %201 = vector.broadcast %cst_85 : f32 to vector<32x1xf32>
    %202 = arith.divf %200, %201 : vector<32x1xf32>
    %203 = vector.broadcast %202 : vector<32x1xf32> to vector<32x32xf32>
    %204 = arith.subf %198, %203 : vector<32x32xf32>
    %205 = arith.mulf %204, %204 : vector<32x32xf32>
    %cst_86 = arith.constant dense<0.000000e+00> : vector<32xf32>
    %206 = vector.multi_reduction <add>, %205, %cst_86 [1] : vector<32x32xf32> to vector<32xf32>
    %207 = vector.shape_cast %206 : vector<32xf32> to vector<32x1xf32>
    %cst_87 = arith.constant 3.200000e+01 : f32
    %208 = vector.broadcast %cst_87 : f32 to vector<32x1xf32>
    %209 = arith.divf %207, %208 : vector<32x1xf32>
    %210 = vector.broadcast %202 : vector<32x1xf32> to vector<32x32xf32>
    %211 = arith.subf %198, %210 : vector<32x32xf32>
    %cst_88 = arith.constant 9.99999974E-6 : f32
    %212 = vector.broadcast %cst_88 : f32 to vector<32x1xf32>
    %213 = arith.addf %209, %212 : vector<32x1xf32>
    %214 = math.rsqrt %213 : vector<32x1xf32>
    %215 = vector.broadcast %214 : vector<32x1xf32> to vector<32x32xf32>
    %216 = arith.mulf %211, %215 : vector<32x32xf32>
    %c712 = arith.constant 712 : index
    %c0_89 = arith.constant 0 : index
    %217 = vector.load %arg2[%c712, %c0_89] : memref<1384x128xf32, #tpu.memory_space<vmem>>, vector<32x8xf32>
    %cst_90 = arith.constant dense<0.000000e+00> : vector<32x8xf32>
    %218 = tpu.matmul %216, %217, %cst_90 {dimension_numbers = #tpu.dot_dimension_numbers<[1], [0], [0], [1], [0, 0, 1, 1], [], []>} : vector<32x32xf32>, vector<32x8xf32>, vector<32x8xf32> -> vector<32x8xf32>
    %c808 = arith.constant 808 : index
    %c0_91 = arith.constant 0 : index
    %219 = vector.load %arg2[%c808, %c0_91] : memref<1384x128xf32, #tpu.memory_space<vmem>>, vector<1x8xf32>
    %220 = vector.broadcast %219 : vector<1x8xf32> to vector<32x8xf32>
    %221 = arith.addf %218, %220 : vector<32x8xf32>
    %c744 = arith.constant 744 : index
    %c0_92 = arith.constant 0 : index
    %222 = vector.load %arg2[%c744, %c0_92] : memref<1384x128xf32, #tpu.memory_space<vmem>>, vector<32x8xf32>
    %cst_93 = arith.constant dense<0.000000e+00> : vector<32x8xf32>
    %223 = tpu.matmul %216, %222, %cst_93 {dimension_numbers = #tpu.dot_dimension_numbers<[1], [0], [0], [1], [0, 0, 1, 1], [], []>} : vector<32x32xf32>, vector<32x8xf32>, vector<32x8xf32> -> vector<32x8xf32>
    %c816 = arith.constant 816 : index
    %c0_94 = arith.constant 0 : index
    %224 = vector.load %arg2[%c816, %c0_94] : memref<1384x128xf32, #tpu.memory_space<vmem>>, vector<1x8xf32>
    %225 = vector.broadcast %224 : vector<1x8xf32> to vector<32x8xf32>
    %226 = arith.addf %223, %225 : vector<32x8xf32>
    %c776 = arith.constant 776 : index
    %c0_95 = arith.constant 0 : index
    %227 = vector.load %arg2[%c776, %c0_95] : memref<1384x128xf32, #tpu.memory_space<vmem>>, vector<32x8xf32>
    %cst_96 = arith.constant dense<0.000000e+00> : vector<32x8xf32>
    %228 = tpu.matmul %216, %227, %cst_96 {dimension_numbers = #tpu.dot_dimension_numbers<[1], [0], [0], [1], [0, 0, 1, 1], [], []>} : vector<32x32xf32>, vector<32x8xf32>, vector<32x8xf32> -> vector<32x8xf32>
    %c824 = arith.constant 824 : index
    %c0_97 = arith.constant 0 : index
    %229 = vector.load %arg2[%c824, %c0_97] : memref<1384x128xf32, #tpu.memory_space<vmem>>, vector<1x8xf32>
    %230 = vector.broadcast %229 : vector<1x8xf32> to vector<32x8xf32>
    %231 = arith.addf %228, %230 : vector<32x8xf32>
    %232 = vector.shape_cast %221 : vector<32x8xf32> to vector<2x16x8xf32>
    %233 = vector.shape_cast %226 : vector<32x8xf32> to vector<2x16x8xf32>
    %234 = vector.shape_cast %231 : vector<32x8xf32> to vector<2x16x8xf32>
    "tpu.trace_start"() <{level = 10 : i32, message = "bqd,bkd->bqk"}> : () -> ()
    %cst_98 = arith.constant dense<0.000000e+00> : vector<2x16x16xf32>
    %235 = tpu.matmul %232, %233, %cst_98 {dimension_numbers = #tpu.dot_dimension_numbers<[2], [2], [1], [1], [0, 0, 0, 1, 1, 1], [0], [0]>} : vector<2x16x8xf32>, vector<2x16x8xf32>, vector<2x16x16xf32> -> vector<2x16x16xf32>
    "tpu.trace_stop"() : () -> ()
    %cst_99 = arith.constant dense<0xFF800000> : vector<2x16xf32>
    %236 = vector.multi_reduction <maximumf>, %235, %cst_99 [2] : vector<2x16x16xf32> to vector<2x16xf32>
    %237 = vector.shape_cast %236 : vector<2x16xf32> to vector<2x16x1xf32>
    %238 = vector.broadcast %237 : vector<2x16x1xf32> to vector<2x16x16xf32>
    %239 = arith.subf %235, %238 : vector<2x16x16xf32>
    %240 = math.exp %239 : vector<2x16x16xf32>
    %cst_100 = arith.constant dense<0.000000e+00> : vector<2x16xf32>
    %241 = vector.multi_reduction <add>, %240, %cst_100 [2] : vector<2x16x16xf32> to vector<2x16xf32>
    %242 = vector.shape_cast %241 : vector<2x16xf32> to vector<2x16x1xf32>
    %243 = tpu.reciprocal %242 {approx = true} : vector<2x16x1xf32> -> vector<2x16x1xf32>
    %244 = vector.broadcast %243 : vector<2x16x1xf32> to vector<2x16x16xf32>
    %245 = arith.mulf %240, %244 : vector<2x16x16xf32>
    "tpu.trace_start"() <{level = 10 : i32, message = "bqk,bkd->bqd"}> : () -> ()
    %cst_101 = arith.constant dense<0.000000e+00> : vector<2x16x8xf32>
    %246 = tpu.matmul %245, %234, %cst_101 {dimension_numbers = #tpu.dot_dimension_numbers<[2], [1], [1], [2], [0, 0, 0, 1, 1, 2], [0], [0]>} : vector<2x16x16xf32>, vector<2x16x8xf32>, vector<2x16x8xf32> -> vector<2x16x8xf32>
    "tpu.trace_stop"() : () -> ()
    %247 = vector.shape_cast %246 : vector<2x16x8xf32> to vector<32x8xf32>
    %c832 = arith.constant 832 : index
    %c0_102 = arith.constant 0 : index
    %248 = vector.load %arg2[%c832, %c0_102] : memref<1384x128xf32, #tpu.memory_space<vmem>>, vector<8x32xf32>
    %cst_103 = arith.constant dense<0.000000e+00> : vector<32x32xf32>
    %249 = tpu.matmul %247, %248, %cst_103 {dimension_numbers = #tpu.dot_dimension_numbers<[1], [0], [0], [1], [0, 0, 1, 1], [], []>} : vector<32x8xf32>, vector<8x32xf32>, vector<32x32xf32> -> vector<32x32xf32>
    %c840 = arith.constant 840 : index
    %c0_104 = arith.constant 0 : index
    %250 = vector.load %arg2[%c840, %c0_104] : memref<1384x128xf32, #tpu.memory_space<vmem>>, vector<32x8xf32>
    %cst_105 = arith.constant dense<0.000000e+00> : vector<32x8xf32>
    %251 = tpu.matmul %216, %250, %cst_105 {dimension_numbers = #tpu.dot_dimension_numbers<[1], [0], [0], [1], [0, 0, 1, 1], [], []>} : vector<32x32xf32>, vector<32x8xf32>, vector<32x8xf32> -> vector<32x8xf32>
    %c936 = arith.constant 936 : index
    %c0_106 = arith.constant 0 : index
    %252 = vector.load %arg2[%c936, %c0_106] : memref<1384x128xf32, #tpu.memory_space<vmem>>, vector<1x8xf32>
    %253 = vector.broadcast %252 : vector<1x8xf32> to vector<32x8xf32>
    %254 = arith.addf %251, %253 : vector<32x8xf32>
    %c872 = arith.constant 872 : index
    %c0_107 = arith.constant 0 : index
    %255 = vector.load %arg2[%c872, %c0_107] : memref<1384x128xf32, #tpu.memory_space<vmem>>, vector<32x8xf32>
    %cst_108 = arith.constant dense<0.000000e+00> : vector<32x8xf32>
    %256 = tpu.matmul %216, %255, %cst_108 {dimension_numbers = #tpu.dot_dimension_numbers<[1], [0], [0], [1], [0, 0, 1, 1], [], []>} : vector<32x32xf32>, vector<32x8xf32>, vector<32x8xf32> -> vector<32x8xf32>
    %c944 = arith.constant 944 : index
    %c0_109 = arith.constant 0 : index
    %257 = vector.load %arg2[%c944, %c0_109] : memref<1384x128xf32, #tpu.memory_space<vmem>>, vector<1x8xf32>
    %258 = vector.broadcast %257 : vector<1x8xf32> to vector<32x8xf32>
    %259 = arith.addf %256, %258 : vector<32x8xf32>
    %c904 = arith.constant 904 : index
    %c0_110 = arith.constant 0 : index
    %260 = vector.load %arg2[%c904, %c0_110] : memref<1384x128xf32, #tpu.memory_space<vmem>>, vector<32x8xf32>
    %cst_111 = arith.constant dense<0.000000e+00> : vector<32x8xf32>
    %261 = tpu.matmul %216, %260, %cst_111 {dimension_numbers = #tpu.dot_dimension_numbers<[1], [0], [0], [1], [0, 0, 1, 1], [], []>} : vector<32x32xf32>, vector<32x8xf32>, vector<32x8xf32> -> vector<32x8xf32>
    %c952 = arith.constant 952 : index
    %c0_112 = arith.constant 0 : index
    %262 = vector.load %arg2[%c952, %c0_112] : memref<1384x128xf32, #tpu.memory_space<vmem>>, vector<1x8xf32>
    %263 = vector.broadcast %262 : vector<1x8xf32> to vector<32x8xf32>
    %264 = arith.addf %261, %263 : vector<32x8xf32>
    %265 = vector.shape_cast %254 : vector<32x8xf32> to vector<2x16x8xf32>
    %266 = vector.shape_cast %259 : vector<32x8xf32> to vector<2x16x8xf32>
    %267 = vector.shape_cast %264 : vector<32x8xf32> to vector<2x16x8xf32>
    "tpu.trace_start"() <{level = 10 : i32, message = "bqd,bkd->bqk"}> : () -> ()
    %cst_113 = arith.constant dense<0.000000e+00> : vector<2x16x16xf32>
    %268 = tpu.matmul %265, %266, %cst_113 {dimension_numbers = #tpu.dot_dimension_numbers<[2], [2], [1], [1], [0, 0, 0, 1, 1, 1], [0], [0]>} : vector<2x16x8xf32>, vector<2x16x8xf32>, vector<2x16x16xf32> -> vector<2x16x16xf32>
    "tpu.trace_stop"() : () -> ()
    %cst_114 = arith.constant dense<0xFF800000> : vector<2x16xf32>
    %269 = vector.multi_reduction <maximumf>, %268, %cst_114 [2] : vector<2x16x16xf32> to vector<2x16xf32>
    %270 = vector.shape_cast %269 : vector<2x16xf32> to vector<2x16x1xf32>
    %271 = vector.broadcast %270 : vector<2x16x1xf32> to vector<2x16x16xf32>
    %272 = arith.subf %268, %271 : vector<2x16x16xf32>
    %273 = math.exp %272 : vector<2x16x16xf32>
    %cst_115 = arith.constant dense<0.000000e+00> : vector<2x16xf32>
    %274 = vector.multi_reduction <add>, %273, %cst_115 [2] : vector<2x16x16xf32> to vector<2x16xf32>
    %275 = vector.shape_cast %274 : vector<2x16xf32> to vector<2x16x1xf32>
    %276 = tpu.reciprocal %275 {approx = true} : vector<2x16x1xf32> -> vector<2x16x1xf32>
    %277 = vector.broadcast %276 : vector<2x16x1xf32> to vector<2x16x16xf32>
    %278 = arith.mulf %273, %277 : vector<2x16x16xf32>
    "tpu.trace_start"() <{level = 10 : i32, message = "bqk,bkd->bqd"}> : () -> ()
    %cst_116 = arith.constant dense<0.000000e+00> : vector<2x16x8xf32>
    %279 = tpu.matmul %278, %267, %cst_116 {dimension_numbers = #tpu.dot_dimension_numbers<[2], [1], [1], [2], [0, 0, 0, 1, 1, 2], [0], [0]>} : vector<2x16x16xf32>, vector<2x16x8xf32>, vector<2x16x8xf32> -> vector<2x16x8xf32>
    "tpu.trace_stop"() : () -> ()
    %280 = vector.shape_cast %279 : vector<2x16x8xf32> to vector<32x8xf32>
    %c960 = arith.constant 960 : index
    %c0_117 = arith.constant 0 : index
    %281 = vector.load %arg2[%c960, %c0_117] : memref<1384x128xf32, #tpu.memory_space<vmem>>, vector<8x32xf32>
    %cst_118 = arith.constant dense<0.000000e+00> : vector<32x32xf32>
    %282 = tpu.matmul %280, %281, %cst_118 {dimension_numbers = #tpu.dot_dimension_numbers<[1], [0], [0], [1], [0, 0, 1, 1], [], []>} : vector<32x8xf32>, vector<8x32xf32>, vector<32x32xf32> -> vector<32x32xf32>
    %283 = arith.addf %249, %282 : vector<32x32xf32>
    %c968 = arith.constant 968 : index
    %c0_119 = arith.constant 0 : index
    %284 = vector.load %arg2[%c968, %c0_119] : memref<1384x128xf32, #tpu.memory_space<vmem>>, vector<32x8xf32>
    %cst_120 = arith.constant dense<0.000000e+00> : vector<32x8xf32>
    %285 = tpu.matmul %216, %284, %cst_120 {dimension_numbers = #tpu.dot_dimension_numbers<[1], [0], [0], [1], [0, 0, 1, 1], [], []>} : vector<32x32xf32>, vector<32x8xf32>, vector<32x8xf32> -> vector<32x8xf32>
    %c1064 = arith.constant 1064 : index
    %c0_121 = arith.constant 0 : index
    %286 = vector.load %arg2[%c1064, %c0_121] : memref<1384x128xf32, #tpu.memory_space<vmem>>, vector<1x8xf32>
    %287 = vector.broadcast %286 : vector<1x8xf32> to vector<32x8xf32>
    %288 = arith.addf %285, %287 : vector<32x8xf32>
    %c1000 = arith.constant 1000 : index
    %c0_122 = arith.constant 0 : index
    %289 = vector.load %arg2[%c1000, %c0_122] : memref<1384x128xf32, #tpu.memory_space<vmem>>, vector<32x8xf32>
    %cst_123 = arith.constant dense<0.000000e+00> : vector<32x8xf32>
    %290 = tpu.matmul %216, %289, %cst_123 {dimension_numbers = #tpu.dot_dimension_numbers<[1], [0], [0], [1], [0, 0, 1, 1], [], []>} : vector<32x32xf32>, vector<32x8xf32>, vector<32x8xf32> -> vector<32x8xf32>
    %c1072 = arith.constant 1072 : index
    %c0_124 = arith.constant 0 : index
    %291 = vector.load %arg2[%c1072, %c0_124] : memref<1384x128xf32, #tpu.memory_space<vmem>>, vector<1x8xf32>
    %292 = vector.broadcast %291 : vector<1x8xf32> to vector<32x8xf32>
    %293 = arith.addf %290, %292 : vector<32x8xf32>
    %c1032 = arith.constant 1032 : index
    %c0_125 = arith.constant 0 : index
    %294 = vector.load %arg2[%c1032, %c0_125] : memref<1384x128xf32, #tpu.memory_space<vmem>>, vector<32x8xf32>
    %cst_126 = arith.constant dense<0.000000e+00> : vector<32x8xf32>
    %295 = tpu.matmul %216, %294, %cst_126 {dimension_numbers = #tpu.dot_dimension_numbers<[1], [0], [0], [1], [0, 0, 1, 1], [], []>} : vector<32x32xf32>, vector<32x8xf32>, vector<32x8xf32> -> vector<32x8xf32>
    %c1080 = arith.constant 1080 : index
    %c0_127 = arith.constant 0 : index
    %296 = vector.load %arg2[%c1080, %c0_127] : memref<1384x128xf32, #tpu.memory_space<vmem>>, vector<1x8xf32>
    %297 = vector.broadcast %296 : vector<1x8xf32> to vector<32x8xf32>
    %298 = arith.addf %295, %297 : vector<32x8xf32>
    %299 = vector.shape_cast %288 : vector<32x8xf32> to vector<2x16x8xf32>
    %300 = vector.shape_cast %293 : vector<32x8xf32> to vector<2x16x8xf32>
    %301 = vector.shape_cast %298 : vector<32x8xf32> to vector<2x16x8xf32>
    "tpu.trace_start"() <{level = 10 : i32, message = "bqd,bkd->bqk"}> : () -> ()
    %cst_128 = arith.constant dense<0.000000e+00> : vector<2x16x16xf32>
    %302 = tpu.matmul %299, %300, %cst_128 {dimension_numbers = #tpu.dot_dimension_numbers<[2], [2], [1], [1], [0, 0, 0, 1, 1, 1], [0], [0]>} : vector<2x16x8xf32>, vector<2x16x8xf32>, vector<2x16x16xf32> -> vector<2x16x16xf32>
    "tpu.trace_stop"() : () -> ()
    %cst_129 = arith.constant dense<0xFF800000> : vector<2x16xf32>
    %303 = vector.multi_reduction <maximumf>, %302, %cst_129 [2] : vector<2x16x16xf32> to vector<2x16xf32>
    %304 = vector.shape_cast %303 : vector<2x16xf32> to vector<2x16x1xf32>
    %305 = vector.broadcast %304 : vector<2x16x1xf32> to vector<2x16x16xf32>
    %306 = arith.subf %302, %305 : vector<2x16x16xf32>
    %307 = math.exp %306 : vector<2x16x16xf32>
    %cst_130 = arith.constant dense<0.000000e+00> : vector<2x16xf32>
    %308 = vector.multi_reduction <add>, %307, %cst_130 [2] : vector<2x16x16xf32> to vector<2x16xf32>
    %309 = vector.shape_cast %308 : vector<2x16xf32> to vector<2x16x1xf32>
    %310 = tpu.reciprocal %309 {approx = true} : vector<2x16x1xf32> -> vector<2x16x1xf32>
    %311 = vector.broadcast %310 : vector<2x16x1xf32> to vector<2x16x16xf32>
    %312 = arith.mulf %307, %311 : vector<2x16x16xf32>
    "tpu.trace_start"() <{level = 10 : i32, message = "bqk,bkd->bqd"}> : () -> ()
    %cst_131 = arith.constant dense<0.000000e+00> : vector<2x16x8xf32>
    %313 = tpu.matmul %312, %301, %cst_131 {dimension_numbers = #tpu.dot_dimension_numbers<[2], [1], [1], [2], [0, 0, 0, 1, 1, 2], [0], [0]>} : vector<2x16x16xf32>, vector<2x16x8xf32>, vector<2x16x8xf32> -> vector<2x16x8xf32>
    "tpu.trace_stop"() : () -> ()
    %314 = vector.shape_cast %313 : vector<2x16x8xf32> to vector<32x8xf32>
    %c1088 = arith.constant 1088 : index
    %c0_132 = arith.constant 0 : index
    %315 = vector.load %arg2[%c1088, %c0_132] : memref<1384x128xf32, #tpu.memory_space<vmem>>, vector<8x32xf32>
    %cst_133 = arith.constant dense<0.000000e+00> : vector<32x32xf32>
    %316 = tpu.matmul %314, %315, %cst_133 {dimension_numbers = #tpu.dot_dimension_numbers<[1], [0], [0], [1], [0, 0, 1, 1], [], []>} : vector<32x8xf32>, vector<8x32xf32>, vector<32x32xf32> -> vector<32x32xf32>
    %317 = arith.addf %283, %316 : vector<32x32xf32>
    %c1096 = arith.constant 1096 : index
    %c0_134 = arith.constant 0 : index
    %318 = vector.load %arg2[%c1096, %c0_134] : memref<1384x128xf32, #tpu.memory_space<vmem>>, vector<32x8xf32>
    %cst_135 = arith.constant dense<0.000000e+00> : vector<32x8xf32>
    %319 = tpu.matmul %216, %318, %cst_135 {dimension_numbers = #tpu.dot_dimension_numbers<[1], [0], [0], [1], [0, 0, 1, 1], [], []>} : vector<32x32xf32>, vector<32x8xf32>, vector<32x8xf32> -> vector<32x8xf32>
    %c1192 = arith.constant 1192 : index
    %c0_136 = arith.constant 0 : index
    %320 = vector.load %arg2[%c1192, %c0_136] : memref<1384x128xf32, #tpu.memory_space<vmem>>, vector<1x8xf32>
    %321 = vector.broadcast %320 : vector<1x8xf32> to vector<32x8xf32>
    %322 = arith.addf %319, %321 : vector<32x8xf32>
    %c1128 = arith.constant 1128 : index
    %c0_137 = arith.constant 0 : index
    %323 = vector.load %arg2[%c1128, %c0_137] : memref<1384x128xf32, #tpu.memory_space<vmem>>, vector<32x8xf32>
    %cst_138 = arith.constant dense<0.000000e+00> : vector<32x8xf32>
    %324 = tpu.matmul %216, %323, %cst_138 {dimension_numbers = #tpu.dot_dimension_numbers<[1], [0], [0], [1], [0, 0, 1, 1], [], []>} : vector<32x32xf32>, vector<32x8xf32>, vector<32x8xf32> -> vector<32x8xf32>
    %c1200 = arith.constant 1200 : index
    %c0_139 = arith.constant 0 : index
    %325 = vector.load %arg2[%c1200, %c0_139] : memref<1384x128xf32, #tpu.memory_space<vmem>>, vector<1x8xf32>
    %326 = vector.broadcast %325 : vector<1x8xf32> to vector<32x8xf32>
    %327 = arith.addf %324, %326 : vector<32x8xf32>
    %c1160 = arith.constant 1160 : index
    %c0_140 = arith.constant 0 : index
    %328 = vector.load %arg2[%c1160, %c0_140] : memref<1384x128xf32, #tpu.memory_space<vmem>>, vector<32x8xf32>
    %cst_141 = arith.constant dense<0.000000e+00> : vector<32x8xf32>
    %329 = tpu.matmul %216, %328, %cst_141 {dimension_numbers = #tpu.dot_dimension_numbers<[1], [0], [0], [1], [0, 0, 1, 1], [], []>} : vector<32x32xf32>, vector<32x8xf32>, vector<32x8xf32> -> vector<32x8xf32>
    %c1208 = arith.constant 1208 : index
    %c0_142 = arith.constant 0 : index
    %330 = vector.load %arg2[%c1208, %c0_142] : memref<1384x128xf32, #tpu.memory_space<vmem>>, vector<1x8xf32>
    %331 = vector.broadcast %330 : vector<1x8xf32> to vector<32x8xf32>
    %332 = arith.addf %329, %331 : vector<32x8xf32>
    %333 = vector.shape_cast %322 : vector<32x8xf32> to vector<2x16x8xf32>
    %334 = vector.shape_cast %327 : vector<32x8xf32> to vector<2x16x8xf32>
    %335 = vector.shape_cast %332 : vector<32x8xf32> to vector<2x16x8xf32>
    "tpu.trace_start"() <{level = 10 : i32, message = "bqd,bkd->bqk"}> : () -> ()
    %cst_143 = arith.constant dense<0.000000e+00> : vector<2x16x16xf32>
    %336 = tpu.matmul %333, %334, %cst_143 {dimension_numbers = #tpu.dot_dimension_numbers<[2], [2], [1], [1], [0, 0, 0, 1, 1, 1], [0], [0]>} : vector<2x16x8xf32>, vector<2x16x8xf32>, vector<2x16x16xf32> -> vector<2x16x16xf32>
    "tpu.trace_stop"() : () -> ()
    %cst_144 = arith.constant dense<0xFF800000> : vector<2x16xf32>
    %337 = vector.multi_reduction <maximumf>, %336, %cst_144 [2] : vector<2x16x16xf32> to vector<2x16xf32>
    %338 = vector.shape_cast %337 : vector<2x16xf32> to vector<2x16x1xf32>
    %339 = vector.broadcast %338 : vector<2x16x1xf32> to vector<2x16x16xf32>
    %340 = arith.subf %336, %339 : vector<2x16x16xf32>
    %341 = math.exp %340 : vector<2x16x16xf32>
    %cst_145 = arith.constant dense<0.000000e+00> : vector<2x16xf32>
    %342 = vector.multi_reduction <add>, %341, %cst_145 [2] : vector<2x16x16xf32> to vector<2x16xf32>
    %343 = vector.shape_cast %342 : vector<2x16xf32> to vector<2x16x1xf32>
    %344 = tpu.reciprocal %343 {approx = true} : vector<2x16x1xf32> -> vector<2x16x1xf32>
    %345 = vector.broadcast %344 : vector<2x16x1xf32> to vector<2x16x16xf32>
    %346 = arith.mulf %341, %345 : vector<2x16x16xf32>
    "tpu.trace_start"() <{level = 10 : i32, message = "bqk,bkd->bqd"}> : () -> ()
    %cst_146 = arith.constant dense<0.000000e+00> : vector<2x16x8xf32>
    %347 = tpu.matmul %346, %335, %cst_146 {dimension_numbers = #tpu.dot_dimension_numbers<[2], [1], [1], [2], [0, 0, 0, 1, 1, 2], [0], [0]>} : vector<2x16x16xf32>, vector<2x16x8xf32>, vector<2x16x8xf32> -> vector<2x16x8xf32>
    "tpu.trace_stop"() : () -> ()
    %348 = vector.shape_cast %347 : vector<2x16x8xf32> to vector<32x8xf32>
    %c1216 = arith.constant 1216 : index
    %c0_147 = arith.constant 0 : index
    %349 = vector.load %arg2[%c1216, %c0_147] : memref<1384x128xf32, #tpu.memory_space<vmem>>, vector<8x32xf32>
    %cst_148 = arith.constant dense<0.000000e+00> : vector<32x32xf32>
    %350 = tpu.matmul %348, %349, %cst_148 {dimension_numbers = #tpu.dot_dimension_numbers<[1], [0], [0], [1], [0, 0, 1, 1], [], []>} : vector<32x8xf32>, vector<8x32xf32>, vector<32x32xf32> -> vector<32x32xf32>
    %351 = arith.addf %317, %350 : vector<32x32xf32>
    %352 = arith.addf %198, %351 : vector<32x32xf32>
    %c1224 = arith.constant 1224 : index
    %c0_149 = arith.constant 0 : index
    %353 = vector.load %arg2[%c1224, %c0_149] : memref<1384x128xf32, #tpu.memory_space<vmem>>, vector<1x32xf32>
    %354 = vector.broadcast %353 : vector<1x32xf32> to vector<32x32xf32>
    %355 = arith.addf %352, %354 : vector<32x32xf32>
    %cst_150 = arith.constant dense<0.000000e+00> : vector<32xf32>
    %356 = vector.multi_reduction <add>, %355, %cst_150 [1] : vector<32x32xf32> to vector<32xf32>
    %357 = vector.shape_cast %356 : vector<32xf32> to vector<32x1xf32>
    %cst_151 = arith.constant 3.200000e+01 : f32
    %358 = vector.broadcast %cst_151 : f32 to vector<32x1xf32>
    %359 = arith.divf %357, %358 : vector<32x1xf32>
    %360 = vector.broadcast %359 : vector<32x1xf32> to vector<32x32xf32>
    %361 = arith.subf %355, %360 : vector<32x32xf32>
    %362 = arith.mulf %361, %361 : vector<32x32xf32>
    %cst_152 = arith.constant dense<0.000000e+00> : vector<32xf32>
    %363 = vector.multi_reduction <add>, %362, %cst_152 [1] : vector<32x32xf32> to vector<32xf32>
    %364 = vector.shape_cast %363 : vector<32xf32> to vector<32x1xf32>
    %cst_153 = arith.constant 3.200000e+01 : f32
    %365 = vector.broadcast %cst_153 : f32 to vector<32x1xf32>
    %366 = arith.divf %364, %365 : vector<32x1xf32>
    %367 = vector.broadcast %359 : vector<32x1xf32> to vector<32x32xf32>
    %368 = arith.subf %355, %367 : vector<32x32xf32>
    %cst_154 = arith.constant 9.99999974E-6 : f32
    %369 = vector.broadcast %cst_154 : f32 to vector<32x1xf32>
    %370 = arith.addf %366, %369 : vector<32x1xf32>
    %371 = math.rsqrt %370 : vector<32x1xf32>
    %372 = vector.broadcast %371 : vector<32x1xf32> to vector<32x32xf32>
    %373 = arith.mulf %368, %372 : vector<32x32xf32>
    %c1232 = arith.constant 1232 : index
    %c0_155 = arith.constant 0 : index
    %374 = vector.load %arg2[%c1232, %c0_155] : memref<1384x128xf32, #tpu.memory_space<vmem>>, vector<32x64xf32>
    %cst_156 = arith.constant dense<0.000000e+00> : vector<32x64xf32>
    %375 = tpu.matmul %373, %374, %cst_156 {dimension_numbers = #tpu.dot_dimension_numbers<[1], [0], [0], [1], [0, 0, 1, 1], [], []>} : vector<32x32xf32>, vector<32x64xf32>, vector<32x64xf32> -> vector<32x64xf32>
    %c1264 = arith.constant 1264 : index
    %c0_157 = arith.constant 0 : index
    %376 = vector.load %arg2[%c1264, %c0_157] : memref<1384x128xf32, #tpu.memory_space<vmem>>, vector<1x64xf32>
    %377 = vector.broadcast %376 : vector<1x64xf32> to vector<32x64xf32>
    %378 = arith.addf %375, %377 : vector<32x64xf32>
    %cst_158 = arith.constant 5.000000e-01 : f32
    %379 = vector.broadcast %cst_158 : f32 to vector<32x64xf32>
    %380 = arith.mulf %379, %378 : vector<32x64xf32>
    %cst_159 = arith.constant 0.707106769 : f32
    %381 = vector.broadcast %cst_159 : f32 to vector<32x64xf32>
    %382 = arith.mulf %378, %381 : vector<32x64xf32>
    %383 = math.erf %382 : vector<32x64xf32>
    %cst_160 = arith.constant 1.000000e+00 : f32
    %384 = vector.broadcast %cst_160 : f32 to vector<32x64xf32>
    %385 = arith.addf %384, %383 : vector<32x64xf32>
    %386 = arith.mulf %380, %385 : vector<32x64xf32>
    %c1272 = arith.constant 1272 : index
    %c0_161 = arith.constant 0 : index
    %387 = vector.load %arg2[%c1272, %c0_161] : memref<1384x128xf32, #tpu.memory_space<vmem>>, vector<64x32xf32>
    %cst_162 = arith.constant dense<0.000000e+00> : vector<32x32xf32>
    %388 = tpu.matmul %386, %387, %cst_162 {dimension_numbers = #tpu.dot_dimension_numbers<[1], [0], [0], [1], [0, 0, 1, 1], [], []>} : vector<32x64xf32>, vector<64x32xf32>, vector<32x32xf32> -> vector<32x32xf32>
    %c1336 = arith.constant 1336 : index
    %c0_163 = arith.constant 0 : index
    %389 = vector.load %arg2[%c1336, %c0_163] : memref<1384x128xf32, #tpu.memory_space<vmem>>, vector<1x32xf32>
    %390 = vector.broadcast %389 : vector<1x32xf32> to vector<32x32xf32>
    %391 = arith.addf %388, %390 : vector<32x32xf32>
    %392 = arith.addf %355, %391 : vector<32x32xf32>
    %cst_164 = arith.constant dense<0.000000e+00> : vector<32xf32>
    %393 = vector.multi_reduction <add>, %392, %cst_164 [1] : vector<32x32xf32> to vector<32xf32>
    %394 = vector.shape_cast %393 : vector<32xf32> to vector<32x1xf32>
    %cst_165 = arith.constant 3.200000e+01 : f32
    %395 = vector.broadcast %cst_165 : f32 to vector<32x1xf32>
    %396 = arith.divf %394, %395 : vector<32x1xf32>
    %397 = vector.broadcast %396 : vector<32x1xf32> to vector<32x32xf32>
    %398 = arith.subf %392, %397 : vector<32x32xf32>
    %399 = arith.mulf %398, %398 : vector<32x32xf32>
    %cst_166 = arith.constant dense<0.000000e+00> : vector<32xf32>
    %400 = vector.multi_reduction <add>, %399, %cst_166 [1] : vector<32x32xf32> to vector<32xf32>
    %401 = vector.shape_cast %400 : vector<32xf32> to vector<32x1xf32>
    %cst_167 = arith.constant 3.200000e+01 : f32
    %402 = vector.broadcast %cst_167 : f32 to vector<32x1xf32>
    %403 = arith.divf %401, %402 : vector<32x1xf32>
    %404 = vector.broadcast %396 : vector<32x1xf32> to vector<32x32xf32>
    %405 = arith.subf %392, %404 : vector<32x32xf32>
    %cst_168 = arith.constant 9.99999974E-6 : f32
    %406 = vector.broadcast %cst_168 : f32 to vector<32x1xf32>
    %407 = arith.addf %403, %406 : vector<32x1xf32>
    %408 = math.rsqrt %407 : vector<32x1xf32>
    %409 = vector.broadcast %408 : vector<32x1xf32> to vector<32x32xf32>
    %410 = arith.mulf %405, %409 : vector<32x32xf32>
    %c1344 = arith.constant 1344 : index
    %c0_169 = arith.constant 0 : index
    %411 = vector.load %arg2[%c1344, %c0_169] : memref<1384x128xf32, #tpu.memory_space<vmem>>, vector<32x128xf32>
    %cst_170 = arith.constant dense<0.000000e+00> : vector<32x128xf32>
    %412 = tpu.matmul %410, %411, %cst_170 {dimension_numbers = #tpu.dot_dimension_numbers<[1], [0], [0], [1], [0, 0, 1, 1], [], []>} : vector<32x32xf32>, vector<32x128xf32>, vector<32x128xf32> -> vector<32x128xf32>
    %c1376 = arith.constant 1376 : index
    %c0_171 = arith.constant 0 : index
    %413 = vector.load %arg2[%c1376, %c0_171] : memref<1384x128xf32, #tpu.memory_space<vmem>>, vector<1x128xf32>
    %414 = vector.broadcast %413 : vector<1x128xf32> to vector<32x128xf32>
    %415 = arith.addf %412, %414 : vector<32x128xf32>
    %c0_172 = arith.constant 0 : index
    %c0_173 = arith.constant 0 : index
    %416 = vector.load %arg3[%c0_172, %c0_173] : memref<32x128xf32, #tpu.memory_space<vmem>>, vector<32x128xf32>
    tpu.vector_store %arg3[%c0_172, %c0_173], %415 {strides = array<i32>} : memref<32x128xf32, #tpu.memory_space<vmem>>, vector<32x128xf32>,
    return
  }
  func.func @transform_0(%arg0: i32) -> (i32, i32) {
    %c0_i32 = arith.constant 0 : i32
    %c0_i32_0 = arith.constant 0 : i32
    %c0_i32_1 = arith.constant 0 : i32
    return %c0_i32, %c0_i32_0 : i32, i32
  }
  func.func @transform_1(%arg0: i32) -> (i32, i32) {
    %c0_i32 = arith.constant 0 : i32
    %c0_i32_0 = arith.constant 0 : i32
    %c0_i32_1 = arith.constant 0 : i32
    return %c0_i32, %c0_i32_0 : i32, i32
  }
  func.func @transform_2(%arg0: i32) -> (i32, i32) {
    %c0_i32 = arith.constant 0 : i32
    %c0_i32_0 = arith.constant 0 : i32
    %c0_i32_1 = arith.constant 0 : i32
    return %c0_i32, %c0_i32_0 : i32, i32
  }
}

</mosaic_0001>

<bundles_post_ra>
// kernel: forward_all.1
= control target key start
LH: loop header
LB: loop body
LE: loop exit
PB: predicated region body
PF: predicated region fallthrough
CT: control target
= control target key end

     0   :  { %vm26_vm0 = vcmask 392192   ;;  %s5720_s0 = inlined_call_operand.vmem [shape: f32[32,48], index: 0, kind: input, shape index: {}]   ;;  %s5721_s1 = inlined_call_operand.vmem [shape: f32[1384,128], index: 1, kind: input, shape index: {}]   ;;  %s5722_s2 = inlined_call_operand.hbm [shape: f32[32,128], index: 2, kind: output, shape index: {}]  }
   0x1   :  { %v21_v0 = vld [vmem:[%s5721_s1 + $0x28] sm:$0xff]  ;;  %v20_v1 = vld [vmem:[%s5721_s1 + $0x20] sm:$0xff]  ;;  %v19_v2 = vld [vmem:[%s5721_s1 + $0x18] sm:$0xff] }
   0x2   :  { %49 = vmatpush.msra.mxu0 %v21_v0  ;;  %v18_v3 = vld [vmem:[%s5721_s1 + $0x10] sm:$0xff]  ;;  %v17_v4 = vld [vmem:[%s5721_s1 + $0x8] sm:$0xff]  ;;  %v16_v5 = vld [vmem:[%s5721_s1] sm:$0xff] }
   0x3   :  { %v12_v6 = vld [vmem:[%s5720_s0] sm:$0xff] }
   0x4   :  { %50 = vmatpush.msra.mxu0 %v20_v1 }
   0x6   :  { %51 = vmatpush.msra.mxu0 %v19_v2 }
   0x8   :  { %52 = vmatpush.msra.mxu0 %v18_v3 }
   0xa   :  { %53 = vmatpush.msra.mxu0 %v17_v4 }
   0xc   :  { %54 = vmatpush.msra.mxu0 %v16_v5 }
   0xd   :  { %3756 = vmatmul.msk.f32.vlgmr.msra.gmra.mxu0 %vm26_vm0, %v12_v6 }
   0xe   :  { %7 = vsyncpa [#allocation3], 0  ;;  %v13_v7 = vld [vmem:[%s5720_s0 + $0x8] sm:$0xff]  ;;  %v14_v8 = vld [vmem:[%s5720_s0 + $0x10] sm:$0xff]  ;;  %vm68_vm1 = vcmask 261120   ;;  %v4259_v26 = vmov 32.0  }
   0xf   :  { %v15_v9 = vld [vmem:[%s5720_s0 + $0x18] sm:$0xff]  ;;  %v22_v10 = vld [vmem:[%s5721_s1 + $0x30] sm:$0xff]  ;;  %v24_v18 = vld [vmem:[%s5721_s1 + $0x40] sm:$0xff]  ;;  %4047 = vrcp.f32 %v4259_v26  ;;  %vm281_vm15 = vcmask 64512   ;;  %s4260_s15 = smov [#allocation2]   ;;  %s3744_s19 = sshll.u32 %s5722_s2, 4  ;;  %s3745_s19 = int_to_ptr.hbm [resolvable:$true] %s3744_s19 }
  0x10   :  { %v23_v14 = vld [vmem:[%s5721_s1 + $0x38] sm:$0xff]  ;;  %v25_v22 = vld [vmem:[%s5721_s1 + $0x48] sm:$0xff]  ;;  %v166_v56 = vld [vmem:[%s5721_s1 + $0x60] sm:$0xff]  ;;  %s3742_s16 = sshll.u32 %s4260_s15, 4  ;;  %s4262_s20 = smov 8   ;;  %s3743_s16 = int_to_ptr.vmem [resolvable:$true] %s3742_s16 }
  0x11   :  { %v167_v53 = vld [vmem:[%s5721_s1 + $0x68] sm:$0xff]  ;;  %v213_v57 = vld [vmem:[%s5721_s1 + $0x80] sm:$0xff]  ;;  %v165_v59 = vld [vmem:[%s5721_s1 + $0x58] sm:$0xff] }
  0x12   :  { %v214_v54 = vld [vmem:[%s5721_s1 + $0x88] sm:$0xff]  ;;  %194 = vmatpush.msra.mxu1 %v167_v53  ;;  %v248_v58 = vld [vmem:[%s5721_s1 + $0xa0] sm:$0xff]  ;;  %v212_v60 = vld [vmem:[%s5721_s1 + $0x78] sm:$0xff] }
  0x13   :  { %v249_v55 = vld [vmem:[%s5721_s1 + $0xa8] sm:$0xff]  ;;  %229 = vmatpush.msra.mxu2 %v214_v54  ;;  %v247_v61 = vld [vmem:[%s5721_s1 + $0x98] sm:$0xff]  ;;  %v164_v62 = vld [vmem:[%s5721_s1 + $0x50] sm:$0xff] }
  0x14   :  { %264 = vmatpush.msra.mxu3 %v249_v55  ;;  %195 = vmatpush.msra.mxu1 %v166_v56  ;;  %v211_v63 = vld [vmem:[%s5721_s1 + $0x70] sm:$0xff]  ;;  %v4017_v54 = vld [vmem:[%s5721_s1 + $0xb8] ss:$0 sm:$0xff] }
  0x15   :  { %3757 = vmatmul.msk.f32.gmra.mxu0 %vm26_vm0, %v13_v7  ;;  %v4048_v27 = vpop.eup %4047  ;;  %230 = vmatpush.msra.mxu2 %v213_v57  ;;  %v246_v0 = vld [vmem:[%s5721_s1 + $0x90] sm:$0xff] }
  0x16   :  { %v82_v28 = vmul.f32 32.0, %v4048_v27  ;;  %vm86_vm2 = vweird.f32 %v4048_v27  ;;  %265 = vmatpush.msra.mxu3 %v248_v58  ;;  %196 = vmatpush.msra.mxu1 %v165_v59  ;;  %v4016_v59 = vld [vmem:[%s5721_s1 + $0xb0] ss:$0 sm:$0xff] }
  0x17   :  { %231 = vmatpush.msra.mxu2 %v212_v60 }
  0x18   :  { %v83_v29 = vsub.f32 1.0, %v82_v28  ;;  %266 = vmatpush.msra.mxu3 %v247_v61  ;;  %197 = vmatpush.msra.mxu1 %v164_v62  ;;  %v459_v62 = vld [vmem:[%s5721_s1 + $0xe8] sm:$0xff] }
  0x19   :  { %232 = vmatpush.msra.mxu2 %v211_v63 }
  0x1a   :  { %v84_v30 = vmul.f32 %v4048_v27, %v83_v29  ;;  %267 = vmatpush.msra.mxu3 %v246_v0 }
  0x1c   :  { %v85_v31 = vadd.f32 %v4048_v27, %v84_v30 }
  0x1d   :  { %3758 = vmatmul.msk.f32.gmra.mxu0 %vm26_vm0, %v14_v8 }
  0x1e   :  { %v4336_v32 = vsel %vm86_vm2, %v4048_v27, %v85_v31 }
  0x25   :  { %3759 = vmatmul.msk.f32.gmra.mxu0 %vm26_vm0, %v15_v9  ;;  %vm352_vm0 = vcmask 130048  }
  0x8a   :  { %v56_v11 = vpop.f32.mrf.mxu0 }
  0x8b   :  { %v4311_v12 = vadd.f32 %v56_v11, %v22_v10 }
  0x8d   :  { %v69_v13 = vsel %vm68_vm1, %v4311_v12, 0.0 }
  0x8e   :  { %70 = vadd.xlane.f32.xlu0 %v69_v13 }
  0x92   :  { %v59_v15 = vpop.f32.mrf.mxu0 }
  0x93   :  { %v4318_v16 = vadd.f32 %v59_v15, %v23_v14 }
  0x95   :  { %v72_v17 = vsel %vm68_vm1, %v4318_v16, 0.0 }
  0x96   :  { %73 = vadd.xlane.f32.xlu0 %v72_v17 }
  0x9a   :  { %v62_v19 = vpop.f32.mrf.mxu0 }
  0x9b   :  { %v4325_v20 = vadd.f32 %v62_v19, %v24_v18 }
  0x9d   :  { %v75_v21 = vsel %vm68_vm1, %v4325_v20, 0.0 }
  0x9e   :  { %76 = vadd.xlane.f32.xlu1 %v75_v21 }
  0xa2   :  { %v65_v23 = vpop.f32.mrf.mxu0 }
  0xa3   :  { %v4332_v24 = vadd.f32 %v65_v23, %v25_v22 }
  0xa5   :  { %v78_v25 = vsel %vm68_vm1, %v4332_v24, 0.0 }
  0xa6   :  { %79 = vadd.xlane.f32.xlu1 %v78_v25 }
 0x101   :  { %v71_v33 = vpop.xlane.xlu0 %70 }
 0x102   :  { %v88_v34 = vmul.f32 %v4336_v32, %v71_v33 }
 0x104   :  { %v4340_v35 = vsub.f32 %v4311_v12, %v88_v34 }
 0x106   :  { %v96_v36 = vmul.f32 %v4340_v35, %v4340_v35 }
 0x108   :  { %v100_v37 = vsel %vm68_vm1, %v96_v36, 0.0 }
 0x109   :  { %101 = vadd.xlane.f32.xlu2 %v100_v37  ;;  %v74_v38 = vpop.xlane.xlu0 %73 }
 0x10a   :  { %v89_v39 = vmul.f32 %v4336_v32, %v74_v38 }
 0x10c   :  { %v4347_v40 = vsub.f32 %v4318_v16, %v89_v39 }
 0x10e   :  { %v97_v41 = vmul.f32 %v4347_v40, %v4347_v40 }
 0x110   :  { %v103_v42 = vsel %vm68_vm1, %v97_v41, 0.0 }
 0x111   :  { %v77_v43 = vpop.xlane.xlu1 %76  ;;  %104 = vadd.xlane.f32.xlu2 %v103_v42 }
 0x112   :  { %v90_v44 = vmul.f32 %v4336_v32, %v77_v43 }
 0x114   :  { %v4354_v45 = vsub.f32 %v4325_v20, %v90_v44 }
 0x116   :  { %v98_v46 = vmul.f32 %v4354_v45, %v4354_v45 }
 0x118   :  { %v106_v47 = vsel %vm68_vm1, %v98_v46, 0.0 }
 0x119   :  { %v80_v48 = vpop.xlane.xlu1 %79  ;;  %107 = vadd.xlane.f32.xlu0 %v106_v47 }
 0x11a   :  { %v91_v49 = vmul.f32 %v4336_v32, %v80_v48 }
 0x11c   :  { %v4361_v50 = vsub.f32 %v4332_v24, %v91_v49 }
 0x11e   :  { %v99_v51 = vmul.f32 %v4361_v50, %v4361_v50 }
 0x120   :  { %v109_v52 = vsel %vm68_vm1, %v99_v51, 0.0 }
 0x121   :  { %110 = vadd.xlane.f32.xlu1 %v109_v52 }
 0x17c   :  { %v102_v1 = vpop.xlane.xlu2 %101 }
 0x17d   :  { %v112_v2 = vmul.f32 %v102_v1, %v4336_v32  ;;  %v458_v1 = vld [vmem:[%s5721_s1 + $0xe0] sm:$0xff] }
 0x17f   :  { %v116_v3 = vadd.f32 1e-05, %v112_v2 }
 0x181   :  { %4049 = vrsqrt.f32 %v116_v3  ;;  %vm126_vm4 = vweird.f32 %v116_v3 }
 0x184   :  { %v105_v4 = vpop.xlane.xlu2 %104 }
 0x185   :  { %v113_v5 = vmul.f32 %v105_v4, %v4336_v32  ;;  %v457_v4 = vld [vmem:[%s5721_s1 + $0xd8] sm:$0xff] }
 0x187   :  { %v4050_v6 = vpop.eup %4049  ;;  %v117_v7 = vadd.f32 1e-05, %v113_v5  ;;  %v456_v5 = vld [vmem:[%s5721_s1 + $0xd0] sm:$0xff] }
 0x188   :  { %v121_v8 = vmul.f32 %v4050_v6, %v116_v3  ;;  %vm127_vm3 = vweird.f32 %v4050_v6 }
 0x189   :  { %4051 = vrsqrt.f32 %v117_v7  ;;  %vm128_vm5 = vmor %vm126_vm4, %vm127_vm3  ;;  %vm136_vm7 = vweird.f32 %v117_v7 }
 0x18a   :  { %v122_v9 = vmul.f32 %v4050_v6, %v121_v8 }
 0x18c   :  { %v123_v10 = vmul.f32 0.5, %v122_v9  ;;  %v108_v11 = vpop.xlane.xlu0 %107 }
 0x18d   :  { %v114_v13 = vmul.f32 %v108_v11, %v4336_v32 }
 0x18e   :  { %v124_v14 = vsub.f32 1.5, %v123_v10 }
 0x18f   :  { %v4052_v15 = vpop.eup %4051  ;;  %v118_v17 = vadd.f32 1e-05, %v114_v13 }
 0x190   :  { %v125_v18 = vmul.f32 %v4050_v6, %v124_v14  ;;  %v131_v19 = vmul.f32 %v4052_v15, %v117_v7  ;;  %vm137_vm6 = vweird.f32 %v4052_v15 }
 0x191   :  { %4053 = vrsqrt.f32 %v118_v17  ;;  %vm138_vm8 = vmor %vm136_vm7, %vm137_vm6  ;;  %vm146_vm10 = vweird.f32 %v118_v17 }
 0x192   :  { %v129_v21 = vsel %vm128_vm5, %v4050_v6, %v125_v18  ;;  %v132_v22 = vmul.f32 %v4052_v15, %v131_v19  ;;  %v493_v18 = vld [vmem:[%s5721_s1 + $0x100] sm:$0xff]  ;;  %v492_v19 = vld [vmem:[%s5721_s1 + $0xf8] sm:$0xff] }
 0x193   :  { %v4406_v23 = vmul.f32 %v129_v21, %v4340_v35  ;;  %v491_v21 = vld [vmem:[%s5721_s1 + $0xf0] sm:$0xff] }
 0x194   :  { %v133_v25 = vmul.f32 0.5, %v132_v22  ;;  %v111_v26 = vpop.xlane.xlu1 %110 }
 0x195   :  { %v115_v27 = vmul.f32 %v111_v26, %v4336_v32  ;;  %3760 = vmatmul.msk.f32.vlgmr.msra.gmra.mxu1 %vm68_vm1, %v4406_v23  ;;  %3764 = vmatmul.msk.f32.vlgmr.msra.gmra.mxu2 %vm68_vm1, %v4406_v23 }
 0x196   :  { %v134_v28 = vsub.f32 1.5, %v133_v25  ;;  %3768 = vmatmul.msk.f32.vlgmr.msra.gmra.mxu3 %vm68_vm1, %v4406_v23 }
 0x197   :  { %v4054_v29 = vpop.eup %4053  ;;  %v119_v30 = vadd.f32 1e-05, %v115_v27 }
 0x198   :  { %v135_v31 = vmul.f32 %v4052_v15, %v134_v28  ;;  %v141_v33 = vmul.f32 %v4054_v29, %v118_v17  ;;  %vm147_vm9 = vweird.f32 %v4054_v29 }
 0x199   :  { %4055 = vrsqrt.f32 %v119_v30  ;;  %vm148_vm11 = vmor %vm146_vm10, %vm147_vm9  ;;  %vm156_vm13 = vweird.f32 %v119_v30 }
 0x19a   :  { %v139_v34 = vsel %vm138_vm8, %v4052_v15, %v135_v31  ;;  %v142_v35 = vmul.f32 %v4054_v29, %v141_v33  ;;  %v494_v15 = vld [vmem:[%s5721_s1 + $0x108] sm:$0xff] }
 0x19b   :  { %v4416_v36 = vmul.f32 %v139_v34, %v4347_v40  ;;  %v4020_v34 = vld [vmem:[%s5721_s1 + $0x138] ss:$0 sm:$0xff] }
 0x19c   :  { %v143_v37 = vmul.f32 0.5, %v142_v35 }
 0x19d   :  { %3761 = vmatmul.msk.f32.gmra.mxu1 %vm68_vm1, %v4416_v36  ;;  %3765 = vmatmul.msk.f32.gmra.mxu2 %vm68_vm1, %v4416_v36 }
 0x19e   :  { %v144_v38 = vsub.f32 1.5, %v143_v37  ;;  %3769 = vmatmul.msk.f32.gmra.mxu3 %vm68_vm1, %v4416_v36 }
 0x19f   :  { %v4056_v39 = vpop.eup %4055 }
 0x1a0   :  { %v145_v41 = vmul.f32 %v4054_v29, %v144_v38  ;;  %v151_v42 = vmul.f32 %v4056_v39, %v119_v30  ;;  %vm157_vm12 = vweird.f32 %v4056_v39 }
 0x1a1   :  { %vm158_vm14 = vmor %vm156_vm13, %vm157_vm12 }
 0x1a2   :  { %v149_v43 = vsel %vm148_vm11, %v4054_v29, %v145_v41  ;;  %v152_v40 = vmul.f32 %v4056_v39, %v151_v42 }
 0x1a3   :  { %v4425_v44 = vmul.f32 %v149_v43, %v4354_v45 }
 0x1a4   :  { %v153_v46 = vmul.f32 0.5, %v152_v40 }
 0x1a5   :  { %3762 = vmatmul.msk.f32.gmra.mxu1 %vm68_vm1, %v4425_v44  ;;  %3766 = vmatmul.msk.f32.gmra.mxu2 %vm68_vm1, %v4425_v44 }
 0x1a6   :  { %v154_v47 = vsub.f32 1.5, %v153_v46  ;;  %3770 = vmatmul.msk.f32.gmra.mxu3 %vm68_vm1, %v4425_v44 }
 0x1a8   :  { %v155_v48 = vmul.f32 %v4056_v39, %v154_v47 }
 0x1aa   :  { %v159_v49 = vsel %vm158_vm14, %v4056_v39, %v155_v48 }
 0x1ab   :  { %v4434_v51 = vmul.f32 %v159_v49, %v4361_v50  ;;  %v4018_v50 = vld [vmem:[%s5721_s1 + $0xc0] ss:$0 sm:$0xff] }
 0x1ad   :  { %3763 = vmatmul.msk.f32.gmra.mxu1 %vm68_vm1, %v4434_v51  ;;  %3767 = vmatmul.msk.f32.gmra.mxu2 %vm68_vm1, %v4434_v51 }
 0x1ae   :  { %3771 = vmatmul.msk.f32.gmra.mxu3 %vm68_vm1, %v4434_v51 }
 0x212   :  { %v199_v53 = vpop.f32.mrf.mxu1 }
 0x213   :  { %v200_v63 = vadd.f32 %v4016_v59, %v199_v53 }
 0x218   :  { %v234_v45 = vpop.f32.mrf.mxu2 }
 0x219   :  { %v269_v52 = vpop.f32.mrf.mxu3  ;;  %v235_v61 = vadd.f32 %v4017_v54, %v234_v45 }
 0x21a   :  { %v270_v60 = vadd.f32 %v4018_v50, %v269_v52  ;;  %v202_v2 = vpop.f32.mrf.mxu1 }
 0x21b   :  { %v203_v6 = vadd.f32 %v4016_v59, %v202_v2 }
 0x220   :  { %v237_v55 = vpop.f32.mrf.mxu2 }
 0x221   :  { %v238_v56 = vadd.f32 %v4017_v54, %v237_v55  ;;  %v272_v57 = vpop.f32.mrf.mxu3 }
 0x222   :  { %v273_v58 = vadd.f32 %v4018_v50, %v272_v57  ;;  %v205_v11 = vpop.f32.mrf.mxu1 }
 0x223   :  { %3772 = vmatpush.xpose.msk.msrb.mxu1 %vm281_vm15, %v238_v56  ;;  %v206_v17 = vadd.f32 %v4016_v59, %v205_v11 }
 0x224   :  { %417 = vmatpush.msrb.mxu3 %v273_v58 }
 0x226   :  { %418 = vmatpush.msrb.mxu3 %v270_v60 }
 0x227   :  { %3773 = vmatpush.xpose.msk.msrb.mxu1 %vm281_vm15, %v235_v61 }
 0x228   :  { %v240_v0 = vpop.f32.mrf.mxu2 }
 0x229   :  { %v275_v3 = vpop.f32.mrf.mxu3  ;;  %v241_v14 = vadd.f32 %v4017_v54, %v240_v0 }
 0x22a   :  { %3774 = vmatmul.msk.f32.vlgmr.msrb.gmra.mxu1 %vm281_vm15, %v200_v63  ;;  %v276_v13 = vadd.f32 %v4018_v50, %v275_v3  ;;  %v208_v22 = vpop.f32.mrf.mxu1 }
 0x22b   :  { %474 = vmatpush.msra.mxu1 %v459_v62  ;;  %v209_v25 = vadd.f32 %v4016_v59, %v208_v22 }
 0x22d   :  { %475 = vmatpush.msra.mxu1 %v458_v1 }
 0x22f   :  { %476 = vmatpush.msra.mxu1 %v457_v4 }
 0x230   :  { %v243_v7 = vpop.f32.mrf.mxu2 }
 0x231   :  { %477 = vmatpush.msra.mxu1 %v456_v5  ;;  %v244_v8 = vadd.f32 %v4017_v54, %v243_v7  ;;  %v278_v9 = vpop.f32.mrf.mxu3 }
 0x232   :  { %3775 = vmatmul.msk.f32.gmra.mxu1 %vm281_vm15, %v203_v6  ;;  %v279_v10 = vadd.f32 %v4018_v50, %v278_v9 }
 0x233   :  { %3776 = vmatpush.xpose.msk.msrb.mxu2 %vm281_vm15, %v244_v8 }
 0x234   :  { %446 = vmatpush.msrb.mxu0 %v279_v10  ;;  %v4019_v10 = vld [vmem:[%s5721_s1 + $0x130] ss:$0 sm:$0xff] }
 0x236   :  { %447 = vmatpush.msrb.mxu0 %v276_v13 }
 0x237   :  { %3777 = vmatpush.xpose.msk.msrb.mxu2 %vm281_vm15, %v241_v14 }
 0x23a   :  { %3778 = vmatmul.msk.f32.vlgmr.msrb.gmra.mxu2 %vm281_vm15, %v206_v17  ;;  %3784 = vmatmul.msk.f32.vlgmr.msra.gmra.mxu1 %vm68_vm1, %v4406_v23 }
 0x23b   :  { %509 = vmatpush.msra.mxu2 %v494_v15 }
 0x23d   :  { %510 = vmatpush.msra.mxu2 %v493_v18 }
 0x23f   :  { %511 = vmatpush.msra.mxu2 %v492_v19 }
 0x241   :  { %512 = vmatpush.msra.mxu2 %v491_v21 }
 0x242   :  { %3779 = vmatmul.msk.f32.gmra.mxu2 %vm281_vm15, %v209_v25  ;;  %3785 = vmatmul.msk.f32.gmra.mxu1 %vm68_vm1, %v4416_v36 }
 0x24a   :  { %3786 = vmatmul.msk.f32.gmra.mxu1 %vm68_vm1, %v4425_v44  ;;  %3788 = vmatmul.msk.f32.vlgmr.msra.gmra.mxu2 %vm68_vm1, %v4406_v23 }
 0x252   :  { %3787 = vmatmul.msk.f32.gmra.mxu1 %vm68_vm1, %v4434_v51  ;;  %3789 = vmatmul.msk.f32.gmra.mxu2 %vm68_vm1, %v4416_v36 }
 0x25a   :  { %3790 = vmatmul.msk.f32.gmra.mxu2 %vm68_vm1, %v4425_v44 }
 0x262   :  { %3791 = vmatmul.msk.f32.gmra.mxu2 %vm68_vm1, %v4434_v51 }
 0x2a7   :  { %v311_v30 = vpop.f32.mrf.mxu1 }
 0x2a8   :  { %v353_v33 = vsel %vm352_vm0, %v311_v30, -inf }
 0x2af   :  { %v314_v45 = vpop.f32.mrf.mxu1 }
 0x2b0   :  { %v356_v55 = vsel %vm352_vm0, %v314_v45, -inf }
 0x2b7   :  { %v479_v6 = vpop.f32.mrf.mxu1 }
 0x2b8   :  { %v480_v14 = vadd.f32 %v4019_v10, %v479_v6 }
 0x2bd   :  { %v346_v26 = vpop.f32.mrf.mxu2 }
 0x2be   :  { %v359_v27 = vsel %vm352_vm0, %v346_v26, -inf }
 0x2bf   :  { %360 = vmax.xlane.f32.xlu2 %v359_v27  ;;  %v482_v17 = vpop.f32.mrf.mxu1  ;;  %v528_v27 = vld [vmem:[%s5721_s1 + $0x120] sm:$0xff] }
 0x2c0   :  { %v483_v18 = vadd.f32 %v4019_v10, %v482_v17 }
 0x2c5   :  { %v349_v28 = vpop.f32.mrf.mxu2 }
 0x2c6   :  { %v362_v29 = vsel %vm352_vm0, %v349_v28, -inf }
 0x2c7   :  { %363 = vmax.xlane.f32.xlu0 %v362_v29  ;;  %v485_v19 = vpop.f32.mrf.mxu1  ;;  %v526_v29 = vld [vmem:[%s5721_s1 + $0x110] sm:$0xff] }
 0x2c8   :  { %v486_v21 = vadd.f32 %v4019_v10, %v485_v19  ;;  %v854_v19 = vld [vmem:[%s5721_s1 + $0x188] sm:$0xff] }
 0x2cd   :  { %v514_v31 = vpop.f32.mrf.mxu2 }
 0x2ce   :  { %v515_v38 = vadd.f32 %v4020_v34, %v514_v31 }
 0x2cf   :  { %354 = vmax.xlane.f32.xlu0 %v353_v33  ;;  %v488_v22 = vpop.f32.mrf.mxu1 }
 0x2d0   :  { %v489_v25 = vadd.f32 %v4019_v10, %v488_v22  ;;  %v853_v22 = vld [vmem:[%s5721_s1 + $0x180] sm:$0xff] }
 0x2d5   :  { %v517_v35 = vpop.f32.mrf.mxu2 }
 0x2d6   :  { %v518_v37 = vadd.f32 %v4020_v34, %v517_v35 }
 0x2d8   :  { %3796 = vmatpush.xpose.msk.msra.mxu0 %vm281_vm15, %v518_v37 }
 0x2dc   :  { %3797 = vmatpush.xpose.msk.msra.mxu0 %vm281_vm15, %v515_v38 }
 0x2dd   :  { %v520_v58 = vpop.f32.mrf.mxu2 }
 0x2de   :  { %v521_v4 = vadd.f32 %v4020_v34, %v520_v58 }
 0x2e5   :  { %v523_v60 = vpop.f32.mrf.mxu2 }
 0x2e6   :  { %v524_v1 = vadd.f32 %v4020_v34, %v523_v60 }
 0x332   :  { %v361_v39 = vpop.xlane.xlu2 %360 }
 0x333   :  { %v367_v41 = vsub.f32 %v346_v26, %v361_v39  ;;  %v529_v26 = vld [vmem:[%s5721_s1 + $0x128] sm:$0xff] }
 0x334   :  { %544 = vmatpush.msra.mxu3 %v529_v26  ;;  %v852_v26 = vld [vmem:[%s5721_s1 + $0x178] sm:$0xff] }
 0x335   :  { %v373_v42 = vmul.f32 1.442695, %v367_v41 }
 0x336   :  { %545 = vmatpush.msra.mxu3 %v528_v27 }
 0x337   :  { %4057 = vpow2.f32 %v373_v42 }
 0x33a   :  { %v364_v43 = vpop.xlane.xlu0 %363 }
 0x33b   :  { %v368_v40 = vsub.f32 %v349_v28, %v364_v43  ;;  %v527_v28 = vld [vmem:[%s5721_s1 + $0x118] sm:$0xff] }
 0x33c   :  { %546 = vmatpush.msra.mxu3 %v527_v28  ;;  %v851_v28 = vld [vmem:[%s5721_s1 + $0x170] sm:$0xff] }
 0x33d   :  { %v4058_v46 = vpop.eup %4057  ;;  %v375_v47 = vmul.f32 1.442695, %v368_v40 }
 0x33e   :  { %v383_v48 = vsel %vm352_vm0, %v4058_v46, 0.0  ;;  %547 = vmatpush.msra.mxu3 %v526_v29 }
 0x33f   :  { %4059 = vpow2.f32 %v375_v47  ;;  %384 = vadd.xlane.f32.xlu1 %v383_v48 }
 0x342   :  { %v355_v49 = vpop.xlane.xlu0 %354 }
 0x343   :  { %v365_v52 = vsub.f32 %v311_v30, %v355_v49  ;;  %v455_v30 = vld [vmem:[%s5721_s1 + $0xc8] sm:$0xff] }
 0x345   :  { %v4060_v53 = vpop.eup %4059  ;;  %v369_v54 = vmul.f32 1.442695, %v365_v52 }
 0x346   :  { %v386_v50 = vsel %vm352_vm0, %v4060_v53, 0.0 }
 0x347   :  { %4061 = vpow2.f32 %v369_v54  ;;  %357 = vmax.xlane.f32.xlu1 %v356_v55  ;;  %387 = vadd.xlane.f32.xlu2 %v386_v50 }
 0x34d   :  { %v4062_v56 = vpop.eup %4061 }
 0x34e   :  { %v377_v57 = vsel %vm352_vm0, %v4062_v56, 0.0 }
 0x34f   :  { %378 = vadd.xlane.f32.xlu2 %v377_v57 }
 0x3b2   :  { %v385_v59 = vpop.xlane.xlu1 %384 }
 0x3b3   :  { %4063 = vrcp.f32 %v385_v59  ;;  %v4021_v59 = vld [vmem:[%s5721_s1 + $0x140] ss:$0 sm:$0xff] }
 0x3b9   :  { %v4064_v61 = vpop.eup %4063 }
 0x3ba   :  { %v358_v62 = vpop.xlane.xlu1 %357  ;;  %v388_v63 = vpop.xlane.xlu2 %387  ;;  %v395_v0 = vmul.f32 %v4064_v61, %v4058_v46 }
 0x3bb   :  { %v366_v2 = vsub.f32 %v314_v45, %v358_v62  ;;  %4065 = vrcp.f32 %v388_v63 }
 0x3bc   :  { %3782 = vmatmul.msk.f32.vlgmr.msrb.gmra.mxu0 %vm352_vm0, %v395_v0 }
 0x3bd   :  { %v371_v3 = vmul.f32 1.442695, %v366_v2  ;;  %3800 = vmatpush.xpose.msk.msrb.mxu0 %vm281_vm15, %v524_v1 }
 0x3bf   :  { %4067 = vpow2.f32 %v371_v3 }
 0x3c1   :  { %v4066_v5 = vpop.eup %4065  ;;  %3801 = vmatpush.xpose.msk.msrb.mxu0 %vm281_vm15, %v521_v4 }
 0x3c2   :  { %v379_v7 = vpop.xlane.xlu2 %378  ;;  %v396_v8 = vmul.f32 %v4066_v5, %v4060_v53 }
 0x3c3   :  { %4069 = vrcp.f32 %v379_v7 }
 0x3c4   :  { %3783 = vmatmul.msk.f32.gmra.mxu0 %vm352_vm0, %v396_v8 }
 0x3c5   :  { %v4068_v9 = vpop.eup %4067 }
 0x3c6   :  { %v380_v11 = vsel %vm352_vm0, %v4068_v9, 0.0 }
 0x3c7   :  { %381 = vadd.xlane.f32.xlu0 %v380_v11 }
 0x3c9   :  { %v4070_v13 = vpop.eup %4069 }
 0x3ca   :  { %v393_v15 = vmul.f32 %v4070_v13, %v4062_v56 }
 0x3cc   :  { %3780 = vmatmul.msk.f32.vlgmr.msrb.gmra.mxu3 %vm352_vm0, %v393_v15  ;;  %3798 = vmatmul.msk.f32.vlgmr.msra.gmra.mxu0 %vm281_vm15, %v480_v14 }
 0x3cd   :  { %802 = vmatpush.msra.mxu0 %v455_v30  ;;  %v816_v30 = vld [vmem:[%s5721_s1 + $0x150] sm:$0xff] }
 0x3d4   :  { %3799 = vmatmul.msk.f32.gmra.mxu0 %vm281_vm15, %v483_v18  ;;  %v819_v18 = vld [vmem:[%s5721_s1 + $0x168] sm:$0xff] }
 0x3dc   :  { %3802 = vmatmul.msk.f32.vlgmr.msrb.gmra.mxu0 %vm281_vm15, %v486_v21  ;;  %v818_v21 = vld [vmem:[%s5721_s1 + $0x160] sm:$0xff] }
 0x3e4   :  { %3803 = vmatmul.msk.f32.gmra.mxu0 %vm281_vm15, %v489_v25  ;;  %v817_v25 = vld [vmem:[%s5721_s1 + $0x158] sm:$0xff] }
 0x439   :  { %v449_v31 = vpop.f32.mrf.mxu0 }
 0x43a   :  { %v382_v33 = vpop.xlane.xlu0 %381 }
 0x43b   :  { %4071 = vrcp.f32 %v382_v33 }
 0x441   :  { %v4072_v34 = vpop.eup %4071  ;;  %v452_v35 = vpop.f32.mrf.mxu0 }
 0x442   :  { %v394_v37 = vmul.f32 %v4072_v34, %v4068_v9 }
 0x444   :  { %3781 = vmatmul.msk.f32.gmra.mxu3 %vm352_vm0, %v394_v37 }
 0x449   :  { %v590_v38 = vpop.f32.mrf.mxu0 }
 0x44a   :  { %v631_v39 = vsel %vm352_vm0, %v590_v38, -inf }
 0x44b   :  { %632 = vmax.xlane.f32.xlu0 %v631_v39 }
 0x44c   :  { %3792 = vmatmul.msk.f32.vlgmr.msra.gmra.mxu3 %vm68_vm1, %v4406_v23 }
 0x44f   :  { %v420_v41 = vpop.f32.mrf.mxu3 }
 0x450   :  { %3812 = vmatmul.msk.f32.vlgmr.msra.gmra.mxu0 %vm281_vm15, %v420_v41 }
 0x451   :  { %v593_v42 = vpop.f32.mrf.mxu0 }
 0x452   :  { %v634_v47 = vsel %vm352_vm0, %v593_v42, -inf }
 0x454   :  { %3793 = vmatmul.msk.f32.gmra.mxu3 %vm68_vm1, %v4416_v36 }
 0x459   :  { %v625_v43 = vpop.f32.mrf.mxu0 }
 0x45a   :  { %v637_v40 = vsel %vm352_vm0, %v625_v43, -inf }
 0x45b   :  { %638 = vmax.xlane.f32.xlu1 %v637_v40 }
 0x45c   :  { %3794 = vmatmul.msk.f32.gmra.mxu3 %vm68_vm1, %v4425_v44 }
 0x461   :  { %v628_v46 = vpop.f32.mrf.mxu0 }
 0x462   :  { %v640_v48 = vsel %vm352_vm0, %v628_v46, -inf }
 0x463   :  { %635 = vmax.xlane.f32.xlu1 %v634_v47  ;;  %641 = vmax.xlane.f32.xlu2 %v640_v48  ;;  %v888_v47 = vld [vmem:[%s5721_s1 + $0x1a0] sm:$0xff]  ;;  %v887_v48 = vld [vmem:[%s5721_s1 + $0x198] sm:$0xff] }
 0x464   :  { %3795 = vmatmul.msk.f32.gmra.mxu3 %vm68_vm1, %v4434_v51 }
 0x4be   :  { %v633_v49 = vpop.xlane.xlu0 %632 }
 0x4bf   :  { %v643_v45 = vsub.f32 %v590_v38, %v633_v49  ;;  %v886_v49 = vld [vmem:[%s5721_s1 + $0x190] sm:$0xff] }
 0x4c1   :  { %v647_v52 = vmul.f32 1.442695, %v643_v45 }
 0x4c3   :  { %4073 = vpow2.f32 %v647_v52 }
 0x4c7   :  { %v423_v53 = vpop.f32.mrf.mxu3 }
 0x4c8   :  { %3813 = vmatmul.msk.f32.gmra.mxu0 %vm281_vm15, %v423_v53 }
 0x4c9   :  { %v4074_v54 = vpop.eup %4073 }
 0x4ca   :  { %v655_v55 = vsel %vm352_vm0, %v4074_v54, 0.0 }
 0x4cb   :  { %656 = vadd.xlane.f32.xlu1 %v655_v55  ;;  %v1177_v55 = vld [vmem:[%s5721_s1 + $0x208] sm:$0xff] }
 0x4ce   :  { %v639_v50 = vpop.xlane.xlu1 %638 }
 0x4cf   :  { %v645_v56 = vsub.f32 %v625_v43, %v639_v50  ;;  %v549_v57 = vpop.f32.mrf.mxu3  ;;  %v733_v43 = vld [vmem:[%s5721_s1 + $0x148] sm:$0xff]  ;;  %v1176_v50 = vld [vmem:[%s5721_s1 + $0x200] sm:$0xff] }
 0x4d0   :  { %3814 = vmatmul.msk.f32.gmra.mxu0 %vm281_vm15, %v449_v31  ;;  %v550_v5 = vadd.f32 %v4021_v59, %v549_v57  ;;  %761 = vmatpush.msrb.mxu3 %v733_v43 }
 0x4d1   :  { %v651_v58 = vmul.f32 1.442695, %v645_v56  ;;  %v1175_v56 = vld [vmem:[%s5721_s1 + $0x1f8] sm:$0xff] }
 0x4d3   :  { %4075 = vpow2.f32 %v651_v58  ;;  %v4023_v58 = vld [vmem:[%s5721_s1 + $0x1b8] ss:$0 sm:$0xff] }
 0x4d6   :  { %v636_v60 = vpop.xlane.xlu1 %635  ;;  %v642_v61 = vpop.xlane.xlu2 %641 }
 0x4d7   :  { %v644_v62 = vsub.f32 %v593_v42, %v636_v60  ;;  %v646_v63 = vsub.f32 %v628_v46, %v642_v61  ;;  %v552_v0 = vpop.f32.mrf.mxu3  ;;  %v889_v46 = vld [vmem:[%s5721_s1 + $0x1a8] sm:$0xff]  ;;  %v1174_v61 = vld [vmem:[%s5721_s1 + $0x1f0] sm:$0xff] }
 0x4d8   :  { %v553_v1 = vadd.f32 %v4021_v59, %v552_v0  ;;  %3815 = vmatmul.msk.f32.gmra.mxu0 %vm281_vm15, %v452_v35  ;;  %904 = vmatpush.msra.mxu3 %v889_v46 }
 0x4d9   :  { %v4076_v2 = vpop.eup %4075  ;;  %v649_v3 = vmul.f32 1.442695, %v644_v62  ;;  %v653_v4 = vmul.f32 1.442695, %v646_v63  ;;  %v4022_v62 = vld [vmem:[%s5721_s1 + $0x1b0] ss:$0 sm:$0xff] }
 0x4da   :  { %695 = vmatpush.msrb.mxu1 %v553_v1  ;;  %v661_v6 = vsel %vm352_vm0, %v4076_v2, 0.0  ;;  %905 = vmatpush.msra.mxu3 %v888_v47  ;;  %v4025_v47 = vld [vmem:[%s5721_s1 + $0x238] ss:$0 sm:$0xff] }
 0x4db   :  { %4077 = vpow2.f32 %v649_v3  ;;  %662 = vadd.xlane.f32.xlu2 %v661_v6 }
 0x4dc   :  { %4079 = vpow2.f32 %v653_v4  ;;  %696 = vmatpush.msrb.mxu1 %v550_v5  ;;  %906 = vmatpush.msra.mxu3 %v887_v48 }
 0x4de   :  { %834 = vmatpush.msra.mxu1 %v819_v18  ;;  %907 = vmatpush.msra.mxu3 %v886_v49 }
 0x4df   :  { %v555_v7 = vpop.f32.mrf.mxu3 }
 0x4e0   :  { %v556_v15 = vadd.f32 %v4021_v59, %v555_v7  ;;  %835 = vmatpush.msra.mxu1 %v818_v21 }
 0x4e1   :  { %v4078_v8 = vpop.eup %4077 }
 0x4e2   :  { %v4080_v9 = vpop.eup %4079  ;;  %v658_v10 = vsel %vm352_vm0, %v4078_v8, 0.0  ;;  %836 = vmatpush.msra.mxu1 %v817_v25 }
 0x4e3   :  { %659 = vadd.xlane.f32.xlu2 %v658_v10  ;;  %v664_v11 = vsel %vm352_vm0, %v4080_v9, 0.0 }
 0x4e4   :  { %665 = vadd.xlane.f32.xlu0 %v664_v11  ;;  %837 = vmatpush.msra.mxu1 %v816_v30  ;;  %v4668_v11 = vpop.f32.mrf.mxu0  ;;  %v1093_v30 = vld [vmem:[%s5721_s1 + $0x1c8] sm:$0xff] }
 0x4e7   :  { %v558_v13 = vpop.f32.mrf.mxu3 }
 0x4e8   :  { %v559_v14 = vadd.f32 %v4021_v59, %v558_v13 }
 0x4ea   :  { %724 = vmatpush.msrb.mxu2 %v559_v14 }
 0x4ec   :  { %725 = vmatpush.msrb.mxu2 %v556_v15 }
 0x4ee   :  { %869 = vmatpush.msra.mxu2 %v854_v19 }
 0x4f0   :  { %870 = vmatpush.msra.mxu2 %v853_v22 }
 0x4f2   :  { %871 = vmatpush.msra.mxu2 %v852_v26 }
 0x4f4   :  { %872 = vmatpush.msra.mxu2 %v851_v28 }
 0x53e   :  { %v657_v17 = vpop.xlane.xlu1 %656 }
 0x53f   :  { %4081 = vrcp.f32 %v657_v17 }
 0x545   :  { %v4082_v27 = vpop.eup %4081  ;;  %v4672_v14 = vpop.f32.mrf.mxu0 }
 0x546   :  { %v671_v29 = vmul.f32 %v4082_v27, %v4074_v54  ;;  %v4024_v27 = vld [vmem:[%s5721_s1 + $0x1c0] ss:$0 sm:$0xff] }
 0x548   :  { %3804 = vmatmul.msk.f32.vlgmr.msrb.gmra.mxu1 %vm352_vm0, %v671_v29 }
 0x54d   :  { %v4676_v17 = vpop.f32.mrf.mxu0 }
 0x54e   :  { %v663_v31 = vpop.xlane.xlu2 %662 }
 0x54f   :  { %4083 = vrcp.f32 %v663_v31 }
 0x555   :  { %v4084_v33 = vpop.eup %4083  ;;  %v4682_v21 = vpop.f32.mrf.mxu0 }
 0x556   :  { %v673_v34 = vmul.f32 %v4084_v33, %v4076_v2  ;;  %v660_v35 = vpop.xlane.xlu2 %659 }
 0x557   :  { %4085 = vrcp.f32 %v660_v35  ;;  %v666_v37 = vpop.xlane.xlu0 %665 }
 0x558   :  { %4087 = vrcp.f32 %v666_v37  ;;  %3806 = vmatmul.msk.f32.vlgmr.msrb.gmra.mxu2 %vm352_vm0, %v673_v34 }
 0x55d   :  { %v4086_v38 = vpop.eup %4085 }
 0x55e   :  { %v4088_v39 = vpop.eup %4087  ;;  %v672_v41 = vmul.f32 %v4086_v38, %v4078_v8 }
 0x55f   :  { %v674_v42 = vmul.f32 %v4088_v39, %v4080_v9 }
 0x560   :  { %3805 = vmatmul.msk.f32.gmra.mxu1 %vm352_vm0, %v672_v41 }
 0x561   :  { %3807 = vmatmul.msk.f32.gmra.mxu2 %vm352_vm0, %v674_v42 }
 0x568   :  { %3816 = vmatmul.msk.f32.vlgmr.msra.gmra.mxu1 %vm68_vm1, %v4406_v23 }
 0x569   :  { %3820 = vmatmul.msk.f32.vlgmr.msra.gmra.mxu2 %vm68_vm1, %v4406_v23 }
 0x570   :  { %3817 = vmatmul.msk.f32.gmra.mxu1 %vm68_vm1, %v4416_v36 }
 0x571   :  { %3821 = vmatmul.msk.f32.gmra.mxu2 %vm68_vm1, %v4416_v36 }
 0x578   :  { %3818 = vmatmul.msk.f32.gmra.mxu1 %vm68_vm1, %v4425_v44 }
 0x579   :  { %3822 = vmatmul.msk.f32.gmra.mxu2 %vm68_vm1, %v4425_v44 }
 0x580   :  { %3819 = vmatmul.msk.f32.gmra.mxu1 %vm68_vm1, %v4434_v51 }
 0x581   :  { %3823 = vmatmul.msk.f32.gmra.mxu2 %vm68_vm1, %v4434_v51 }
 0x5c5   :  { %v698_v40 = vpop.f32.mrf.mxu1 }
 0x5c6   :  { %3808 = vmatmul.msk.f32.vlgmr.msrb.gmra.mxu3 %vm281_vm15, %v698_v40 }
 0x5c7   :  { %1192 = vmatpush.msrb.mxu3 %v1177_v55 }
 0x5c9   :  { %1193 = vmatpush.msrb.mxu3 %v1176_v50 }
 0x5cb   :  { %1194 = vmatpush.msrb.mxu3 %v1175_v56 }
 0x5cd   :  { %1195 = vmatpush.msrb.mxu3 %v1174_v61 }
 0x5db   :  { %v727_v45 = vpop.f32.mrf.mxu2 }
 0x5dd   :  { %v701_v52 = vpop.f32.mrf.mxu1 }
 0x5de   :  { %3809 = vmatmul.msk.f32.gmra.mxu3 %vm281_vm15, %v701_v52 }
 0x5e4   :  { %v730_v53 = vpop.f32.mrf.mxu2 }
 0x5e5   :  { %v839_v57 = vpop.f32.mrf.mxu1 }
 0x5e6   :  { %3810 = vmatmul.msk.f32.gmra.mxu3 %vm281_vm15, %v727_v45  ;;  %v840_v0 = vadd.f32 %v4022_v62, %v839_v57 }
 0x5ec   :  { %v874_v54 = vpop.f32.mrf.mxu2 }
 0x5ed   :  { %v875_v63 = vadd.f32 %v4023_v58, %v874_v54  ;;  %v842_v2 = vpop.f32.mrf.mxu1 }
 0x5ee   :  { %3811 = vmatmul.msk.f32.gmra.mxu3 %vm281_vm15, %v730_v53  ;;  %v843_v3 = vadd.f32 %v4022_v62, %v842_v2 }
 0x5f4   :  { %v877_v59 = vpop.f32.mrf.mxu2 }
 0x5f5   :  { %v878_v60 = vadd.f32 %v4023_v58, %v877_v59  ;;  %v845_v6 = vpop.f32.mrf.mxu1 }
 0x5f6   :  { %3824 = vmatmul.msk.f32.vlgmr.msra.gmra.mxu3 %vm68_vm1, %v4406_v23  ;;  %v846_v8 = vadd.f32 %v4022_v62, %v845_v6 }
 0x5f7   :  { %3828 = vmatpush.xpose.msk.msrb.mxu0 %vm281_vm15, %v878_v60 }
 0x5fb   :  { %3829 = vmatpush.xpose.msk.msrb.mxu0 %vm281_vm15, %v875_v63 }
 0x5fc   :  { %v880_v1 = vpop.f32.mrf.mxu2 }
 0x5fd   :  { %v881_v7 = vadd.f32 %v4023_v58, %v880_v1  ;;  %v848_v9 = vpop.f32.mrf.mxu1 }
 0x5fe   :  { %3830 = vmatmul.msk.f32.vlgmr.msrb.gmra.mxu0 %vm281_vm15, %v840_v0  ;;  %3825 = vmatmul.msk.f32.gmra.mxu3 %vm68_vm1, %v4416_v36  ;;  %v849_v10 = vadd.f32 %v4022_v62, %v848_v9  ;;  %v1140_v9 = vld [vmem:[%s5721_s1 + $0x1d8] sm:$0xff] }
 0x604   :  { %v883_v4 = vpop.f32.mrf.mxu2 }
 0x605   :  { %v884_v5 = vadd.f32 %v4023_v58, %v883_v4 }
 0x606   :  { %3831 = vmatmul.msk.f32.gmra.mxu0 %vm281_vm15, %v843_v3  ;;  %3826 = vmatmul.msk.f32.gmra.mxu3 %vm68_vm1, %v4425_v44 }
 0x607   :  { %3832 = vmatpush.xpose.msk.msrb.mxu1 %vm281_vm15, %v884_v5 }
 0x60b   :  { %3833 = vmatpush.xpose.msk.msrb.mxu1 %vm281_vm15, %v881_v7  ;;  %v1142_v7 = vld [vmem:[%s5721_s1 + $0x1e8] sm:$0xff] }
 0x60e   :  { %3834 = vmatmul.msk.f32.vlgmr.msrb.gmra.mxu1 %vm281_vm15, %v846_v8  ;;  %3827 = vmatmul.msk.f32.gmra.mxu3 %vm68_vm1, %v4434_v51  ;;  %v1141_v8 = vld [vmem:[%s5721_s1 + $0x1e0] sm:$0xff] }
 0x60f   :  { %1121 = vmatpush.msra.mxu1 %v1093_v30  ;;  %v1209_v30 = vld [vmem:[%s5721_s1 + $0x210] sm:$0xff] }
 0x616   :  { %3835 = vmatmul.msk.f32.gmra.mxu1 %vm281_vm15, %v849_v10  ;;  %3848 = vmatmul.msk.f32.vlgmr.msrb.gmra.mxu3 %vm68_vm1, %v4406_v23  ;;  %v1139_v10 = vld [vmem:[%s5721_s1 + $0x1d0] sm:$0xff] }
 0x61e   :  { %3849 = vmatmul.msk.f32.gmra.mxu3 %vm68_vm1, %v4416_v36 }
 0x626   :  { %3850 = vmatmul.msk.f32.gmra.mxu3 %vm68_vm1, %v4425_v44 }
 0x62e   :  { %3851 = vmatmul.msk.f32.gmra.mxu3 %vm68_vm1, %v4434_v51 }
 0x649   :  { %v4670_v13 = vpop.f32.mrf.mxu3 }
 0x661   :  { %v4674_v15 = vpop.f32.mrf.mxu3 }
 0x669   :  { %v4678_v18 = vpop.f32.mrf.mxu3 }
 0x671   :  { %v4680_v19 = vpop.f32.mrf.mxu3 }
 0x679   :  { %v909_v22 = vpop.f32.mrf.mxu3 }
 0x67a   :  { %v910_v33 = vadd.f32 %v4024_v27, %v909_v22 }
 0x67b   :  { %v950_v25 = vpop.f32.mrf.mxu0 }
 0x67c   :  { %v991_v26 = vsel %vm352_vm0, %v950_v25, -inf }
 0x67d   :  { %992 = vmax.xlane.f32.xlu0 %v991_v26  ;;  %v1212_v26 = vld [vmem:[%s5721_s1 + $0x228] sm:$0xff] }
 0x681   :  { %v912_v28 = vpop.f32.mrf.mxu3 }
 0x682   :  { %v913_v29 = vadd.f32 %v4024_v27, %v912_v28  ;;  %v1210_v28 = vld [vmem:[%s5721_s1 + $0x218] sm:$0xff] }
 0x683   :  { %v953_v31 = vpop.f32.mrf.mxu0 }
 0x684   :  { %v994_v34 = vsel %vm352_vm0, %v953_v31, -inf  ;;  %1055 = vmatpush.msrb.mxu2 %v913_v29 }
 0x685   :  { %995 = vmax.xlane.f32.xlu1 %v994_v34 }
 0x686   :  { %1056 = vmatpush.msrb.mxu2 %v910_v33 }
 0x688   :  { %1157 = vmatpush.msra.mxu2 %v1142_v7 }
 0x689   :  { %v915_v35 = vpop.f32.mrf.mxu3 }
 0x68a   :  { %v916_v43 = vadd.f32 %v4024_v27, %v915_v35  ;;  %1158 = vmatpush.msra.mxu2 %v1141_v8 }
 0x68b   :  { %v985_v37 = vpop.f32.mrf.mxu1 }
 0x68c   :  { %v997_v38 = vsel %vm352_vm0, %v985_v37, -inf  ;;  %1159 = vmatpush.msra.mxu2 %v1140_v9 }
 0x68d   :  { %998 = vmax.xlane.f32.xlu2 %v997_v38 }
 0x68e   :  { %1160 = vmatpush.msra.mxu2 %v1139_v10 }
 0x691   :  { %v918_v39 = vpop.f32.mrf.mxu3 }
 0x692   :  { %v919_v41 = vadd.f32 %v4024_v27, %v918_v39  ;;  %v1211_v27 = vld [vmem:[%s5721_s1 + $0x220] sm:$0xff] }
 0x693   :  { %v988_v42 = vpop.f32.mrf.mxu1 }
 0x694   :  { %v1000_v40 = vsel %vm352_vm0, %v988_v42, -inf  ;;  %1084 = vmatpush.msra.mxu0 %v919_v41 }
 0x695   :  { %1001 = vmax.xlane.f32.xlu0 %v1000_v40 }
 0x696   :  { %1085 = vmatpush.msra.mxu0 %v916_v43 }
 0x698   :  { %1227 = vmatpush.msrb.mxu0 %v1212_v26 }
 0x699   :  { %v1197_v46 = vpop.f32.mrf.mxu3 }
 0x69a   :  { %v1198_v45 = vadd.f32 %v4025_v47, %v1197_v46  ;;  %1228 = vmatpush.msrb.mxu0 %v1211_v27 }
 0x69c   :  { %1229 = vmatpush.msrb.mxu0 %v1210_v28 }
 0x69e   :  { %1230 = vmatpush.msrb.mxu0 %v1209_v30 }
 0x6a1   :  { %v1200_v48 = vpop.f32.mrf.mxu3 }
 0x6a2   :  { %v1201_v49 = vadd.f32 %v4025_v47, %v1200_v48 }
 0x6a4   :  { %3856 = vmatpush.xpose.msk.msrb.mxu1 %vm281_vm15, %v1201_v49 }
 0x6a8   :  { %3857 = vmatpush.xpose.msk.msrb.mxu1 %vm281_vm15, %v1198_v45 }
 0x6a9   :  { %v1203_v22 = vpop.f32.mrf.mxu3 }
 0x6b1   :  { %v1206_v29 = vpop.f32.mrf.mxu3 }
 0x6b2   :  { %v1207_v35 = vadd.f32 %v4025_v47, %v1206_v29 }
 0x6f0   :  { %v993_v52 = vpop.xlane.xlu0 %992 }
 0x6f1   :  { %v1003_v53 = vsub.f32 %v950_v25, %v993_v52 }
 0x6f3   :  { %v1007_v54 = vmul.f32 1.442695, %v1003_v53 }
 0x6f5   :  { %4089 = vpow2.f32 %v1007_v54 }
 0x6f8   :  { %v996_v55 = vpop.xlane.xlu1 %995 }
 0x6f9   :  { %v1004_v50 = vsub.f32 %v953_v31, %v996_v55  ;;  %v4027_v55 = vld [vmem:[%s5721_s1 + $0x240] ss:$0 sm:$0xff] }
 0x6fb   :  { %v4090_v56 = vpop.eup %4089  ;;  %v1009_v57 = vmul.f32 1.442695, %v1004_v50 }
 0x6fc   :  { %v1015_v58 = vsel %vm352_vm0, %v4090_v56, 0.0 }
 0x6fd   :  { %4091 = vpow2.f32 %v1009_v57  ;;  %1016 = vadd.xlane.f32.xlu1 %v1015_v58 }
 0x700   :  { %v999_v59 = vpop.xlane.xlu2 %998 }
 0x701   :  { %v1005_v60 = vsub.f32 %v985_v37, %v999_v59  ;;  %v1204_v37 = vadd.f32 %v4025_v47, %v1203_v22 }
 0x703   :  { %v4092_v61 = vpop.eup %4091  ;;  %v1011_v62 = vmul.f32 1.442695, %v1005_v60 }
 0x704   :  { %v1018_v63 = vsel %vm352_vm0, %v4092_v61, 0.0 }
 0x705   :  { %4093 = vpow2.f32 %v1011_v62  ;;  %1019 = vadd.xlane.f32.xlu2 %v1018_v63 }
 0x708   :  { %v1002_v0 = vpop.xlane.xlu0 %1001 }
 0x709   :  { %v1006_v1 = vsub.f32 %v988_v42, %v1002_v0 }
 0x70b   :  { %v4094_v2 = vpop.eup %4093  ;;  %v1013_v3 = vmul.f32 1.442695, %v1006_v1 }
 0x70c   :  { %v1021_v4 = vsel %vm352_vm0, %v4094_v2, 0.0 }
 0x70d   :  { %4095 = vpow2.f32 %v1013_v3  ;;  %1022 = vadd.xlane.f32.xlu0 %v1021_v4 }
 0x713   :  { %v4096_v5 = vpop.eup %4095 }
 0x714   :  { %v1024_v6 = vsel %vm352_vm0, %v4096_v5, 0.0 }
 0x715   :  { %1025 = vadd.xlane.f32.xlu1 %v1024_v6 }
 0x770   :  { %v1017_v25 = vpop.xlane.xlu1 %1016 }
 0x771   :  { %4097 = vrcp.f32 %v1017_v25 }
 0x777   :  { %v4098_v31 = vpop.eup %4097 }
 0x778   :  { %v1031_v33 = vmul.f32 %v4098_v31, %v4090_v56  ;;  %v1020_v34 = vpop.xlane.xlu2 %1019 }
 0x779   :  { %4099 = vrcp.f32 %v1020_v34 }
 0x77a   :  { %3836 = vmatmul.msk.f32.vlgmr.msrb.gmra.mxu2 %vm352_vm0, %v1031_v33 }
 0x77b   :  { %3860 = vmatpush.xpose.msk.msrb.mxu2 %vm281_vm15, %v1207_v35 }
 0x77f   :  { %v4100_v38 = vpop.eup %4099  ;;  %3861 = vmatpush.xpose.msk.msrb.mxu2 %vm281_vm15, %v1204_v37 }
 0x780   :  { %v1023_v39 = vpop.xlane.xlu0 %1022  ;;  %v1032_v41 = vmul.f32 %v4100_v38, %v4092_v61 }
 0x781   :  { %4101 = vrcp.f32 %v1023_v39 }
 0x782   :  { %3837 = vmatmul.msk.f32.gmra.mxu2 %vm352_vm0, %v1032_v41 }
 0x787   :  { %v4102_v42 = vpop.eup %4101 }
 0x788   :  { %v1033_v43 = vmul.f32 %v4102_v42, %v4094_v2  ;;  %v1026_v40 = vpop.xlane.xlu1 %1025 }
 0x789   :  { %4103 = vrcp.f32 %v1026_v40 }
 0x78a   :  { %3838 = vmatmul.msk.f32.vlgmr.msra.gmra.mxu0 %vm352_vm0, %v1033_v43  ;;  %3844 = vmatmul.msk.f32.vlgmr.msra.gmra.mxu2 %vm68_vm1, %v4406_v23 }
 0x78f   :  { %v4104_v46 = vpop.eup %4103 }
 0x790   :  { %v1034_v48 = vmul.f32 %v4104_v46, %v4096_v5 }
 0x792   :  { %3839 = vmatmul.msk.f32.gmra.mxu0 %vm352_vm0, %v1034_v48  ;;  %3845 = vmatmul.msk.f32.gmra.mxu2 %vm68_vm1, %v4416_v36 }
 0x79a   :  { %3846 = vmatmul.msk.f32.gmra.mxu2 %vm68_vm1, %v4425_v44  ;;  %3852 = vmatmul.msk.f32.vlgmr.msrb.gmra.mxu0 %vm68_vm1, %v4406_v23 }
 0x7a2   :  { %3847 = vmatmul.msk.f32.gmra.mxu2 %vm68_vm1, %v4434_v51  ;;  %3853 = vmatmul.msk.f32.gmra.mxu0 %vm68_vm1, %v4416_v36 }
 0x7aa   :  { %3854 = vmatmul.msk.f32.gmra.mxu0 %vm68_vm1, %v4425_v44  ;;  %v4026_v44 = vld [vmem:[%s5721_s1 + $0x230] ss:$0 sm:$0xff] }
 0x7b2   :  { %3855 = vmatmul.msk.f32.gmra.mxu0 %vm68_vm1, %v4434_v51 }
 0x7fd   :  { %v1058_v47 = vpop.f32.mrf.mxu2 }
 0x7fe   :  { %3840 = vmatmul.msk.f32.vlgmr.msra.gmra.mxu1 %vm281_vm15, %v1058_v47 }
 0x805   :  { %v1061_v49 = vpop.f32.mrf.mxu2 }
 0x806   :  { %3841 = vmatmul.msk.f32.gmra.mxu1 %vm281_vm15, %v1061_v49 }
 0x807   :  { %v1087_v45 = vpop.f32.mrf.mxu0 }
 0x80d   :  { %v1162_v23 = vpop.f32.mrf.mxu2 }
 0x80e   :  { %3842 = vmatmul.msk.f32.gmra.mxu1 %vm281_vm15, %v1087_v45  ;;  %v1163_v51 = vadd.f32 %v4026_v44, %v1162_v23 }
 0x80f   :  { %v1090_v52 = vpop.f32.mrf.mxu0 }
 0x815   :  { %v1165_v53 = vpop.f32.mrf.mxu2 }
 0x816   :  { %3843 = vmatmul.msk.f32.gmra.mxu1 %vm281_vm15, %v1090_v52  ;;  %v1166_v59 = vadd.f32 %v4026_v44, %v1165_v53 }
 0x817   :  { %v1232_v36 = vpop.f32.mrf.mxu0 }
 0x818   :  { %v1233_v58 = vadd.f32 %v4027_v55, %v1232_v36 }
 0x81d   :  { %v1168_v54 = vpop.f32.mrf.mxu2 }
 0x81e   :  { %v1169_v50 = vadd.f32 %v4026_v44, %v1168_v54  ;;  %3858 = vmatmul.msk.f32.vlgmr.msrb.gmra.mxu1 %vm281_vm15, %v1163_v51 }
 0x81f   :  { %v1235_v56 = vpop.f32.mrf.mxu0 }
 0x820   :  { %v1236_v57 = vadd.f32 %v4027_v55, %v1235_v56  ;;  %3862 = vmatmul.msk.f32.vlgmr.msrb.gmra.mxu2 %vm281_vm15, %v1169_v50 }
 0x822   :  { %1378 = vmatpush.msra.mxu3 %v1236_v57 }
 0x824   :  { %1379 = vmatpush.msra.mxu3 %v1233_v58 }
 0x825   :  { %v1171_v60 = vpop.f32.mrf.mxu2 }
 0x826   :  { %v1172_v61 = vadd.f32 %v4026_v44, %v1171_v60  ;;  %3859 = vmatmul.msk.f32.gmra.mxu1 %vm281_vm15, %v1166_v59  ;;  %v1416_v59 = vld [vmem:[%s5721_s1 + $0x248] sm:$0xff] }
 0x827   :  { %v1238_v62 = vpop.f32.mrf.mxu0  ;;  %1444 = vmatpush.msra.mxu1 %v1416_v59 }
 0x828   :  { %3863 = vmatmul.msk.f32.gmra.mxu2 %vm281_vm15, %v1172_v61  ;;  %v1239_v1 = vadd.f32 %v4027_v55, %v1238_v62 }
 0x82f   :  { %v1241_v63 = vpop.f32.mrf.mxu0 }
 0x830   :  { %v1242_v0 = vadd.f32 %v4027_v55, %v1241_v63 }
 0x832   :  { %1407 = vmatpush.msra.mxu0 %v1242_v0  ;;  %v805_v0 = vadd.f32 %v4668_v11, %v4670_v13 }
 0x834   :  { %1408 = vmatpush.msra.mxu0 %v1239_v1 }
 0x87b   :  { %v4763_v2 = vpop.f32.mrf.mxu1 }
 0x87c   :  { %v1135_v1 = vadd.f32 %v4763_v2, %v805_v0 }
 0x883   :  { %v4765_v3 = vpop.f32.mrf.mxu1 }
 0x88b   :  { %v4767_v4 = vpop.f32.mrf.mxu1 }
 0x893   :  { %v4769_v5 = vpop.f32.mrf.mxu1 }
 0x89b   :  { %v1273_v6 = vpop.f32.mrf.mxu1 }
 0x89c   :  { %v1314_v7 = vsel %vm352_vm0, %v1273_v6, -inf }
 0x89d   :  { %1315 = vmax.xlane.f32.xlu2 %v1314_v7 }
 0x8a3   :  { %v1276_v8 = vpop.f32.mrf.mxu1  ;;  %v1308_v9 = vpop.f32.mrf.mxu2 }
 0x8a4   :  { %v1320_v10 = vsel %vm352_vm0, %v1308_v9, -inf  ;;  %v1317_v22 = vsel %vm352_vm0, %v1276_v8, -inf }
 0x8a5   :  { %1321 = vmax.xlane.f32.xlu1 %v1320_v10  ;;  %1318 = vmax.xlane.f32.xlu0 %v1317_v22  ;;  %v808_v22 = vadd.f32 %v4672_v14, %v4674_v15 }
 0x8a7   :  { %v1136_v11 = vadd.f32 %v4765_v3, %v808_v22 }
 0x8ab   :  { %v1311_v25 = vpop.f32.mrf.mxu2 }
 0x8ac   :  { %v1323_v26 = vsel %vm352_vm0, %v1311_v25, -inf }
 0x8ad   :  { %1324 = vmax.xlane.f32.xlu2 %v1323_v26 }
 0x910   :  { %v1316_v27 = vpop.xlane.xlu2 %1315 }
 0x911   :  { %v1326_v28 = vsub.f32 %v1273_v6, %v1316_v27  ;;  %v811_v27 = vadd.f32 %v4676_v17, %v4678_v18 }
 0x913   :  { %v1330_v29 = vmul.f32 1.442695, %v1326_v28 }
 0x915   :  { %4105 = vpow2.f32 %v1330_v29 }
 0x918   :  { %v1322_v30 = vpop.xlane.xlu1 %1321  ;;  %v1319_v31 = vpop.xlane.xlu0 %1318 }
 0x919   :  { %v1328_v33 = vsub.f32 %v1308_v9, %v1322_v30  ;;  %v1327_v34 = vsub.f32 %v1276_v8, %v1319_v31  ;;  %v4028_v8 = vld [vmem:[%s5721_s1 + $0x250] ss:$0 sm:$0xff]  ;;  %v814_v30 = vadd.f32 %v4682_v21, %v4680_v19 }
 0x91b   :  { %v4106_v35 = vpop.eup %4105  ;;  %v1334_v37 = vmul.f32 1.442695, %v1328_v33  ;;  %v1332_v38 = vmul.f32 1.442695, %v1327_v34 }
 0x91c   :  { %v1338_v39 = vsel %vm352_vm0, %v4106_v35, 0.0 }
 0x91d   :  { %4107 = vpow2.f32 %v1334_v37  ;;  %1339 = vadd.xlane.f32.xlu0 %v1338_v39 }
 0x91e   :  { %4109 = vpow2.f32 %v1332_v38 }
 0x920   :  { %v1325_v41 = vpop.xlane.xlu2 %1324 }
 0x921   :  { %v1329_v42 = vsub.f32 %v1311_v25, %v1325_v41 }
 0x923   :  { %v4108_v43 = vpop.eup %4107  ;;  %v1336_v40 = vmul.f32 1.442695, %v1329_v42 }
 0x924   :  { %v4110_v46 = vpop.eup %4109  ;;  %v1344_v48 = vsel %vm352_vm0, %v4108_v43, 0.0 }
 0x925   :  { %4111 = vpow2.f32 %v1336_v40  ;;  %1345 = vadd.xlane.f32.xlu2 %v1344_v48  ;;  %v1341_v47 = vsel %vm352_vm0, %v4110_v46, 0.0 }
 0x926   :  { %1342 = vadd.xlane.f32.xlu1 %v1341_v47 }
 0x92b   :  { %v4112_v49 = vpop.eup %4111 }
 0x92c   :  { %v1347_v45 = vsel %vm352_vm0, %v4112_v49, 0.0 }
 0x92d   :  { %1348 = vadd.xlane.f32.xlu0 %v1347_v45 }
 0x990   :  { %v1340_v23 = vpop.xlane.xlu0 %1339 }
 0x991   :  { %4113 = vrcp.f32 %v1340_v23 }
 0x997   :  { %v4114_v52 = vpop.eup %4113 }
 0x998   :  { %v1354_v53 = vmul.f32 %v4114_v52, %v4106_v35  ;;  %v1346_v36 = vpop.xlane.xlu2 %1345 }
 0x999   :  { %4115 = vrcp.f32 %v1346_v36  ;;  %v1343_v44 = vpop.xlane.xlu1 %1342  ;;  %v1563_v36 = vld [vmem:[%s5721_s1 + $0x270] sm:$0xff] }
 0x99a   :  { %4117 = vrcp.f32 %v1343_v44  ;;  %3864 = vmatmul.msk.f32.vlgmr.msra.gmra.mxu3 %vm352_vm0, %v1354_v53  ;;  %1590 = vmatpush.msra.mxu2 %v1563_v36  ;;  %v1562_v44 = vld [vmem:[%s5721_s1 + $0x268] sm:$0xff] }
 0x99c   :  { %1591 = vmatpush.msra.mxu2 %v1562_v44 }
 0x99f   :  { %v4116_v51 = vpop.eup %4115 }
 0x9a0   :  { %v4118_v54 = vpop.eup %4117  ;;  %v1356_v55 = vmul.f32 %v4116_v51, %v4108_v43  ;;  %v1349_v50 = vpop.xlane.xlu0 %1348  ;;  %v1561_v51 = vld [vmem:[%s5721_s1 + $0x260] sm:$0xff] }
 0x9a1   :  { %4119 = vrcp.f32 %v1349_v50  ;;  %v1355_v56 = vmul.f32 %v4118_v54, %v4110_v46  ;;  %1592 = vmatpush.msra.mxu2 %v1561_v51  ;;  %v1560_v54 = vld [vmem:[%s5721_s1 + $0x258] sm:$0xff] }
 0x9a2   :  { %3866 = vmatmul.msk.f32.vlgmr.msra.gmra.mxu0 %vm352_vm0, %v1356_v55 }
 0x9a3   :  { %3865 = vmatmul.msk.f32.gmra.mxu3 %vm352_vm0, %v1355_v56  ;;  %1593 = vmatpush.msra.mxu2 %v1560_v54 }
 0x9a7   :  { %v4120_v57 = vpop.eup %4119 }
 0x9a8   :  { %v1357_v58 = vmul.f32 %v4120_v57, %v4112_v49 }
 0x9aa   :  { %3867 = vmatmul.msk.f32.gmra.mxu0 %vm352_vm0, %v1357_v58 }
 0xa1d   :  { %v1381_v60 = vpop.f32.mrf.mxu3 }
 0xa1e   :  { %3868 = vmatmul.msk.f32.vlgmr.msra.gmra.mxu1 %vm281_vm15, %v1381_v60 }
 0xa1f   :  { %v1410_v62 = vpop.f32.mrf.mxu0 }
 0xa26   :  { %v1384_v61 = vpop.f32.mrf.mxu3 }
 0xa27   :  { %3869 = vmatmul.msk.f32.gmra.mxu1 %vm281_vm15, %v1384_v61  ;;  %v1413_v63 = vpop.f32.mrf.mxu0 }
 0xa2f   :  { %3870 = vmatmul.msk.f32.gmra.mxu1 %vm281_vm15, %v1410_v62 }
 0xa37   :  { %3871 = vmatmul.msk.f32.gmra.mxu1 %vm281_vm15, %v1413_v63 }
 0xa9b   :  { %v1446_v6 = vpop.f32.mrf.mxu1 }
 0xa9c   :  { %v1458_v7 = vadd.f32 %v1446_v6, %v1135_v1 }
 0xa9e   :  { %v1462_v9 = vadd.f32 %v1458_v7, %v4311_v12  ;;  %v1137_v12 = vadd.f32 %v4767_v4, %v811_v27 }
 0xaa0   :  { %v4797_v10 = vadd.f32 %v4028_v8, %v1462_v9 }
 0xaa2   :  { %v1472_v25 = vsel %vm68_vm1, %v4797_v10, 0.0 }
 0xaa3   :  { %1473 = vadd.xlane.f32.xlu1 %v1472_v25 }
 0xaa4   :  { %v1449_v13 = vpop.f32.mrf.mxu1 }
 0xaa5   :  { %v1459_v2 = vadd.f32 %v1449_v13, %v1136_v11 }
 0xaa7   :  { %v1463_v26 = vadd.f32 %v1459_v2, %v4318_v16  ;;  %v1138_v16 = vadd.f32 %v4769_v5, %v814_v30 }
 0xaa9   :  { %v4807_v28 = vadd.f32 %v4028_v8, %v1463_v26 }
 0xaab   :  { %v1475_v14 = vsel %vm68_vm1, %v4807_v28, 0.0 }
 0xaac   :  { %1476 = vadd.xlane.f32.xlu2 %v1475_v14  ;;  %v1452_v15 = vpop.f32.mrf.mxu1 }
 0xaad   :  { %v1460_v29 = vadd.f32 %v1452_v15, %v1137_v12 }
 0xaaf   :  { %v1464_v3 = vadd.f32 %v1460_v29, %v4325_v20 }
 0xab1   :  { %v4815_v31 = vadd.f32 %v4028_v8, %v1464_v3 }
 0xab3   :  { %v1478_v17 = vsel %vm68_vm1, %v4815_v31, 0.0 }
 0xab4   :  { %1479 = vadd.xlane.f32.xlu0 %v1478_v17  ;;  %v1455_v18 = vpop.f32.mrf.mxu1 }
 0xab5   :  { %v1461_v4 = vadd.f32 %v1455_v18, %v1138_v16 }
 0xab7   :  { %v1465_v33 = vadd.f32 %v1461_v4, %v4332_v24 }
 0xab9   :  { %v4821_v34 = vadd.f32 %v4028_v8, %v1465_v33 }
 0xabb   :  { %v1481_v20 = vsel %vm68_vm1, %v4821_v34, 0.0 }
 0xabc   :  { %1482 = vadd.xlane.f32.xlu1 %v1481_v20 }
 0xb16   :  { %v1474_v35 = vpop.xlane.xlu1 %1473 }
 0xb17   :  { %v1484_v19 = vmul.f32 %v1474_v35, %v4336_v32 }
 0xb19   :  { %v1488_v21 = vsub.f32 %v4797_v10, %v1484_v19 }
 0xb1b   :  { %v1492_v5 = vmul.f32 %v1488_v21, %v1488_v21 }
 0xb1d   :  { %v1496_v37 = vsel %vm68_vm1, %v1492_v5, 0.0 }
 0xb1e   :  { %1497 = vadd.xlane.f32.xlu2 %v1496_v37 }
 0xb1f   :  { %v1477_v38 = vpop.xlane.xlu2 %1476 }
 0xb20   :  { %v1485_v39 = vmul.f32 %v1477_v38, %v4336_v32 }
 0xb22   :  { %v4830_v24 = vsub.f32 %v4807_v28, %v1485_v39 }
 0xb24   :  { %v1493_v41 = vmul.f32 %v4830_v24, %v4830_v24 }
 0xb26   :  { %v1499_v42 = vsel %vm68_vm1, %v1493_v41, 0.0 }
 0xb27   :  { %1500 = vadd.xlane.f32.xlu0 %v1499_v42  ;;  %v1480_v43 = vpop.xlane.xlu0 %1479  ;;  %v4029_v42 = vld [vmem:[%s5721_s1 + $0x278] ss:$0 sm:$0xff] }
 0xb28   :  { %v1486_v40 = vmul.f32 %v1480_v43, %v4336_v32 }
 0xb2a   :  { %v4837_v46 = vsub.f32 %v4815_v31, %v1486_v40 }
 0xb2c   :  { %v1494_v48 = vmul.f32 %v4837_v46, %v4837_v46 }
 0xb2e   :  { %v1502_v47 = vsel %vm68_vm1, %v1494_v48, 0.0 }
 0xb2f   :  { %1503 = vadd.xlane.f32.xlu1 %v1502_v47  ;;  %v1483_v49 = vpop.xlane.xlu1 %1482 }
 0xb30   :  { %v1487_v45 = vmul.f32 %v1483_v49, %v4336_v32 }
 0xb32   :  { %v4844_v23 = vsub.f32 %v4821_v34, %v1487_v45 }
 0xb34   :  { %v1495_v52 = vmul.f32 %v4844_v23, %v4844_v23 }
 0xb36   :  { %v1505_v53 = vsel %vm68_vm1, %v1495_v52, 0.0 }
 0xb37   :  { %1506 = vadd.xlane.f32.xlu2 %v1505_v53 }
 0xb91   :  { %v1498_v55 = vpop.xlane.xlu2 %1497 }
 0xb92   :  { %v1508_v50 = vmul.f32 %v1498_v55, %v4336_v32  ;;  %v1790_v55 = vld [vmem:[%s5721_s1 + $0x2b8] sm:$0xff] }
 0xb93   :  { %1814 = vmatpush.msrb.mxu3 %v1790_v55 }
 0xb94   :  { %v1512_v56 = vadd.f32 1e-05, %v1508_v50 }
 0xb96   :  { %4121 = vrsqrt.f32 %v1512_v56  ;;  %vm1522_vm3 = vweird.f32 %v1512_v56 }
 0xb9a   :  { %v1501_v57 = vpop.xlane.xlu0 %1500 }
 0xb9b   :  { %v1509_v58 = vmul.f32 %v1501_v57, %v4336_v32 }
 0xb9c   :  { %v4122_v59 = vpop.eup %4121 }
 0xb9d   :  { %v1517_v60 = vmul.f32 %v4122_v59, %v1512_v56  ;;  %v1513_v61 = vadd.f32 1e-05, %v1509_v58  ;;  %vm1523_vm2 = vweird.f32 %v4122_v59  ;;  %v1789_v58 = vld [vmem:[%s5721_s1 + $0x2b0] sm:$0xff] }
 0xb9e   :  { %vm1524_vm4 = vmor %vm1522_vm3, %vm1523_vm2  ;;  %1815 = vmatpush.msrb.mxu3 %v1789_v58 }
 0xb9f   :  { %v1518_v62 = vmul.f32 %v4122_v59, %v1517_v60  ;;  %4123 = vrsqrt.f32 %v1513_v61  ;;  %vm1532_vm6 = vweird.f32 %v1513_v61 }
 0xba1   :  { %v1519_v63 = vmul.f32 0.5, %v1518_v62  ;;  %v1788_v62 = vld [vmem:[%s5721_s1 + $0x2a8] sm:$0xff] }
 0xba2   :  { %v1504_v0 = vpop.xlane.xlu1 %1503  ;;  %1816 = vmatpush.msrb.mxu3 %v1788_v62 }
 0xba3   :  { %v1520_v1 = vsub.f32 1.5, %v1519_v63  ;;  %v1510_v6 = vmul.f32 %v1504_v0, %v4336_v32 }
 0xba5   :  { %v4124_v7 = vpop.eup %4123  ;;  %v1521_v8 = vmul.f32 %v4122_v59, %v1520_v1  ;;  %v1514_v9 = vadd.f32 1e-05, %v1510_v6 }
 0xba6   :  { %v1527_v22 = vmul.f32 %v4124_v7, %v1513_v61  ;;  %vm1533_vm5 = vweird.f32 %v4124_v7 }
 0xba7   :  { %v1525_v25 = vsel %vm1524_vm4, %v4122_v59, %v1521_v8  ;;  %4125 = vrsqrt.f32 %v1514_v9  ;;  %vm1534_vm7 = vmor %vm1532_vm6, %vm1533_vm5  ;;  %vm1542_vm9 = vweird.f32 %v1514_v9  ;;  %v1787_v8 = vld [vmem:[%s5721_s1 + $0x2a0] sm:$0xff] }
 0xba8   :  { %v1556_v11 = vmul.f32 %v1525_v25, %v1488_v21  ;;  %v1528_v13 = vmul.f32 %v4124_v7, %v1527_v22  ;;  %1817 = vmatpush.msrb.mxu3 %v1787_v8 }
 0xbaa   :  { %v1529_v2 = vmul.f32 0.5, %v1528_v13  ;;  %v1507_v26 = vpop.xlane.xlu2 %1506  ;;  %3872 = vmatmul.msk.f32.vlgmr.msra.gmra.mxu2 %vm68_vm1, %v1556_v11  ;;  %v1786_v13 = vld [vmem:[%s5721_s1 + $0x298] sm:$0xff] }
 0xbab   :  { %v1511_v27 = vmul.f32 %v1507_v26, %v4336_v32  ;;  %1818 = vmatpush.msrb.mxu3 %v1786_v13 }
 0xbac   :  { %v1530_v12 = vsub.f32 1.5, %v1529_v2 }
 0xbad   :  { %v4126_v14 = vpop.eup %4125  ;;  %v1515_v15 = vadd.f32 1e-05, %v1511_v27 }
 0xbae   :  { %v1531_v29 = vmul.f32 %v4124_v7, %v1530_v12  ;;  %v1537_v3 = vmul.f32 %v4126_v14, %v1514_v9  ;;  %vm1543_vm8 = vweird.f32 %v4126_v14 }
 0xbaf   :  { %4127 = vrsqrt.f32 %v1515_v15  ;;  %vm1544_vm10 = vmor %vm1542_vm9, %vm1543_vm8  ;;  %vm1552_vm12 = vweird.f32 %v1515_v15 }
 0xbb0   :  { %v1538_v30 = vmul.f32 %v4126_v14, %v1537_v3  ;;  %v1535_v16 = vsel %vm1534_vm7, %v4124_v7, %v1531_v29  ;;  %vm1793_vm7 = vcmask 523264  }
 0xbb1   :  { %v1557_v17 = vmul.f32 %v1535_v16, %v4830_v24 }
 0xbb2   :  { %v1539_v18 = vmul.f32 0.5, %v1538_v30 }
 0xbb3   :  { %3873 = vmatmul.msk.f32.gmra.mxu2 %vm68_vm1, %v1557_v17 }
 0xbb4   :  { %v1540_v4 = vsub.f32 1.5, %v1539_v18  ;;  %v1784_v18 = vld [vmem:[%s5721_s1 + $0x288] sm:$0xff] }
 0xbb5   :  { %v4128_v33 = vpop.eup %4127 }
 0xbb6   :  { %v1541_v20 = vmul.f32 %v4126_v14, %v1540_v4  ;;  %v1547_v35 = vmul.f32 %v4128_v33, %v1515_v15  ;;  %vm1553_vm11 = vweird.f32 %v4128_v33  ;;  %v1785_v15 = vld [vmem:[%s5721_s1 + $0x290] sm:$0xff] }
 0xbb7   :  { %vm1554_vm13 = vmor %vm1552_vm12, %vm1553_vm11  ;;  %1819 = vmatpush.msrb.mxu3 %v1785_v15 }
 0xbb8   :  { %v1548_v19 = vmul.f32 %v4128_v33, %v1547_v35  ;;  %v1545_v21 = vsel %vm1544_vm10, %v4126_v14, %v1541_v20 }
 0xbb9   :  { %v1558_v5 = vmul.f32 %v1545_v21, %v4837_v46  ;;  %1820 = vmatpush.msrb.mxu3 %v1784_v18  ;;  %v1783_v21 = vld [vmem:[%s5721_s1 + $0x280] sm:$0xff] }
 0xbba   :  { %v1549_v37 = vmul.f32 0.5, %v1548_v19 }
 0xbbb   :  { %3874 = vmatmul.msk.f32.gmra.mxu2 %vm68_vm1, %v1558_v5  ;;  %1821 = vmatpush.msrb.mxu3 %v1783_v21 }
 0xbbc   :  { %v1550_v38 = vsub.f32 1.5, %v1549_v37 }
 0xbbe   :  { %v1551_v39 = vmul.f32 %v4128_v33, %v1550_v38 }
 0xbc0   :  { %v1555_v24 = vsel %vm1554_vm13, %v4128_v33, %v1551_v39 }
 0xbc1   :  { %v1559_v41 = vmul.f32 %v1555_v24, %v4844_v23 }
 0xbc3   :  { %3875 = vmatmul.msk.f32.gmra.mxu2 %vm68_vm1, %v1559_v41 }
 0xc2d   :  { %v1595_v43 = vpop.f32.mrf.mxu2 }
 0xc2e   :  { %v4875_v40 = vadd.f32 %v4029_v42, %v1595_v43 }
 0xc30   :  { %v4878_v46 = vmul.f32 0.70710677, %v4875_v40 }
 0xc32   :  { %v1615_v48 = vmul.f32 %v4878_v46, %v4878_v46 }
 0xc34   :  { %v4882_v47 = vmin.f32 %v1615_v48, 16.0 }
 0xc36   :  { %v1617_v49 = vmul.f32 2.1237322e-06, %v4882_v47  ;;  %v1628_v45 = vmul.f32 3.8918573e-05, %v4882_v47  ;;  %v1598_v23 = vpop.f32.mrf.mxu2 }
 0xc37   :  { %v4886_v52 = vadd.f32 %v4029_v42, %v1598_v23 }
 0xc38   :  { %v1618_v53 = vadd.f32 0.00028619796, %v1617_v49  ;;  %v1629_v36 = vadd.f32 0.001143296, %v1628_v45 }
 0xc39   :  { %v4889_v44 = vmul.f32 0.70710677, %v4886_v52 }
 0xc3a   :  { %v1619_v51 = vmul.f32 %v1618_v53, %v4882_v47  ;;  %v1630_v54 = vmul.f32 %v1629_v36, %v4882_v47 }
 0xc3b   :  { %v1655_v50 = vmul.f32 %v4889_v44, %v4889_v44 }
 0xc3c   :  { %v1620_v56 = vadd.f32 0.0036580483, %v1619_v51  ;;  %v1631_v57 = vadd.f32 0.014752088, %v1630_v54 }
 0xc3d   :  { %v4901_v59 = vmin.f32 %v1655_v50, 16.0 }
 0xc3e   :  { %v1632_v60 = vmul.f32 %v1631_v57, %v4882_v47  ;;  %v1601_v61 = vpop.f32.mrf.mxu2  ;;  %v1621_v63 = vmul.f32 %v1620_v56, %v4882_v47 }
 0xc3f   :  { %v1657_v0 = vmul.f32 2.1237322e-06, %v4901_v59  ;;  %v1668_v1 = vmul.f32 3.8918573e-05, %v4901_v59  ;;  %v4910_v6 = vadd.f32 %v4029_v42, %v1601_v61 }
 0xc40   :  { %v1633_v7 = vadd.f32 0.112945676, %v1632_v60  ;;  %v1622_v2 = vadd.f32 0.05243302, %v1621_v63 }
 0xc41   :  { %v1658_v9 = vadd.f32 0.00028619796, %v1657_v0  ;;  %v1669_v22 = vadd.f32 0.001143296, %v1668_v1  ;;  %v4917_v11 = vmul.f32 0.70710677, %v4910_v6 }
 0xc42   :  { %v1634_v25 = vmul.f32 %v1633_v7, %v4882_v47  ;;  %v1623_v4 = vmul.f32 %v1622_v2, %v4882_v47 }
 0xc43   :  { %v1659_v26 = vmul.f32 %v1658_v9, %v4901_v59  ;;  %v1670_v27 = vmul.f32 %v1669_v22, %v4901_v59  ;;  %v1695_v14 = vmul.f32 %v4917_v11, %v4917_v11 }
 0xc44   :  { %v1635_v12 = vadd.f32 0.4994258, %v1634_v25  ;;  %v1624_v39 = vadd.f32 0.18741608, %v1623_v4 }
 0xc45   :  { %v1671_v29 = vadd.f32 0.014752088, %v1670_v27  ;;  %v1660_v30 = vadd.f32 0.0036580483, %v1659_v26  ;;  %v4930_v16 = vmin.f32 %v1695_v14, 16.0 }
 0xc46   :  { %v1636_v3 = vmul.f32 %v1635_v12, %v4882_v47  ;;  %v1604_v17 = vpop.f32.mrf.mxu2  ;;  %v1625_v36 = vmul.f32 %v1624_v39, %v4882_v47 }
 0xc47   :  { %v1672_v33 = vmul.f32 %v1671_v29, %v4901_v59  ;;  %v1697_v35 = vmul.f32 2.1237322e-06, %v4930_v16  ;;  %v4938_v19 = vadd.f32 %v4029_v42, %v1604_v17  ;;  %v1708_v37 = vmul.f32 3.8918573e-05, %v4930_v16 }
 0xc48   :  { %v1637_v20 = vadd.f32 1.0, %v1636_v3  ;;  %v1661_v38 = vmul.f32 %v1660_v30, %v4901_v59  ;;  %v1626_v0 = vadd.f32 1.1283791, %v1625_v36 }
 0xc49   :  { %v1673_v5 = vadd.f32 0.112945676, %v1672_v33  ;;  %v1698_v41 = vadd.f32 0.00028619796, %v1697_v35  ;;  %v1709_v43 = vadd.f32 0.001143296, %v1708_v37 }
 0xc4a   :  { %4129 = vrcp.f32 %v1637_v20  ;;  %v4947_v48 = vmul.f32 0.70710677, %v4938_v19  ;;  %v1662_v45 = vadd.f32 0.05243302, %v1661_v38  ;;  %v1647_v1 = vand.u32 2147483647, %v1637_v20 }
 0xc4b   :  { %v1674_v24 = vmul.f32 %v1673_v5, %v4901_v59  ;;  %v1699_v49 = vmul.f32 %v1698_v41, %v4930_v16  ;;  %v1710_v23 = vmul.f32 %v1709_v43, %v4930_v16  ;;  %v1649_v7 = vand.u32 2147483648, %v1637_v20 }
 0xc4c   :  { %v1735_v53 = vmul.f32 %v4947_v48, %v4947_v48  ;;  %v1663_v60 = vmul.f32 %v1662_v45, %v4901_v59  ;;  %vm1643_vm2 = vweird.f32 %v1637_v20  ;;  %v1627_v15 = vmul.f32 %v1626_v0, %v4878_v46 }
 0xc4d   :  { %v1675_v42 = vadd.f32 0.4994258, %v1674_v24  ;;  %v1700_v55 = vadd.f32 0.0036580483, %v1699_v49  ;;  %v1711_v50 = vadd.f32 0.014752088, %v1710_v23 }
 0xc4e   :  { %v4955_v56 = vmin.f32 %v1735_v53, 16.0  ;;  %v1664_v2 = vadd.f32 0.18741608, %v1663_v60  ;;  %vm1648_vm4 = vcmp.eq.f32.partialorder %v1647_v1, 8.507059e+37  ;;  %v1650_v29 = vor.u32 1.1754944e-38, %v1649_v7 }
 0xc4f   :  { %v1676_v51 = vmul.f32 %v1675_v42, %v4901_v59  ;;  %v1712_v61 = vmul.f32 %v1711_v50, %v4930_v16  ;;  %v1701_v8 = vmul.f32 %v1700_v55, %v4930_v16  ;;  %v1607_v23 = vmul.f32 0.5, %v4875_v40 }
 0xc50   :  { %v4130_v54 = vpop.eup %4129  ;;  %v1737_v62 = vmul.f32 2.1237322e-06, %v4955_v56  ;;  %v1748_v63 = vmul.f32 3.8918573e-05, %v4955_v56 }
 0xc51   :  { %v1639_v57 = vmul.f32 %v4130_v54, %v1637_v20  ;;  %v4957_v58 = vadd.f32 1.0, %v1676_v51  ;;  %vm1644_vm14 = vweird.f32 %v4130_v54  ;;  %v1713_v22 = vadd.f32 0.112945676, %v1712_v61 }
 0xc52   :  { %v1738_v25 = vadd.f32 0.00028619796, %v1737_v62  ;;  %v1749_v13 = vadd.f32 0.001143296, %v1748_v63  ;;  %vm1645_vm3 = vmor %vm1643_vm2, %vm1644_vm14  ;;  %v1702_v17 = vadd.f32 0.05243302, %v1701_v8  ;;  %v1665_v20 = vmul.f32 %v1664_v2, %v4901_v59 }
 0xc53   :  { %v1640_v47 = vsub.f32 1.0, %v1639_v57  ;;  %4131 = vrcp.f32 %v4957_v58  ;;  %v1714_v27 = vmul.f32 %v1713_v22, %v4930_v16  ;;  %v1689_v39 = vand.u32 2147483648, %v4957_v58 }
 0xc54   :  { %v1739_v12 = vmul.f32 %v1738_v25, %v4955_v56  ;;  %v1750_v14 = vmul.f32 %v1749_v13, %v4955_v56  ;;  %v1703_v41 = vmul.f32 %v1702_v17, %v4930_v16  ;;  %v1666_v49 = vadd.f32 1.1283791, %v1665_v20 }
 0xc55   :  { %v1641_v9 = vmul.f32 %v4130_v54, %v1640_v47  ;;  %v1715_v18 = vadd.f32 0.4994258, %v1714_v27  ;;  %v1687_v59 = vand.u32 2147483647, %v4957_v58  ;;  %vm1683_vm6 = vweird.f32 %v4957_v58 }
 0xc56   :  { %v1751_v4 = vadd.f32 0.014752088, %v1750_v14  ;;  %v1740_v37 = vadd.f32 0.0036580483, %v1739_v12  ;;  %v1690_v50 = vor.u32 1.1754944e-38, %v1689_v39  ;;  %v1667_v60 = vmul.f32 %v1666_v49, %v4889_v44 }
 0xc57   :  { %v1642_v26 = vadd.f32 %v4130_v54, %v1641_v9  ;;  %v1716_v5 = vmul.f32 %v1715_v18, %v4930_v16  ;;  %v1704_v57 = vadd.f32 0.18741608, %v1703_v41  ;;  %vm1688_vm9 = vcmp.eq.f32.partialorder %v1687_v59, 8.507059e+37 }
 0xc58   :  { %v1752_v46 = vmul.f32 %v1751_v4, %v4955_v56  ;;  %v1741_v36 = vmul.f32 %v1740_v37, %v4955_v56  ;;  %v1608_v44 = vmul.f32 0.5, %v4886_v52 }
 0xc59   :  { %v4132_v3 = vpop.eup %4131  ;;  %v1646_v30 = vsel %vm1645_vm3, %v4130_v54, %v1642_v26  ;;  %v1717_v43 = vadd.f32 1.0, %v1716_v5  ;;  %v1705_v1 = vmul.f32 %v1704_v57, %v4930_v16 }
 0xc5a   :  { %v1651_v33 = vsel %vm1648_vm4, %v1650_v29, %v1646_v30  ;;  %v1679_v35 = vmul.f32 %v4132_v3, %v4957_v58  ;;  %v1753_v42 = vadd.f32 0.112945676, %v1752_v46  ;;  %vm1684_vm5 = vweird.f32 %v4132_v3 }
 0xc5b   :  { %v1652_v21 = vmul.f32 %v1651_v33, %v1627_v15  ;;  %4133 = vrcp.f32 %v1717_v43  ;;  %vm1685_vm8 = vmor %vm1683_vm6, %vm1684_vm5  ;;  %v1742_v63 = vadd.f32 0.05243302, %v1741_v36  ;;  %v1706_v2 = vadd.f32 1.1283791, %v1705_v1 }
 0xc5c   :  { %v1680_v38 = vsub.f32 1.0, %v1679_v35  ;;  %v1754_v54 = vmul.f32 %v1753_v42, %v4955_v56  ;;  %v1729_v26 = vand.u32 2147483648, %v1717_v43  ;;  %v1727_v14 = vand.u32 2147483647, %v1717_v43 }
 0xc5d   :  { %v3876_v24 = vclamps-f32 %v1652_v21, 1.0  ;;  %v1743_v9 = vmul.f32 %v1742_v63, %v4955_v56  ;;  %vm1723_vm11 = vweird.f32 %v1717_v43  ;;  %v1609_v21 = vmul.f32 0.5, %v4910_v6 }
 0xc5e   :  { %v1681_v45 = vmul.f32 %v4132_v3, %v1680_v38  ;;  %v1755_v62 = vadd.f32 0.4994258, %v1754_v54  ;;  %v1730_v16 = vor.u32 1.1754944e-38, %v1729_v26  ;;  %vm1728_vm13 = vcmp.eq.f32.partialorder %v1727_v14, 8.507059e+37 }
 0xc5f   :  { %v1775_v53 = vadd.f32 1.0, %v3876_v24  ;;  %v1744_v15 = vadd.f32 0.18741608, %v1743_v9 }
 0xc60   :  { %v1682_v51 = vadd.f32 %v4132_v3, %v1681_v45  ;;  %v1756_v47 = vmul.f32 %v1755_v62, %v4955_v56  ;;  %v1610_v45 = vmul.f32 0.5, %v4938_v19 }
 0xc61   :  { %v1779_v55 = vmul.f32 %v1775_v53, %v1607_v23  ;;  %v4134_v58 = vpop.eup %4133  ;;  %v1745_v18 = vmul.f32 %v1744_v15, %v4955_v56  ;;  %v4030_v53 = vld [vmem:[%s5721_s1 + $0x2c0] ss:$0 sm:$0xff] }
 0xc62   :  { %v1686_v61 = vsel %vm1685_vm8, %v4132_v3, %v1682_v51  ;;  %v1719_v8 = vmul.f32 %v4134_v58, %v1717_v43  ;;  %v1757_v22 = vadd.f32 1.0, %v1756_v47  ;;  %vm1724_vm10 = vweird.f32 %v4134_v58 }
 0xc63   :  { %v1691_v40 = vsel %vm1688_vm9, %v1690_v50, %v1686_v61  ;;  %3880 = vmatmul.msk.f32.vlgmr.msrb.gmra.mxu3 %vm1793_vm7, %v1779_v55  ;;  %vm1725_vm12 = vmor %vm1723_vm11, %vm1724_vm10  ;;  %v1707_v3 = vmul.f32 %v1706_v2, %v4917_v11  ;;  %v1746_v5 = vadd.f32 1.1283791, %v1745_v18  ;;  %v1976_v18 = vld [vmem:[%s5721_s1 + $0x2f8] sm:$0xff] }
 0xc64   :  { %v1692_v0 = vmul.f32 %v1691_v40, %v1667_v60  ;;  %v1720_v13 = vsub.f32 1.0, %v1719_v8  ;;  %4135 = vrcp.f32 %v1757_v22  ;;  %v1769_v37 = vand.u32 2147483648, %v1757_v22 }
 0xc65   :  { %v1767_v39 = vand.u32 2147483647, %v1757_v22  ;;  %vm1763_vm2 = vweird.f32 %v1757_v22  ;;  %v1747_v43 = vmul.f32 %v1746_v5, %v4947_v48  ;;  %v1974_v5 = vld [vmem:[%s5721_s1 + $0x2e8] sm:$0xff] }
 0xc66   :  { %v3877_v7 = vclamps-f32 %v1692_v0, 1.0  ;;  %v1721_v12 = vmul.f32 %v4134_v58, %v1720_v13  ;;  %v1770_v41 = vor.u32 1.1754944e-38, %v1769_v37  ;;  %v2009_v37 = vld [vmem:[%s5721_s1 + $0x308] sm:$0xff] }
 0xc67   :  { %vm1768_vm4 = vcmp.eq.f32.partialorder %v1767_v39, 8.507059e+37 }
 0xc68   :  { %v1776_v25 = vadd.f32 1.0, %v3877_v7  ;;  %v1722_v29 = vadd.f32 %v4134_v58, %v1721_v12 }
 0xc6a   :  { %v1780_v27 = vmul.f32 %v1776_v25, %v1608_v44  ;;  %v1726_v30 = vsel %vm1725_vm12, %v4134_v58, %v1722_v29  ;;  %v4136_v52 = vpop.eup %4135 }
 0xc6b   :  { %v1731_v17 = vsel %vm1728_vm13, %v1730_v16, %v1726_v30  ;;  %v1759_v33 = vmul.f32 %v4136_v52, %v1757_v22  ;;  %vm1764_vm14 = vweird.f32 %v4136_v52  ;;  %v1977_v30 = vld [vmem:[%s5721_s1 + $0x300] sm:$0xff] }
 0xc6c   :  { %3881 = vmatmul.msk.f32.gmra.mxu3 %vm1793_vm7, %v1780_v27  ;;  %v1732_v4 = vmul.f32 %v1731_v17, %v1707_v3  ;;  %vm1765_vm3 = vmor %vm1763_vm2, %vm1764_vm14  ;;  %v1930_v3 = vld [vmem:[%s5721_s1 + $0x2e0] sm:$0xff]  ;;  %1992 = vmatpush.msrb.mxu1 %v1977_v30  ;;  %v1929_v17 = vld [vmem:[%s5721_s1 + $0x2d8] sm:$0xff] }
 0xc6d   :  { %v1760_v35 = vsub.f32 1.0, %v1759_v33  ;;  %1957 = vmatpush.msrb.mxu0 %v1930_v3  ;;  %v1928_v33 = vld [vmem:[%s5721_s1 + $0x2d0] sm:$0xff] }
 0xc6e   :  { %v3878_v20 = vclamps-f32 %v1732_v4, 1.0  ;;  %v2011_v4 = vld [vmem:[%s5721_s1 + $0x318] sm:$0xff]  ;;  %1993 = vmatpush.msrb.mxu1 %v1976_v18 }
 0xc6f   :  { %v1761_v38 = vmul.f32 %v4136_v52, %v1760_v35  ;;  %1958 = vmatpush.msrb.mxu0 %v1929_v17  ;;  %v2010_v35 = vld [vmem:[%s5721_s1 + $0x310] sm:$0xff] }
 0xc70   :  { %v1777_v46 = vadd.f32 1.0, %v3878_v20  ;;  %v1975_v20 = vld [vmem:[%s5721_s1 + $0x2f0] sm:$0xff] }
 0xc71   :  { %v1762_v11 = vadd.f32 %v4136_v52, %v1761_v38  ;;  %1959 = vmatpush.msrb.mxu0 %v1928_v33  ;;  %1994 = vmatpush.msrb.mxu1 %v1975_v20  ;;  %v4032_v20 = vld [vmem:[%s5721_s1 + $0x330] ss:$0 sm:$0xff] }
 0xc72   :  { %v1781_v24 = vmul.f32 %v1777_v46, %v1609_v21  ;;  %v1927_v21 = vld [vmem:[%s5721_s1 + $0x2c8] sm:$0xff] }
 0xc73   :  { %v1766_v56 = vsel %vm1765_vm3, %v4136_v52, %v1762_v11  ;;  %v2012_v52 = vld [vmem:[%s5721_s1 + $0x320] sm:$0xff]  ;;  %1960 = vmatpush.msrb.mxu0 %v1927_v21  ;;  %1995 = vmatpush.msrb.mxu1 %v1974_v5 }
 0xc74   :  { %3882 = vmatmul.msk.f32.gmra.mxu3 %vm1793_vm7, %v1781_v24  ;;  %v1771_v42 = vsel %vm1768_vm4, %v1770_v41, %v1766_v56  ;;  %2027 = vmatpush.msrb.mxu2 %v2012_v52 }
 0xc75   :  { %v1772_v49 = vmul.f32 %v1771_v42, %v1747_v43 }
 0xc76   :  { %2028 = vmatpush.msrb.mxu2 %v2011_v4 }
 0xc77   :  { %v3879_v6 = vclamps-f32 %v1772_v49, 1.0 }
 0xc78   :  { %2029 = vmatpush.msrb.mxu2 %v2010_v35 }
 0xc79   :  { %v1778_v59 = vadd.f32 1.0, %v3879_v6 }
 0xc7a   :  { %2030 = vmatpush.msrb.mxu2 %v2009_v37  ;;  %v4031_v37 = vld [vmem:[%s5721_s1 + $0x328] ss:$0 sm:$0xff] }
 0xc7b   :  { %v1782_v23 = vmul.f32 %v1778_v59, %v1610_v45 }
 0xc7d   :  { %3883 = vmatmul.msk.f32.gmra.mxu3 %vm1793_vm7, %v1782_v23 }
 0xce6   :  { %v1823_v36 = vpop.f32.mrf.mxu3 }
 0xce7   :  { %v1824_v51 = vadd.f32 %v4030_v53, %v1823_v36 }
 0xce9   :  { %v4999_v48 = vadd.f32 %v1824_v51, %v4797_v10 }
 0xceb   :  { %v1839_v54 = vsel %vm68_vm1, %v4999_v48, 0.0 }
 0xcec   :  { %1840 = vadd.xlane.f32.xlu0 %v1839_v54 }
 0xcef   :  { %v1826_v55 = vpop.f32.mrf.mxu3 }
 0xcf0   :  { %v1827_v50 = vadd.f32 %v4030_v53, %v1826_v55 }
 0xcf2   :  { %v5004_v19 = vadd.f32 %v1827_v50, %v4807_v28 }
 0xcf4   :  { %v1842_v57 = vsel %vm68_vm1, %v5004_v19, 0.0 }
 0xcf5   :  { %1843 = vadd.xlane.f32.xlu1 %v1842_v57 }
 0xcf7   :  { %v1829_v60 = vpop.f32.mrf.mxu3 }
 0xcf8   :  { %v1830_v61 = vadd.f32 %v4030_v53, %v1829_v60  ;;  %v2220_v60 = vld [vmem:[%s5721_s1 + $0x360] sm:$0xff] }
 0xcf9   :  { %2235 = vmatpush.msra.mxu1 %v2220_v60 }
 0xcfa   :  { %v5009_v62 = vadd.f32 %v1830_v61, %v4815_v31  ;;  %v2255_v61 = vld [vmem:[%s5721_s1 + $0x380] sm:$0xff] }
 0xcfb   :  { %2270 = vmatpush.msra.mxu2 %v2255_v61  ;;  %v4035_v61 = vld [vmem:[%s5721_s1 + $0x3b0] ss:$0 sm:$0xff] }
 0xcfc   :  { %v1845_v10 = vsel %vm68_vm1, %v5009_v62, 0.0 }
 0xcfd   :  { %1846 = vadd.xlane.f32.xlu2 %v1845_v10  ;;  %v2219_v10 = vld [vmem:[%s5721_s1 + $0x358] sm:$0xff] }
 0xcfe   :  { %2236 = vmatpush.msra.mxu1 %v2219_v10 }
 0xd00   :  { %v1832_v40 = vpop.f32.mrf.mxu3 }
 0xd01   :  { %v1833_v63 = vadd.f32 %v4030_v53, %v1832_v40  ;;  %v2254_v40 = vld [vmem:[%s5721_s1 + $0x378] sm:$0xff] }
 0xd02   :  { %2271 = vmatpush.msra.mxu2 %v2254_v40 }
 0xd03   :  { %v5014_v0 = vadd.f32 %v1833_v63, %v4821_v34 }
 0xd05   :  { %v1848_v28 = vsel %vm68_vm1, %v5014_v0, 0.0 }
 0xd06   :  { %1849 = vadd.xlane.f32.xlu0 %v1848_v28  ;;  %v2218_v28 = vld [vmem:[%s5721_s1 + $0x350] sm:$0xff] }
 0xd07   :  { %2237 = vmatpush.msra.mxu1 %v2218_v28 }
 0xd5f   :  { %v1841_v47 = vpop.xlane.xlu0 %1840 }
 0xd60   :  { %v1851_v58 = vmul.f32 %v1841_v47, %v4336_v32  ;;  %v2253_v47 = vld [vmem:[%s5721_s1 + $0x370] sm:$0xff] }
 0xd61   :  { %2272 = vmatpush.msra.mxu2 %v2253_v47 }
 0xd62   :  { %v5020_v1 = vsub.f32 %v4999_v48, %v1851_v58 }
 0xd64   :  { %v1859_v31 = vmul.f32 %v5020_v1, %v5020_v1 }
 0xd66   :  { %v1863_v7 = vsel %vm68_vm1, %v1859_v31, 0.0  ;;  %v2252_v31 = vld [vmem:[%s5721_s1 + $0x368] sm:$0xff] }
 0xd67   :  { %1864 = vadd.xlane.f32.xlu1 %v1863_v7  ;;  %2273 = vmatpush.msra.mxu2 %v2252_v31 }
 0xd68   :  { %v1844_v8 = vpop.xlane.xlu1 %1843 }
 0xd69   :  { %v1852_v34 = vmul.f32 %v1844_v8, %v4336_v32 }
 0xd6b   :  { %v5027_v9 = vsub.f32 %v5004_v19, %v1852_v34 }
 0xd6d   :  { %v1860_v22 = vmul.f32 %v5027_v9, %v5027_v9 }
 0xd6f   :  { %v1866_v44 = vsel %vm68_vm1, %v1860_v22, 0.0 }
 0xd70   :  { %1867 = vadd.xlane.f32.xlu2 %v1866_v44  ;;  %v1847_v25 = vpop.xlane.xlu2 %1846 }
 0xd71   :  { %v1853_v13 = vmul.f32 %v1847_v25, %v4336_v32 }
 0xd73   :  { %v5034_v2 = vsub.f32 %v5009_v62, %v1853_v13 }
 0xd75   :  { %v1861_v26 = vmul.f32 %v5034_v2, %v5034_v2 }
 0xd77   :  { %v1869_v27 = vsel %vm68_vm1, %v1861_v26, 0.0 }
 0xd78   :  { %1870 = vadd.xlane.f32.xlu0 %v1869_v27 }
 0xd79   :  { %v1850_v12 = vpop.xlane.xlu0 %1849 }
 0xd7a   :  { %v1854_v14 = vmul.f32 %v1850_v12, %v4336_v32 }
 0xd7c   :  { %v5041_v15 = vsub.f32 %v5014_v0, %v1854_v14 }
 0xd7e   :  { %v1862_v29 = vmul.f32 %v5041_v15, %v5041_v15 }
 0xd80   :  { %v1872_v16 = vsel %vm68_vm1, %v1862_v29, 0.0 }
 0xd81   :  { %1873 = vadd.xlane.f32.xlu1 %v1872_v16 }
 0xdda   :  { %v1865_v46 = vpop.xlane.xlu1 %1864 }
 0xddb   :  { %v1875_v38 = vmul.f32 %v1865_v46, %v4336_v32 }
 0xddd   :  { %v1879_v39 = vadd.f32 1e-05, %v1875_v38  ;;  %v4033_v38 = vld [vmem:[%s5721_s1 + $0x338] ss:$0 sm:$0xff] }
 0xddf   :  { %4137 = vrsqrt.f32 %v1879_v39  ;;  %vm1889_vm6 = vweird.f32 %v1879_v39 }
 0xde3   :  { %v1868_v24 = vpop.xlane.xlu2 %1867 }
 0xde4   :  { %v1876_v11 = vmul.f32 %v1868_v24, %v4336_v32 }
 0xde5   :  { %v4138_v41 = vpop.eup %4137 }
 0xde6   :  { %v1884_v43 = vmul.f32 %v4138_v41, %v1879_v39  ;;  %v1880_v56 = vadd.f32 1e-05, %v1876_v11  ;;  %vm1890_vm5 = vweird.f32 %v4138_v41 }
 0xde7   :  { %vm1891_vm8 = vmor %vm1889_vm6, %vm1890_vm5 }
 0xde8   :  { %v1885_v42 = vmul.f32 %v4138_v41, %v1884_v43  ;;  %4139 = vrsqrt.f32 %v1880_v56  ;;  %vm1899_vm10 = vweird.f32 %v1880_v56 }
 0xdea   :  { %v1886_v49 = vmul.f32 0.5, %v1885_v42 }
 0xdeb   :  { %v1871_v53 = vpop.xlane.xlu0 %1870 }
 0xdec   :  { %v1887_v6 = vsub.f32 1.5, %v1886_v49  ;;  %v1877_v51 = vmul.f32 %v1871_v53, %v4336_v32 }
 0xdee   :  { %v4140_v45 = vpop.eup %4139  ;;  %v1888_v59 = vmul.f32 %v4138_v41, %v1887_v6  ;;  %v1881_v50 = vadd.f32 1e-05, %v1877_v51 }
 0xdef   :  { %v1894_v23 = vmul.f32 %v4140_v45, %v1880_v56  ;;  %vm1900_vm9 = vweird.f32 %v4140_v45 }
 0xdf0   :  { %v1892_v36 = vsel %vm1891_vm8, %v4138_v41, %v1888_v59  ;;  %4141 = vrsqrt.f32 %v1881_v50  ;;  %vm1901_vm11 = vmor %vm1899_vm10, %vm1900_vm9  ;;  %vm1909_vm13 = vweird.f32 %v1881_v50 }
 0xdf1   :  { %v5086_v54 = vmul.f32 %v1892_v36, %v5020_v1  ;;  %v1895_v55 = vmul.f32 %v4140_v45, %v1894_v23  ;;  %v2217_v1 = vld [vmem:[%s5721_s1 + $0x348] sm:$0xff] }
 0xdf2   :  { %2238 = vmatpush.msra.mxu1 %v2217_v1 }
 0xdf3   :  { %v1896_v57 = vmul.f32 0.5, %v1895_v55  ;;  %3884 = vmatmul.msk.f32.vlgmr.msrb.gmra.mxu0 %vm68_vm1, %v5086_v54  ;;  %3888 = vmatmul.msk.f32.vlgmr.msrb.gmra.mxu1 %vm68_vm1, %v5086_v54 }
 0xdf4   :  { %3892 = vmatmul.msk.f32.vlgmr.msrb.gmra.mxu2 %vm68_vm1, %v5086_v54  ;;  %v1874_v8 = vpop.xlane.xlu1 %1873 }
 0xdf5   :  { %v1897_v63 = vsub.f32 1.5, %v1896_v57  ;;  %v1878_v44 = vmul.f32 %v1874_v8, %v4336_v32 }
 0xdf6   :  { %v4142_v34 = vpop.eup %4141 }
 0xdf7   :  { %v1898_v58 = vmul.f32 %v4140_v45, %v1897_v63  ;;  %v1904_v25 = vmul.f32 %v4142_v34, %v1881_v50  ;;  %v1882_v13 = vadd.f32 1e-05, %v1878_v44  ;;  %vm1910_vm12 = vweird.f32 %v4142_v34 }
 0xdf8   :  { %vm1911_vm14 = vmor %vm1909_vm13, %vm1910_vm12 }
 0xdf9   :  { %v1902_v7 = vsel %vm1901_vm11, %v4140_v45, %v1898_v58  ;;  %v1905_v26 = vmul.f32 %v4142_v34, %v1904_v25  ;;  %4143 = vrsqrt.f32 %v1882_v13  ;;  %vm1919_vm3 = vweird.f32 %v1882_v13 }
 0xdfa   :  { %v5119_v22 = vmul.f32 %v1902_v7, %v5027_v9 }
 0xdfb   :  { %v1906_v27 = vmul.f32 0.5, %v1905_v26 }
 0xdfc   :  { %3885 = vmatmul.msk.f32.gmra.mxu0 %vm68_vm1, %v5119_v22  ;;  %3889 = vmatmul.msk.f32.gmra.mxu1 %vm68_vm1, %v5119_v22 }
 0xdfd   :  { %3893 = vmatmul.msk.f32.gmra.mxu2 %vm68_vm1, %v5119_v22  ;;  %v1907_v9 = vsub.f32 1.5, %v1906_v27 }
 0xdff   :  { %v1908_v12 = vmul.f32 %v4142_v34, %v1907_v9  ;;  %v4144_v14 = vpop.eup %4143 }
 0xe00   :  { %v1914_v16 = vmul.f32 %v4144_v14, %v1882_v13  ;;  %vm1920_vm2 = vweird.f32 %v4144_v14 }
 0xe01   :  { %v1912_v29 = vsel %vm1911_vm14, %v4142_v34, %v1908_v12  ;;  %vm1921_vm4 = vmor %vm1919_vm3, %vm1920_vm2 }
 0xe02   :  { %v5129_v3 = vmul.f32 %v1912_v29, %v5034_v2  ;;  %v1915_v30 = vmul.f32 %v4144_v14, %v1914_v16 }
 0xe04   :  { %3886 = vmatmul.msk.f32.gmra.mxu0 %vm68_vm1, %v5129_v3  ;;  %3890 = vmatmul.msk.f32.gmra.mxu1 %vm68_vm1, %v5129_v3  ;;  %v1916_v52 = vmul.f32 0.5, %v1915_v30 }
 0xe05   :  { %3894 = vmatmul.msk.f32.gmra.mxu2 %vm68_vm1, %v5129_v3 }
 0xe06   :  { %v1917_v17 = vsub.f32 1.5, %v1916_v52 }
 0xe08   :  { %v1918_v18 = vmul.f32 %v4144_v14, %v1917_v17 }
 0xe0a   :  { %v1922_v4 = vsel %vm1921_vm4, %v4144_v14, %v1918_v18 }
 0xe0b   :  { %v5138_v2 = vmul.f32 %v1922_v4, %v5041_v15 }
 0xe0d   :  { %3887 = vmatmul.msk.f32.gmra.mxu0 %vm68_vm1, %v5138_v2  ;;  %3891 = vmatmul.msk.f32.gmra.mxu1 %vm68_vm1, %v5138_v2 }
 0xe0e   :  { %3895 = vmatmul.msk.f32.gmra.mxu2 %vm68_vm1, %v5138_v2 }
 0xe15   :  { %3908 = vmatmul.msk.f32.vlgmr.msra.gmra.mxu1 %vm68_vm1, %v5086_v54 }
 0xe16   :  { %3912 = vmatmul.msk.f32.vlgmr.msra.gmra.mxu2 %vm68_vm1, %v5086_v54 }
 0xe1d   :  { %3909 = vmatmul.msk.f32.gmra.mxu1 %vm68_vm1, %v5119_v22 }
 0xe1e   :  { %3913 = vmatmul.msk.f32.gmra.mxu2 %vm68_vm1, %v5119_v22 }
 0xe25   :  { %3910 = vmatmul.msk.f32.gmra.mxu1 %vm68_vm1, %v5129_v3 }
 0xe26   :  { %3914 = vmatmul.msk.f32.gmra.mxu2 %vm68_vm1, %v5129_v3 }
 0xe2d   :  { %3911 = vmatmul.msk.f32.gmra.mxu1 %vm68_vm1, %v5138_v2 }
 0xe2e   :  { %3915 = vmatmul.msk.f32.gmra.mxu2 %vm68_vm1, %v5138_v2 }
 0xe70   :  { %v1997_v15 = vpop.f32.mrf.mxu1  ;;  %v1962_v5 = vpop.f32.mrf.mxu0 }
 0xe71   :  { %v1998_v46 = vadd.f32 %v4032_v20, %v1997_v15  ;;  %v1963_v11 = vadd.f32 %v4031_v37, %v1962_v5 }
 0xe77   :  { %v2032_v33 = vpop.f32.mrf.mxu2 }
 0xe78   :  { %v2033_v41 = vadd.f32 %v4033_v38, %v2032_v33 }
 0xe79   :  { %v2000_v35 = vpop.f32.mrf.mxu1  ;;  %v1965_v56 = vpop.f32.mrf.mxu0 }
 0xe7a   :  { %v2001_v21 = vadd.f32 %v4032_v20, %v2000_v35  ;;  %v1966_v42 = vadd.f32 %v4031_v37, %v1965_v56 }
 0xe7c   :  { %3896 = vmatpush.xpose.msk.msra.mxu3 %vm281_vm15, %v2001_v21 }
 0xe80   :  { %v2035_v39 = vpop.f32.mrf.mxu2  ;;  %3897 = vmatpush.xpose.msk.msra.mxu3 %vm281_vm15, %v1998_v46 }
 0xe81   :  { %v2036_v24 = vadd.f32 %v4033_v38, %v2035_v39  ;;  %v2003_v43 = vpop.f32.mrf.mxu1  ;;  %v1968_v59 = vpop.f32.mrf.mxu0 }
 0xe82   :  { %v2004_v23 = vadd.f32 %v4032_v20, %v2003_v43  ;;  %v1969_v51 = vadd.f32 %v4031_v37, %v1968_v59 }
 0xe83   :  { %3898 = vmatmul.msk.f32.vlgmr.msra.gmra.mxu3 %vm281_vm15, %v1963_v11 }
 0xe84   :  { %2178 = vmatpush.msrb.mxu3 %v2036_v24 }
 0xe86   :  { %2179 = vmatpush.msrb.mxu3 %v2033_v41 }
 0xe88   :  { %v2038_v49 = vpop.f32.mrf.mxu2 }
 0xe89   :  { %v2039_v55 = vadd.f32 %v4033_v38, %v2038_v49  ;;  %v4034_v49 = vld [vmem:[%s5721_s1 + $0x3a8] ss:$0 sm:$0xff] }
 0xe8a   :  { %v2006_v6 = vpop.f32.mrf.mxu1  ;;  %v1971_v50 = vpop.f32.mrf.mxu0 }
 0xe8b   :  { %3899 = vmatmul.msk.f32.gmra.mxu3 %vm281_vm15, %v1966_v42  ;;  %v2007_v45 = vadd.f32 %v4032_v20, %v2006_v6  ;;  %v1972_v60 = vadd.f32 %v4031_v37, %v1971_v50 }
 0xe8d   :  { %3900 = vmatpush.xpose.msk.msra.mxu0 %vm281_vm15, %v2007_v45 }
 0xe91   :  { %v2041_v53 = vpop.f32.mrf.mxu2  ;;  %3901 = vmatpush.xpose.msk.msra.mxu0 %vm281_vm15, %v2004_v23 }
 0xe92   :  { %v2042_v36 = vadd.f32 %v4033_v38, %v2041_v53  ;;  %v2240_v41 = vpop.f32.mrf.mxu1 }
 0xe93   :  { %v2241_v59 = vadd.f32 %v4034_v49, %v2240_v41 }
 0xe94   :  { %3902 = vmatmul.msk.f32.vlgmr.msra.gmra.mxu0 %vm281_vm15, %v1969_v51 }
 0xe95   :  { %2207 = vmatpush.msrb.mxu0 %v2042_v36 }
 0xe97   :  { %2208 = vmatpush.msrb.mxu0 %v2039_v55 }
 0xe99   :  { %v2275_v57 = vpop.f32.mrf.mxu2 }
 0xe9a   :  { %v2276_v63 = vadd.f32 %v4035_v61, %v2275_v57  ;;  %v2243_v53 = vpop.f32.mrf.mxu1 }
 0xe9b   :  { %v2244_v36 = vadd.f32 %v4034_v49, %v2243_v53 }
 0xe9c   :  { %3903 = vmatmul.msk.f32.gmra.mxu0 %vm281_vm15, %v1972_v60  ;;  %v2290_v60 = vld [vmem:[%s5721_s1 + $0x3a0] sm:$0xff] }
 0xe9d   :  { %2305 = vmatpush.msra.mxu3 %v2290_v60  ;;  %v2613_v60 = vld [vmem:[%s5721_s1 + $0x3f0] sm:$0xff] }
 0xea1   :  { %v2278_v10 = vpop.f32.mrf.mxu2 }
 0xea2   :  { %v2279_v40 = vadd.f32 %v4035_v61, %v2278_v10  ;;  %v2246_v51 = vpop.f32.mrf.mxu1  ;;  %v2288_v10 = vld [vmem:[%s5721_s1 + $0x390] sm:$0xff] }
 0xea3   :  { %v2247_v55 = vadd.f32 %v4034_v49, %v2246_v51  ;;  %v2615_v51 = vld [vmem:[%s5721_s1 + $0x400] sm:$0xff] }
 0xea4   :  { %3920 = vmatpush.xpose.msk.msra.mxu0 %vm281_vm15, %v2279_v40  ;;  %v2287_v40 = vld [vmem:[%s5721_s1 + $0x388] sm:$0xff] }
 0xea8   :  { %3921 = vmatpush.xpose.msk.msra.mxu0 %vm281_vm15, %v2276_v63  ;;  %v2216_v63 = vld [vmem:[%s5721_s1 + $0x340] sm:$0xff] }
 0xea9   :  { %v2281_v15 = vpop.f32.mrf.mxu2 }
 0xeaa   :  { %v2282_v24 = vadd.f32 %v4035_v61, %v2281_v15  ;;  %v2249_v50 = vpop.f32.mrf.mxu1 }
 0xeab   :  { %v2250_v57 = vadd.f32 %v4034_v49, %v2249_v50  ;;  %v2614_v50 = vld [vmem:[%s5721_s1 + $0x3f8] sm:$0xff] }
 0xeb1   :  { %v2284_v20 = vpop.f32.mrf.mxu2 }
 0xeb2   :  { %v2285_v46 = vadd.f32 %v4035_v61, %v2284_v20  ;;  %v2289_v61 = vld [vmem:[%s5721_s1 + $0x398] sm:$0xff] }
 0xeb3   :  { %2306 = vmatpush.msra.mxu3 %v2289_v61 }
 0xeb5   :  { %2307 = vmatpush.msra.mxu3 %v2288_v10  ;;  %v2612_v10 = vld [vmem:[%s5721_s1 + $0x3e8] sm:$0xff] }
 0xeb7   :  { %2308 = vmatpush.msra.mxu3 %v2287_v40 }
 0xf06   :  { %v2073_v31 = vpop.f32.mrf.mxu3 }
 0xf07   :  { %v2114_v7 = vsel %vm352_vm0, %v2073_v31, -inf }
 0xf0e   :  { %v2076_v14 = vpop.f32.mrf.mxu3 }
 0xf0f   :  { %v2117_v52 = vsel %vm352_vm0, %v2076_v14, -inf }
 0xf11   :  { %v2108_v28 = vpop.f32.mrf.mxu0 }
 0xf12   :  { %v2120_v47 = vsel %vm352_vm0, %v2108_v28, -inf }
 0xf13   :  { %2121 = vmax.xlane.f32.xlu2 %v2120_v47 }
 0xf19   :  { %v2111_v58 = vpop.f32.mrf.mxu0 }
 0xf1a   :  { %v2123_v1 = vsel %vm352_vm0, %v2111_v58, -inf }
 0xf1b   :  { %2124 = vmax.xlane.f32.xlu0 %v2123_v1 }
 0xf23   :  { %2115 = vmax.xlane.f32.xlu0 %v2114_v7 }
 0xf86   :  { %v2122_v8 = vpop.xlane.xlu2 %2121 }
 0xf87   :  { %v2128_v34 = vsub.f32 %v2108_v28, %v2122_v8 }
 0xf89   :  { %v2134_v44 = vmul.f32 1.442695, %v2128_v34 }
 0xf8b   :  { %4145 = vpow2.f32 %v2134_v44 }
 0xf8e   :  { %v2125_v25 = vpop.xlane.xlu0 %2124 }
 0xf8f   :  { %v2129_v13 = vsub.f32 %v2111_v58, %v2125_v25 }
 0xf91   :  { %v4146_v26 = vpop.eup %4145  ;;  %v2136_v27 = vmul.f32 1.442695, %v2129_v13 }
 0xf92   :  { %v2144_v9 = vsel %vm352_vm0, %v4146_v26, 0.0 }
 0xf93   :  { %4147 = vpow2.f32 %v2136_v27  ;;  %2145 = vadd.xlane.f32.xlu1 %v2144_v9 }
 0xf96   :  { %v2116_v12 = vpop.xlane.xlu0 %2115 }
 0xf97   :  { %v2126_v29 = vsub.f32 %v2073_v31, %v2116_v12 }
 0xf99   :  { %v4148_v16 = vpop.eup %4147  ;;  %v2130_v30 = vmul.f32 1.442695, %v2126_v29 }
 0xf9a   :  { %v2147_v17 = vsel %vm352_vm0, %v4148_v16, 0.0 }
 0xf9b   :  { %4149 = vpow2.f32 %v2130_v30  ;;  %2118 = vmax.xlane.f32.xlu1 %v2117_v52  ;;  %2148 = vadd.xlane.f32.xlu2 %v2147_v17 }
 0xfa1   :  { %v4150_v18 = vpop.eup %4149 }
 0xfa2   :  { %v2138_v4 = vsel %vm352_vm0, %v4150_v18, 0.0 }
 0xfa3   :  { %2139 = vadd.xlane.f32.xlu2 %v2138_v4 }
0x1006   :  { %v2146_v33 = vpop.xlane.xlu1 %2145 }
0x1007   :  { %4151 = vrcp.f32 %v2146_v33  ;;  %v4036_v33 = vld [vmem:[%s5721_s1 + $0x3b8] ss:$0 sm:$0xff] }
0x100d   :  { %v4152_v35 = vpop.eup %4151 }
0x100e   :  { %v2156_v21 = vmul.f32 %v4152_v35, %v4146_v26  ;;  %v2119_v5 = vpop.xlane.xlu1 %2118  ;;  %v2149_v37 = vpop.xlane.xlu2 %2148 }
0x100f   :  { %v2127_v38 = vsub.f32 %v2076_v14, %v2119_v5  ;;  %4153 = vrcp.f32 %v2149_v37 }
0x1010   :  { %3906 = vmatmul.msk.f32.vlgmr.msrb.gmra.mxu0 %vm352_vm0, %v2156_v21 }
0x1011   :  { %v2132_v39 = vmul.f32 1.442695, %v2127_v38  ;;  %3924 = vmatpush.xpose.msk.msrb.mxu0 %vm281_vm15, %v2285_v46 }
0x1013   :  { %4155 = vpow2.f32 %v2132_v39 }
0x1015   :  { %v4154_v11 = vpop.eup %4153  ;;  %3925 = vmatpush.xpose.msk.msrb.mxu0 %vm281_vm15, %v2282_v24 }
0x1016   :  { %v2140_v43 = vpop.xlane.xlu2 %2139  ;;  %v2157_v56 = vmul.f32 %v4154_v11, %v4148_v16 }
0x1017   :  { %4157 = vrcp.f32 %v2140_v43 }
0x1018   :  { %3907 = vmatmul.msk.f32.gmra.mxu0 %vm352_vm0, %v2157_v56 }
0x1019   :  { %v4156_v42 = vpop.eup %4155 }
0x101a   :  { %v2141_v6 = vsel %vm352_vm0, %v4156_v42, 0.0 }
0x101b   :  { %2142 = vadd.xlane.f32.xlu0 %v2141_v6 }
0x101d   :  { %v4158_v45 = vpop.eup %4157 }
0x101e   :  { %v2154_v23 = vmul.f32 %v4158_v45, %v4150_v18 }
0x1020   :  { %3904 = vmatmul.msk.f32.vlgmr.msrb.gmra.mxu3 %vm352_vm0, %v2154_v23  ;;  %3922 = vmatmul.msk.f32.vlgmr.msra.gmra.mxu0 %vm281_vm15, %v2241_v59 }
0x1021   :  { %2563 = vmatpush.msra.mxu0 %v2216_v63  ;;  %v2577_v63 = vld [vmem:[%s5721_s1 + $0x3c8] sm:$0xff] }
0x1028   :  { %3923 = vmatmul.msk.f32.gmra.mxu0 %vm281_vm15, %v2244_v36  ;;  %v2580_v36 = vld [vmem:[%s5721_s1 + $0x3e0] sm:$0xff] }
0x1030   :  { %3926 = vmatmul.msk.f32.vlgmr.msrb.gmra.mxu0 %vm281_vm15, %v2247_v55  ;;  %v2579_v55 = vld [vmem:[%s5721_s1 + $0x3d8] sm:$0xff] }
0x1038   :  { %3927 = vmatmul.msk.f32.gmra.mxu0 %vm281_vm15, %v2250_v57  ;;  %v2578_v57 = vld [vmem:[%s5721_s1 + $0x3d0] sm:$0xff] }
0x108d   :  { %v2210_v28 = vpop.f32.mrf.mxu0 }
0x108e   :  { %v2143_v47 = vpop.xlane.xlu0 %2142 }
0x108f   :  { %4159 = vrcp.f32 %v2143_v47 }
0x1095   :  { %v4160_v58 = vpop.eup %4159  ;;  %v2213_v1 = vpop.f32.mrf.mxu0 }
0x1096   :  { %v2155_v31 = vmul.f32 %v4160_v58, %v4156_v42 }
0x1098   :  { %3905 = vmatmul.msk.f32.gmra.mxu3 %vm352_vm0, %v2155_v31 }
0x109d   :  { %v2351_v7 = vpop.f32.mrf.mxu0 }
0x109e   :  { %v2392_v8 = vsel %vm352_vm0, %v2351_v7, -inf }
0x109f   :  { %2393 = vmax.xlane.f32.xlu0 %v2392_v8 }
0x10a0   :  { %3916 = vmatmul.msk.f32.vlgmr.msra.gmra.mxu3 %vm68_vm1, %v5086_v54 }
0x10a3   :  { %v2181_v34 = vpop.f32.mrf.mxu3 }
0x10a4   :  { %3936 = vmatmul.msk.f32.vlgmr.msra.gmra.mxu0 %vm281_vm15, %v2181_v34 }
0x10a5   :  { %v2354_v44 = vpop.f32.mrf.mxu0 }
0x10a6   :  { %v2395_v27 = vsel %vm352_vm0, %v2354_v44, -inf }
0x10a8   :  { %3917 = vmatmul.msk.f32.gmra.mxu3 %vm68_vm1, %v5119_v22 }
0x10ad   :  { %v2386_v25 = vpop.f32.mrf.mxu0 }
0x10ae   :  { %v2398_v13 = vsel %vm352_vm0, %v2386_v25, -inf }
0x10af   :  { %2399 = vmax.xlane.f32.xlu1 %v2398_v13 }
0x10b0   :  { %3918 = vmatmul.msk.f32.gmra.mxu3 %vm68_vm1, %v5129_v3 }
0x10b5   :  { %v2389_v26 = vpop.f32.mrf.mxu0 }
0x10b6   :  { %v2401_v9 = vsel %vm352_vm0, %v2389_v26, -inf }
0x10b7   :  { %2396 = vmax.xlane.f32.xlu1 %v2395_v27  ;;  %2402 = vmax.xlane.f32.xlu2 %v2401_v9  ;;  %v2649_v27 = vld [vmem:[%s5721_s1 + $0x418] sm:$0xff]  ;;  %v2648_v9 = vld [vmem:[%s5721_s1 + $0x410] sm:$0xff] }
0x10b8   :  { %3919 = vmatmul.msk.f32.gmra.mxu3 %vm68_vm1, %v5138_v2 }
0x1112   :  { %v2394_v12 = vpop.xlane.xlu0 %2393 }
0x1113   :  { %v2404_v14 = vsub.f32 %v2351_v7, %v2394_v12  ;;  %v2647_v12 = vld [vmem:[%s5721_s1 + $0x408] sm:$0xff] }
0x1115   :  { %v2408_v29 = vmul.f32 1.442695, %v2404_v14 }
0x1117   :  { %4161 = vpow2.f32 %v2408_v29 }
0x111b   :  { %v2184_v16 = vpop.f32.mrf.mxu3 }
0x111c   :  { %3937 = vmatmul.msk.f32.gmra.mxu0 %vm281_vm15, %v2184_v16 }
0x111d   :  { %v4162_v30 = vpop.eup %4161 }
0x111e   :  { %v2416_v52 = vsel %vm352_vm0, %v4162_v30, 0.0 }
0x111f   :  { %2417 = vadd.xlane.f32.xlu1 %v2416_v52  ;;  %v2938_v52 = vld [vmem:[%s5721_s1 + $0x480] sm:$0xff] }
0x1122   :  { %v2400_v17 = vpop.xlane.xlu1 %2399 }
0x1123   :  { %v2406_v18 = vsub.f32 %v2386_v25, %v2400_v17  ;;  %v2310_v4 = vpop.f32.mrf.mxu3  ;;  %v2494_v25 = vld [vmem:[%s5721_s1 + $0x3c0] sm:$0xff]  ;;  %v2937_v17 = vld [vmem:[%s5721_s1 + $0x478] sm:$0xff] }
0x1124   :  { %3938 = vmatmul.msk.f32.gmra.mxu0 %vm281_vm15, %v2210_v28  ;;  %v2311_v11 = vadd.f32 %v4036_v33, %v2310_v4  ;;  %2522 = vmatpush.msrb.mxu3 %v2494_v25 }
0x1125   :  { %v2412_v15 = vmul.f32 1.442695, %v2406_v18  ;;  %v2936_v18 = vld [vmem:[%s5721_s1 + $0x470] sm:$0xff] }
0x1127   :  { %4163 = vpow2.f32 %v2412_v15  ;;  %v4038_v15 = vld [vmem:[%s5721_s1 + $0x430] ss:$0 sm:$0xff] }
0x112a   :  { %v2397_v20 = vpop.xlane.xlu1 %2396  ;;  %v2403_v35 = vpop.xlane.xlu2 %2402 }
0x112b   :  { %v2405_v21 = vsub.f32 %v2354_v44, %v2397_v20  ;;  %v2407_v5 = vsub.f32 %v2389_v26, %v2403_v35  ;;  %v2313_v37 = vpop.f32.mrf.mxu3  ;;  %v2650_v26 = vld [vmem:[%s5721_s1 + $0x420] sm:$0xff]  ;;  %v2935_v35 = vld [vmem:[%s5721_s1 + $0x468] sm:$0xff] }
0x112c   :  { %v2314_v46 = vadd.f32 %v4036_v33, %v2313_v37  ;;  %3939 = vmatmul.msk.f32.gmra.mxu0 %vm281_vm15, %v2213_v1  ;;  %2665 = vmatpush.msra.mxu3 %v2650_v26 }
0x112d   :  { %v4164_v38 = vpop.eup %4163  ;;  %v2410_v39 = vmul.f32 1.442695, %v2405_v21  ;;  %v2414_v24 = vmul.f32 1.442695, %v2407_v5  ;;  %v4037_v21 = vld [vmem:[%s5721_s1 + $0x428] ss:$0 sm:$0xff] }
0x112e   :  { %2456 = vmatpush.msrb.mxu1 %v2314_v46  ;;  %v2422_v41 = vsel %vm352_vm0, %v4164_v38, 0.0  ;;  %2666 = vmatpush.msra.mxu3 %v2649_v27 }
0x112f   :  { %4165 = vpow2.f32 %v2410_v39  ;;  %2423 = vadd.xlane.f32.xlu2 %v2422_v41 }
0x1130   :  { %4167 = vpow2.f32 %v2414_v24  ;;  %2457 = vmatpush.msrb.mxu1 %v2311_v11  ;;  %2667 = vmatpush.msra.mxu3 %v2648_v9  ;;  %v4040_v9 = vld [vmem:[%s5721_s1 + $0x4b0] ss:$0 sm:$0xff] }
0x1132   :  { %2595 = vmatpush.msra.mxu1 %v2580_v36  ;;  %2668 = vmatpush.msra.mxu3 %v2647_v12 }
0x1133   :  { %v2316_v43 = vpop.f32.mrf.mxu3 }
0x1134   :  { %v2317_v23 = vadd.f32 %v4036_v33, %v2316_v43  ;;  %2596 = vmatpush.msra.mxu1 %v2579_v55 }
0x1135   :  { %v4166_v56 = vpop.eup %4165 }
0x1136   :  { %v4168_v42 = vpop.eup %4167  ;;  %v2419_v49 = vsel %vm352_vm0, %v4166_v56, 0.0  ;;  %2597 = vmatpush.msra.mxu1 %v2578_v57 }
0x1137   :  { %2420 = vadd.xlane.f32.xlu2 %v2419_v49  ;;  %v2425_v6 = vsel %vm352_vm0, %v4168_v42, 0.0 }
0x1138   :  { %2426 = vadd.xlane.f32.xlu0 %v2425_v6  ;;  %2598 = vmatpush.msra.mxu1 %v2577_v63  ;;  %v5348_v6 = vpop.f32.mrf.mxu0 }
0x113b   :  { %v2319_v45 = vpop.f32.mrf.mxu3 }
0x113c   :  { %v2320_v59 = vadd.f32 %v4036_v33, %v2319_v45 }
0x113e   :  { %2485 = vmatpush.msrb.mxu2 %v2320_v59 }
0x1140   :  { %2486 = vmatpush.msrb.mxu2 %v2317_v23 }
0x1142   :  { %2630 = vmatpush.msra.mxu2 %v2615_v51 }
0x1144   :  { %2631 = vmatpush.msra.mxu2 %v2614_v50 }
0x1146   :  { %2632 = vmatpush.msra.mxu2 %v2613_v60 }
0x1148   :  { %2633 = vmatpush.msra.mxu2 %v2612_v10  ;;  %v4039_v10 = vld [vmem:[%s5721_s1 + $0x438] ss:$0 sm:$0xff] }
0x1192   :  { %v2418_v53 = vpop.xlane.xlu1 %2417 }
0x1193   :  { %4169 = vrcp.f32 %v2418_v53 }
0x1199   :  { %v4170_v61 = vpop.eup %4169  ;;  %v5352_v59 = vpop.f32.mrf.mxu0 }
0x119a   :  { %v2432_v40 = vmul.f32 %v4170_v61, %v4162_v30 }
0x119c   :  { %3928 = vmatmul.msk.f32.vlgmr.msrb.gmra.mxu1 %vm352_vm0, %v2432_v40 }
0x11a1   :  { %v5356_v53 = vpop.f32.mrf.mxu0 }
0x11a2   :  { %v2424_v28 = vpop.xlane.xlu2 %2423 }
0x11a3   :  { %4171 = vrcp.f32 %v2424_v28  ;;  %v2854_v28 = vld [vmem:[%s5721_s1 + $0x440] sm:$0xff] }
0x11a9   :  { %v4172_v47 = vpop.eup %4171  ;;  %v2574_v51 = vpop.f32.mrf.mxu0 }
0x11aa   :  { %v2434_v58 = vmul.f32 %v4172_v47, %v4164_v38  ;;  %v2421_v1 = vpop.xlane.xlu2 %2420 }
0x11ab   :  { %4173 = vrcp.f32 %v2421_v1  ;;  %v2427_v31 = vpop.xlane.xlu0 %2426 }
0x11ac   :  { %4175 = vrcp.f32 %v2427_v31  ;;  %3930 = vmatmul.msk.f32.vlgmr.msrb.gmra.mxu2 %vm352_vm0, %v2434_v58 }
0x11b1   :  { %v4174_v7 = vpop.eup %4173 }
0x11b2   :  { %v4176_v8 = vpop.eup %4175  ;;  %v2433_v34 = vmul.f32 %v4174_v7, %v4166_v56 }
0x11b3   :  { %v2435_v44 = vmul.f32 %v4176_v8, %v4168_v42 }
0x11b4   :  { %3929 = vmatmul.msk.f32.gmra.mxu1 %vm352_vm0, %v2433_v34 }
0x11b5   :  { %3931 = vmatmul.msk.f32.gmra.mxu2 %vm352_vm0, %v2435_v44 }
0x11bc   :  { %3940 = vmatmul.msk.f32.vlgmr.msra.gmra.mxu1 %vm68_vm1, %v5086_v54 }
0x11bd   :  { %3944 = vmatmul.msk.f32.vlgmr.msra.gmra.mxu2 %vm68_vm1, %v5086_v54 }
0x11c4   :  { %3941 = vmatmul.msk.f32.gmra.mxu1 %vm68_vm1, %v5119_v22 }
0x11c5   :  { %3945 = vmatmul.msk.f32.gmra.mxu2 %vm68_vm1, %v5119_v22 }
0x11cc   :  { %3942 = vmatmul.msk.f32.gmra.mxu1 %vm68_vm1, %v5129_v3 }
0x11cd   :  { %3946 = vmatmul.msk.f32.gmra.mxu2 %vm68_vm1, %v5129_v3 }
0x11d4   :  { %3943 = vmatmul.msk.f32.gmra.mxu1 %vm68_vm1, %v5138_v2 }
0x11d5   :  { %3947 = vmatmul.msk.f32.gmra.mxu2 %vm68_vm1, %v5138_v2 }
0x1219   :  { %v2459_v13 = vpop.f32.mrf.mxu1 }
0x121a   :  { %3932 = vmatmul.msk.f32.vlgmr.msrb.gmra.mxu3 %vm281_vm15, %v2459_v13 }
0x121b   :  { %2953 = vmatpush.msrb.mxu3 %v2938_v52 }
0x121d   :  { %2954 = vmatpush.msrb.mxu3 %v2937_v17 }
0x121f   :  { %2955 = vmatpush.msrb.mxu3 %v2936_v18 }
0x1221   :  { %2956 = vmatpush.msrb.mxu3 %v2935_v35 }
0x122f   :  { %v2488_v14 = vpop.f32.mrf.mxu2 }
0x1231   :  { %v2462_v29 = vpop.f32.mrf.mxu1 }
0x1232   :  { %3933 = vmatmul.msk.f32.gmra.mxu3 %vm281_vm15, %v2462_v29 }
0x1238   :  { %v2491_v16 = vpop.f32.mrf.mxu2 }
0x1239   :  { %v2600_v4 = vpop.f32.mrf.mxu1 }
0x123a   :  { %3934 = vmatmul.msk.f32.gmra.mxu3 %vm281_vm15, %v2488_v14  ;;  %v2601_v37 = vadd.f32 %v4037_v21, %v2600_v4 }
0x1240   :  { %v2635_v30 = vpop.f32.mrf.mxu2 }
0x1241   :  { %v2636_v5 = vadd.f32 %v4038_v15, %v2635_v30  ;;  %v2603_v38 = vpop.f32.mrf.mxu1 }
0x1242   :  { %3935 = vmatmul.msk.f32.gmra.mxu3 %vm281_vm15, %v2491_v16  ;;  %v2604_v39 = vadd.f32 %v4037_v21, %v2603_v38 }
0x1248   :  { %v2638_v33 = vpop.f32.mrf.mxu2 }
0x1249   :  { %v2639_v20 = vadd.f32 %v4038_v15, %v2638_v33  ;;  %v2606_v41 = vpop.f32.mrf.mxu1 }
0x124a   :  { %3948 = vmatmul.msk.f32.vlgmr.msra.gmra.mxu3 %vm68_vm1, %v5086_v54  ;;  %v2607_v56 = vadd.f32 %v4037_v21, %v2606_v41 }
0x124b   :  { %3952 = vmatpush.xpose.msk.msrb.mxu0 %vm281_vm15, %v2639_v20 }
0x124f   :  { %3953 = vmatpush.xpose.msk.msrb.mxu0 %vm281_vm15, %v2636_v5 }
0x1250   :  { %v2641_v46 = vpop.f32.mrf.mxu2 }
0x1251   :  { %v2642_v43 = vadd.f32 %v4038_v15, %v2641_v46  ;;  %v2609_v42 = vpop.f32.mrf.mxu1 }
0x1252   :  { %3954 = vmatmul.msk.f32.vlgmr.msrb.gmra.mxu0 %vm281_vm15, %v2601_v37  ;;  %3949 = vmatmul.msk.f32.gmra.mxu3 %vm68_vm1, %v5119_v22  ;;  %v2610_v49 = vadd.f32 %v4037_v21, %v2609_v42  ;;  %v2902_v42 = vld [vmem:[%s5721_s1 + $0x458] sm:$0xff] }
0x1258   :  { %v2644_v24 = vpop.f32.mrf.mxu2 }
0x1259   :  { %v2645_v11 = vadd.f32 %v4038_v15, %v2644_v24 }
0x125a   :  { %3955 = vmatmul.msk.f32.gmra.mxu0 %vm281_vm15, %v2604_v39  ;;  %3950 = vmatmul.msk.f32.gmra.mxu3 %vm68_vm1, %v5129_v3 }
0x125b   :  { %3956 = vmatpush.xpose.msk.msrb.mxu1 %vm281_vm15, %v2645_v11 }
0x125f   :  { %3957 = vmatpush.xpose.msk.msrb.mxu1 %vm281_vm15, %v2642_v43 }
0x1262   :  { %3958 = vmatmul.msk.f32.vlgmr.msrb.gmra.mxu1 %vm281_vm15, %v2607_v56  ;;  %3951 = vmatmul.msk.f32.gmra.mxu3 %vm68_vm1, %v5138_v2  ;;  %v2903_v56 = vld [vmem:[%s5721_s1 + $0x460] sm:$0xff] }
0x1263   :  { %2882 = vmatpush.msra.mxu1 %v2854_v28 }
0x126a   :  { %3959 = vmatmul.msk.f32.gmra.mxu1 %vm281_vm15, %v2610_v49  ;;  %3972 = vmatmul.msk.f32.vlgmr.msrb.gmra.mxu3 %vm68_vm1, %v5086_v54  ;;  %v2901_v49 = vld [vmem:[%s5721_s1 + $0x450] sm:$0xff] }
0x1272   :  { %3973 = vmatmul.msk.f32.gmra.mxu3 %vm68_vm1, %v5119_v22 }
0x127a   :  { %3974 = vmatmul.msk.f32.gmra.mxu3 %vm68_vm1, %v5129_v3 }
0x1282   :  { %3975 = vmatmul.msk.f32.gmra.mxu3 %vm68_vm1, %v5138_v2 }
0x129d   :  { %v5350_v45 = vpop.f32.mrf.mxu3 }
0x12b5   :  { %v5354_v23 = vpop.f32.mrf.mxu3 }
0x12bd   :  { %v5358_v36 = vpop.f32.mrf.mxu3 }
0x12c5   :  { %v2533_v55 = vpop.f32.mrf.mxu3 }
0x12c6   :  { %v5360_v50 = vadd.f32 %v2574_v51, %v2533_v55  ;;  %v2900_v51 = vld [vmem:[%s5721_s1 + $0x448] sm:$0xff] }
0x12cd   :  { %v2670_v57 = vpop.f32.mrf.mxu3 }
0x12ce   :  { %v2671_v58 = vadd.f32 %v4039_v10, %v2670_v57 }
0x12cf   :  { %v2711_v60 = vpop.f32.mrf.mxu0 }
0x12d0   :  { %v2752_v61 = vsel %vm352_vm0, %v2711_v60, -inf }
0x12d1   :  { %2753 = vmax.xlane.f32.xlu0 %v2752_v61  ;;  %v2972_v61 = vld [vmem:[%s5721_s1 + $0x498] sm:$0xff] }
0x12d5   :  { %v2673_v40 = vpop.f32.mrf.mxu3 }
0x12d6   :  { %v2674_v63 = vadd.f32 %v4039_v10, %v2673_v40 }
0x12d7   :  { %v2714_v47 = vpop.f32.mrf.mxu0 }
0x12d8   :  { %v2755_v1 = vsel %vm352_vm0, %v2714_v47, -inf  ;;  %2816 = vmatpush.msrb.mxu2 %v2674_v63  ;;  %v2970_v63 = vld [vmem:[%s5721_s1 + $0x488] sm:$0xff] }
0x12d9   :  { %2756 = vmax.xlane.f32.xlu1 %v2755_v1 }
0x12da   :  { %2817 = vmatpush.msrb.mxu2 %v2671_v58 }
0x12dc   :  { %2918 = vmatpush.msra.mxu2 %v2903_v56  ;;  %v2572_v56 = vadd.f32 %v5356_v53, %v5358_v36 }
0x12dd   :  { %v2676_v31 = vpop.f32.mrf.mxu3 }
0x12de   :  { %v2677_v13 = vadd.f32 %v4039_v10, %v2676_v31  ;;  %2919 = vmatpush.msra.mxu2 %v2902_v42 }
0x12df   :  { %v2746_v7 = vpop.f32.mrf.mxu1 }
0x12e0   :  { %v2758_v8 = vsel %vm352_vm0, %v2746_v7, -inf  ;;  %2920 = vmatpush.msra.mxu2 %v2901_v49 }
0x12e1   :  { %2759 = vmax.xlane.f32.xlu2 %v2758_v8 }
0x12e2   :  { %2921 = vmatpush.msra.mxu2 %v2900_v51 }
0x12e5   :  { %v2679_v34 = vpop.f32.mrf.mxu3 }
0x12e6   :  { %v2680_v44 = vadd.f32 %v4039_v10, %v2679_v34  ;;  %v2971_v10 = vld [vmem:[%s5721_s1 + $0x490] sm:$0xff] }
0x12e7   :  { %v2749_v25 = vpop.f32.mrf.mxu1 }
0x12e8   :  { %v2761_v26 = vsel %vm352_vm0, %v2749_v25, -inf  ;;  %2845 = vmatpush.msra.mxu0 %v2680_v44 }
0x12e9   :  { %2762 = vmax.xlane.f32.xlu0 %v2761_v26 }
0x12ea   :  { %2846 = vmatpush.msra.mxu0 %v2677_v13 }
0x12ed   :  { %v2958_v27 = vpop.f32.mrf.mxu3 }
0x12ee   :  { %v2959_v29 = vadd.f32 %v4040_v9, %v2958_v27 }
0x12f5   :  { %v2961_v12 = vpop.f32.mrf.mxu3 }
0x12f6   :  { %v2962_v14 = vadd.f32 %v4040_v9, %v2961_v12 }
0x12f8   :  { %3980 = vmatpush.xpose.msk.msrb.mxu1 %vm281_vm15, %v2962_v14 }
0x12fc   :  { %3981 = vmatpush.xpose.msk.msrb.mxu1 %vm281_vm15, %v2959_v29 }
0x12fd   :  { %v2964_v55 = vpop.f32.mrf.mxu3 }
0x12fe   :  { %v2965_v31 = vadd.f32 %v4040_v9, %v2964_v55 }
0x1305   :  { %v2967_v40 = vpop.f32.mrf.mxu3 }
0x1306   :  { %v2968_v1 = vadd.f32 %v4040_v9, %v2967_v40 }
0x1344   :  { %v2754_v16 = vpop.xlane.xlu0 %2753 }
0x1345   :  { %v2764_v30 = vsub.f32 %v2711_v60, %v2754_v16  ;;  %v2973_v60 = vld [vmem:[%s5721_s1 + $0x4a0] sm:$0xff] }
0x1346   :  { %2988 = vmatpush.msrb.mxu0 %v2973_v60 }
0x1347   :  { %v2768_v52 = vmul.f32 1.442695, %v2764_v30 }
0x1348   :  { %2989 = vmatpush.msrb.mxu0 %v2972_v61 }
0x1349   :  { %4177 = vpow2.f32 %v2768_v52  ;;  %v4042_v52 = vld [vmem:[%s5721_s1 + $0x4b8] ss:$0 sm:$0xff] }
0x134a   :  { %2990 = vmatpush.msrb.mxu0 %v2971_v10 }
0x134c   :  { %v2757_v17 = vpop.xlane.xlu1 %2756  ;;  %2991 = vmatpush.msrb.mxu0 %v2970_v63 }
0x134d   :  { %v2765_v18 = vsub.f32 %v2714_v47, %v2757_v17 }
0x134f   :  { %v4178_v4 = vpop.eup %4177  ;;  %v2770_v15 = vmul.f32 1.442695, %v2765_v18 }
0x1350   :  { %v2776_v33 = vsel %vm352_vm0, %v4178_v4, 0.0 }
0x1351   :  { %4179 = vpow2.f32 %v2770_v15  ;;  %2777 = vadd.xlane.f32.xlu1 %v2776_v33 }
0x1354   :  { %v2760_v20 = vpop.xlane.xlu2 %2759 }
0x1355   :  { %v2766_v35 = vsub.f32 %v2746_v7, %v2760_v20 }
0x1357   :  { %v4180_v21 = vpop.eup %4179  ;;  %v2772_v5 = vmul.f32 1.442695, %v2766_v35 }
0x1358   :  { %v2779_v37 = vsel %vm352_vm0, %v4180_v21, 0.0 }
0x1359   :  { %4181 = vpow2.f32 %v2772_v5  ;;  %2780 = vadd.xlane.f32.xlu2 %v2779_v37 }
0x135c   :  { %v2763_v46 = vpop.xlane.xlu0 %2762 }
0x135d   :  { %v2767_v38 = vsub.f32 %v2749_v25, %v2763_v46 }
0x135f   :  { %v4182_v39 = vpop.eup %4181  ;;  %v2774_v24 = vmul.f32 1.442695, %v2767_v38  ;;  %v2566_v38 = vadd.f32 %v5348_v6, %v5350_v45 }
0x1360   :  { %v2782_v11 = vsel %vm352_vm0, %v4182_v39, 0.0 }
0x1361   :  { %4183 = vpow2.f32 %v2774_v24  ;;  %2783 = vadd.xlane.f32.xlu0 %v2782_v11  ;;  %v2569_v11 = vadd.f32 %v5352_v59, %v5354_v23 }
0x1367   :  { %v4184_v41 = vpop.eup %4183 }
0x1368   :  { %v2785_v43 = vsel %vm352_vm0, %v4184_v41, 0.0 }
0x1369   :  { %2786 = vadd.xlane.f32.xlu1 %v2785_v43 }
0x13c4   :  { %v2778_v57 = vpop.xlane.xlu1 %2777 }
0x13c5   :  { %4185 = vrcp.f32 %v2778_v57 }
0x13cb   :  { %v4186_v28 = vpop.eup %4185 }
0x13cc   :  { %v2792_v47 = vmul.f32 %v4186_v28, %v4178_v4  ;;  %v2781_v58 = vpop.xlane.xlu2 %2780 }
0x13cd   :  { %4187 = vrcp.f32 %v2781_v58 }
0x13ce   :  { %3960 = vmatmul.msk.f32.vlgmr.msrb.gmra.mxu2 %vm352_vm0, %v2792_v47 }
0x13cf   :  { %3984 = vmatpush.xpose.msk.msrb.mxu2 %vm281_vm15, %v2968_v1 }
0x13d3   :  { %v4188_v7 = vpop.eup %4187  ;;  %3985 = vmatpush.xpose.msk.msrb.mxu2 %vm281_vm15, %v2965_v31 }
0x13d4   :  { %v2784_v8 = vpop.xlane.xlu0 %2783  ;;  %v2793_v34 = vmul.f32 %v4188_v7, %v4180_v21 }
0x13d5   :  { %4189 = vrcp.f32 %v2784_v8 }
0x13d6   :  { %3961 = vmatmul.msk.f32.gmra.mxu2 %vm352_vm0, %v2793_v34 }
0x13db   :  { %v4190_v44 = vpop.eup %4189 }
0x13dc   :  { %v2794_v25 = vmul.f32 %v4190_v44, %v4182_v39  ;;  %v2787_v13 = vpop.xlane.xlu1 %2786 }
0x13dd   :  { %4191 = vrcp.f32 %v2787_v13 }
0x13de   :  { %3962 = vmatmul.msk.f32.vlgmr.msra.gmra.mxu0 %vm352_vm0, %v2794_v25  ;;  %3968 = vmatmul.msk.f32.vlgmr.msra.gmra.mxu2 %vm68_vm1, %v5086_v54 }
0x13e3   :  { %v4192_v26 = vpop.eup %4191 }
0x13e4   :  { %v2795_v27 = vmul.f32 %v4192_v26, %v4184_v41 }
0x13e6   :  { %3963 = vmatmul.msk.f32.gmra.mxu0 %vm352_vm0, %v2795_v27  ;;  %3969 = vmatmul.msk.f32.gmra.mxu2 %vm68_vm1, %v5119_v22 }
0x13ee   :  { %3970 = vmatmul.msk.f32.gmra.mxu2 %vm68_vm1, %v5129_v3  ;;  %3976 = vmatmul.msk.f32.vlgmr.msrb.gmra.mxu0 %vm68_vm1, %v5086_v54 }
0x13f6   :  { %3971 = vmatmul.msk.f32.gmra.mxu2 %vm68_vm1, %v5138_v2  ;;  %3977 = vmatmul.msk.f32.gmra.mxu0 %vm68_vm1, %v5119_v22 }
0x13fe   :  { %3978 = vmatmul.msk.f32.gmra.mxu0 %vm68_vm1, %v5129_v3  ;;  %v4041_v3 = vld [vmem:[%s5721_s1 + $0x4a8] ss:$0 sm:$0xff] }
0x1406   :  { %3979 = vmatmul.msk.f32.gmra.mxu0 %vm68_vm1, %v5138_v2 }
0x1451   :  { %v2819_v9 = vpop.f32.mrf.mxu2 }
0x1452   :  { %3964 = vmatmul.msk.f32.vlgmr.msra.gmra.mxu1 %vm281_vm15, %v2819_v9 }
0x1459   :  { %v2822_v12 = vpop.f32.mrf.mxu2 }
0x145a   :  { %3965 = vmatmul.msk.f32.gmra.mxu1 %vm281_vm15, %v2822_v12 }
0x145b   :  { %v2848_v14 = vpop.f32.mrf.mxu0 }
0x1461   :  { %v2923_v54 = vpop.f32.mrf.mxu2 }
0x1462   :  { %3966 = vmatmul.msk.f32.gmra.mxu1 %vm281_vm15, %v2848_v14  ;;  %v2924_v2 = vadd.f32 %v4041_v3, %v2923_v54 }
0x1463   :  { %v2851_v29 = vpop.f32.mrf.mxu0 }
0x1469   :  { %v2926_v16 = vpop.f32.mrf.mxu2 }
0x146a   :  { %3967 = vmatmul.msk.f32.gmra.mxu1 %vm281_vm15, %v2851_v29  ;;  %v2927_v33 = vadd.f32 %v4041_v3, %v2926_v16 }
0x146b   :  { %v2993_v22 = vpop.f32.mrf.mxu0 }
0x146c   :  { %v2994_v15 = vadd.f32 %v4042_v52, %v2993_v22 }
0x1471   :  { %v2929_v30 = vpop.f32.mrf.mxu2 }
0x1472   :  { %v2930_v17 = vadd.f32 %v4041_v3, %v2929_v30  ;;  %3982 = vmatmul.msk.f32.vlgmr.msrb.gmra.mxu1 %vm281_vm15, %v2924_v2 }
0x1473   :  { %v2996_v18 = vpop.f32.mrf.mxu0 }
0x1474   :  { %v2997_v4 = vadd.f32 %v4042_v52, %v2996_v18  ;;  %3986 = vmatmul.msk.f32.vlgmr.msrb.gmra.mxu2 %vm281_vm15, %v2930_v17 }
0x1476   :  { %3139 = vmatpush.msra.mxu3 %v2997_v4 }
0x1478   :  { %3140 = vmatpush.msra.mxu3 %v2994_v15  ;;  %v3177_v15 = vld [vmem:[%s5721_s1 + $0x4c0] sm:$0xff] }
0x1479   :  { %v2932_v20 = vpop.f32.mrf.mxu2  ;;  %3205 = vmatpush.msra.mxu1 %v3177_v15 }
0x147a   :  { %v2933_v35 = vadd.f32 %v4041_v3, %v2932_v20  ;;  %3983 = vmatmul.msk.f32.gmra.mxu1 %vm281_vm15, %v2927_v33 }
0x147b   :  { %v2999_v21 = vpop.f32.mrf.mxu0 }
0x147c   :  { %3987 = vmatmul.msk.f32.gmra.mxu2 %vm281_vm15, %v2933_v35  ;;  %v3000_v46 = vadd.f32 %v4042_v52, %v2999_v21 }
0x1483   :  { %v3002_v5 = vpop.f32.mrf.mxu0 }
0x1484   :  { %v3003_v37 = vadd.f32 %v4042_v52, %v3002_v5 }
0x1486   :  { %3168 = vmatpush.msra.mxu0 %v3003_v37 }
0x1488   :  { %3169 = vmatpush.msra.mxu0 %v3000_v46  ;;  %v4043_v46 = vld [vmem:[%s5721_s1 + $0x4c8] ss:$0 sm:$0xff] }
0x14cf   :  { %v2884_v39 = vpop.f32.mrf.mxu1 }
0x14d0   :  { %v5443_v24 = vadd.f32 %v2884_v39, %v2566_v38 }
0x14d7   :  { %v2887_v41 = vpop.f32.mrf.mxu1 }
0x14d8   :  { %v5447_v43 = vadd.f32 %v2887_v41, %v2569_v11 }
0x14df   :  { %v2890_v42 = vpop.f32.mrf.mxu1 }
0x14e0   :  { %v5451_v49 = vadd.f32 %v2890_v42, %v2572_v56 }
0x14e7   :  { %v2893_v51 = vpop.f32.mrf.mxu1 }
0x14e8   :  { %v5454_v55 = vadd.f32 %v2893_v51, %v5360_v50 }
0x14ef   :  { %v3034_v6 = vpop.f32.mrf.mxu1 }
0x14f0   :  { %v3075_v45 = vsel %vm352_vm0, %v3034_v6, -inf }
0x14f1   :  { %3076 = vmax.xlane.f32.xlu2 %v3075_v45 }
0x14f7   :  { %v3037_v57 = vpop.f32.mrf.mxu1  ;;  %v3069_v60 = vpop.f32.mrf.mxu2 }
0x14f8   :  { %v3081_v59 = vsel %vm352_vm0, %v3069_v60, -inf  ;;  %v3078_v23 = vsel %vm352_vm0, %v3037_v57, -inf }
0x14f9   :  { %3082 = vmax.xlane.f32.xlu1 %v3081_v59  ;;  %3079 = vmax.xlane.f32.xlu0 %v3078_v23 }
0x14ff   :  { %v3072_v53 = vpop.f32.mrf.mxu2 }
0x1500   :  { %v3084_v36 = vsel %vm352_vm0, %v3072_v53, -inf }
0x1501   :  { %3085 = vmax.xlane.f32.xlu2 %v3084_v36 }
0x1564   :  { %v3077_v61 = vpop.xlane.xlu2 %3076 }
0x1565   :  { %v3087_v10 = vsub.f32 %v3034_v6, %v3077_v61 }
0x1567   :  { %v3091_v50 = vmul.f32 1.442695, %v3087_v10 }
0x1569   :  { %4193 = vpow2.f32 %v3091_v50 }
0x156c   :  { %v3083_v40 = vpop.xlane.xlu1 %3082  ;;  %v3080_v63 = vpop.xlane.xlu0 %3079 }
0x156d   :  { %v3089_v28 = vsub.f32 %v3069_v60, %v3083_v40  ;;  %v3088_v47 = vsub.f32 %v3037_v57, %v3080_v63 }
0x156f   :  { %v4194_v58 = vpop.eup %4193  ;;  %v3095_v1 = vmul.f32 1.442695, %v3089_v28  ;;  %v3093_v31 = vmul.f32 1.442695, %v3088_v47 }
0x1570   :  { %v3099_v7 = vsel %vm352_vm0, %v4194_v58, 0.0 }
0x1571   :  { %4195 = vpow2.f32 %v3095_v1  ;;  %3100 = vadd.xlane.f32.xlu0 %v3099_v7 }
0x1572   :  { %4197 = vpow2.f32 %v3093_v31 }
0x1574   :  { %v3086_v8 = vpop.xlane.xlu2 %3085 }
0x1575   :  { %v3090_v34 = vsub.f32 %v3072_v53, %v3086_v8 }
0x1577   :  { %v4196_v44 = vpop.eup %4195  ;;  %v3097_v25 = vmul.f32 1.442695, %v3090_v34 }
0x1578   :  { %v4198_v13 = vpop.eup %4197  ;;  %v3105_v26 = vsel %vm352_vm0, %v4196_v44, 0.0 }
0x1579   :  { %4199 = vpow2.f32 %v3097_v25  ;;  %3106 = vadd.xlane.f32.xlu2 %v3105_v26  ;;  %v3102_v27 = vsel %vm352_vm0, %v4198_v13, 0.0  ;;  %v3323_v26 = vld [vmem:[%s5721_s1 + $0x4e0] sm:$0xff] }
0x157a   :  { %3103 = vadd.xlane.f32.xlu1 %v3102_v27  ;;  %v3322_v27 = vld [vmem:[%s5721_s1 + $0x4d8] sm:$0xff] }
0x157f   :  { %v4200_v9 = vpop.eup %4199 }
0x1580   :  { %v3108_v12 = vsel %vm352_vm0, %v4200_v9, 0.0 }
0x1581   :  { %3109 = vadd.xlane.f32.xlu0 %v3108_v12 }
0x15e4   :  { %v3101_v14 = vpop.xlane.xlu0 %3100 }
0x15e5   :  { %4201 = vrcp.f32 %v3101_v14 }
0x15eb   :  { %v4202_v54 = vpop.eup %4201 }
0x15ec   :  { %v3115_v29 = vmul.f32 %v4202_v54, %v4194_v58  ;;  %v3107_v16 = vpop.xlane.xlu2 %3106 }
0x15ed   :  { %4203 = vrcp.f32 %v3107_v16  ;;  %v3104_v22 = vpop.xlane.xlu1 %3103 }
0x15ee   :  { %4205 = vrcp.f32 %v3104_v22  ;;  %3988 = vmatmul.msk.f32.vlgmr.msra.gmra.mxu3 %vm352_vm0, %v3115_v29 }
0x15f3   :  { %v4204_v3 = vpop.eup %4203 }
0x15f4   :  { %v4206_v2 = vpop.eup %4205  ;;  %v3117_v30 = vmul.f32 %v4204_v3, %v4196_v44  ;;  %v3110_v52 = vpop.xlane.xlu0 %3109 }
0x15f5   :  { %4207 = vrcp.f32 %v3110_v52  ;;  %v3116_v17 = vmul.f32 %v4206_v2, %v4198_v13  ;;  %v3324_v13 = vld [vmem:[%s5721_s1 + $0x4e8] sm:$0xff] }
0x15f6   :  { %3990 = vmatmul.msk.f32.vlgmr.msra.gmra.mxu0 %vm352_vm0, %v3117_v30  ;;  %3351 = vmatpush.msra.mxu2 %v3324_v13 }
0x15f7   :  { %3989 = vmatmul.msk.f32.gmra.mxu3 %vm352_vm0, %v3116_v17 }
0x15f8   :  { %3352 = vmatpush.msra.mxu2 %v3323_v26 }
0x15fa   :  { %3353 = vmatpush.msra.mxu2 %v3322_v27 }
0x15fb   :  { %v4208_v18 = vpop.eup %4207 }
0x15fc   :  { %v3118_v4 = vmul.f32 %v4208_v18, %v4200_v9  ;;  %v3321_v9 = vld [vmem:[%s5721_s1 + $0x4d0] sm:$0xff] }
0x15fd   :  { %3354 = vmatpush.msra.mxu2 %v3321_v9 }
0x15fe   :  { %3991 = vmatmul.msk.f32.gmra.mxu0 %vm352_vm0, %v3118_v4 }
0x1671   :  { %v3142_v33 = vpop.f32.mrf.mxu3 }
0x1672   :  { %3992 = vmatmul.msk.f32.vlgmr.msra.gmra.mxu1 %vm281_vm15, %v3142_v33 }
0x1673   :  { %v3171_v35 = vpop.f32.mrf.mxu0 }
0x167a   :  { %v3145_v20 = vpop.f32.mrf.mxu3 }
0x167b   :  { %3993 = vmatmul.msk.f32.gmra.mxu1 %vm281_vm15, %v3145_v20  ;;  %v3174_v21 = vpop.f32.mrf.mxu0 }
0x1683   :  { %3994 = vmatmul.msk.f32.gmra.mxu1 %vm281_vm15, %v3171_v35 }
0x168b   :  { %3995 = vmatmul.msk.f32.gmra.mxu1 %vm281_vm15, %v3174_v21 }
0x16ef   :  { %v3207_v5 = vpop.f32.mrf.mxu1 }
0x16f0   :  { %v3219_v37 = vadd.f32 %v3207_v5, %v5443_v24 }
0x16f2   :  { %v3223_v38 = vadd.f32 %v3219_v37, %v4999_v48 }
0x16f4   :  { %v5480_v39 = vadd.f32 %v4043_v46, %v3223_v38 }
0x16f6   :  { %v3233_v11 = vsel %vm68_vm1, %v5480_v39, 0.0 }
0x16f7   :  { %3234 = vadd.xlane.f32.xlu1 %v3233_v11 }
0x16f8   :  { %v3210_v41 = vpop.f32.mrf.mxu1 }
0x16f9   :  { %v3220_v56 = vadd.f32 %v3210_v41, %v5447_v43 }
0x16fb   :  { %v3224_v42 = vadd.f32 %v3220_v56, %v5004_v19 }
0x16fd   :  { %v5486_v51 = vadd.f32 %v4043_v46, %v3224_v42 }
0x16ff   :  { %v3236_v24 = vsel %vm68_vm1, %v5486_v51, 0.0 }
0x1700   :  { %3237 = vadd.xlane.f32.xlu2 %v3236_v24  ;;  %v3213_v6 = vpop.f32.mrf.mxu1 }
0x1701   :  { %v3221_v48 = vadd.f32 %v3213_v6, %v5451_v49 }
0x1703   :  { %v3225_v45 = vadd.f32 %v3221_v48, %v5009_v62 }
0x1705   :  { %v5492_v57 = vadd.f32 %v4043_v46, %v3225_v45 }
0x1707   :  { %v3239_v60 = vsel %vm68_vm1, %v5492_v57, 0.0 }
0x1708   :  { %3240 = vadd.xlane.f32.xlu0 %v3239_v60  ;;  %v3216_v43 = vpop.f32.mrf.mxu1 }
0x1709   :  { %v3222_v19 = vadd.f32 %v3216_v43, %v5454_v55 }
0x170b   :  { %v3226_v59 = vadd.f32 %v3222_v19, %v5014_v0 }
0x170d   :  { %v5498_v23 = vadd.f32 %v4043_v46, %v3226_v59 }
0x170f   :  { %v3242_v53 = vsel %vm68_vm1, %v5498_v23, 0.0 }
0x1710   :  { %3243 = vadd.xlane.f32.xlu1 %v3242_v53 }
0x176a   :  { %v3235_v49 = vpop.xlane.xlu1 %3234 }
0x176b   :  { %v3245_v62 = vmul.f32 %v3235_v49, %v4336_v32 }
0x176d   :  { %v3249_v36 = vsub.f32 %v5480_v39, %v3245_v62 }
0x176f   :  { %v3253_v61 = vmul.f32 %v3249_v36, %v3249_v36 }
0x1771   :  { %v3257_v10 = vsel %vm68_vm1, %v3253_v61, 0.0 }
0x1772   :  { %3258 = vadd.xlane.f32.xlu2 %v3257_v10 }
0x1773   :  { %v3238_v50 = vpop.xlane.xlu2 %3237 }
0x1774   :  { %v3246_v55 = vmul.f32 %v3238_v50, %v4336_v32 }
0x1776   :  { %v5507_v0 = vsub.f32 %v5486_v51, %v3246_v55 }
0x1778   :  { %v3254_v40 = vmul.f32 %v5507_v0, %v5507_v0 }
0x177a   :  { %v3260_v63 = vsel %vm68_vm1, %v3254_v40, 0.0 }
0x177b   :  { %3261 = vadd.xlane.f32.xlu0 %v3260_v63  ;;  %v3241_v28 = vpop.xlane.xlu0 %3240  ;;  %v4044_v63 = vld [vmem:[%s5721_s1 + $0x4f0] ss:$0 sm:$0xff] }
0x177c   :  { %v3247_v47 = vmul.f32 %v3241_v28, %v4336_v32 }
0x177e   :  { %v5514_v58 = vsub.f32 %v5492_v57, %v3247_v47 }
0x1780   :  { %v3255_v1 = vmul.f32 %v5514_v58, %v5514_v58 }
0x1782   :  { %v3263_v31 = vsel %vm68_vm1, %v3255_v1, 0.0 }
0x1783   :  { %3264 = vadd.xlane.f32.xlu1 %v3263_v31  ;;  %v3244_v7 = vpop.xlane.xlu1 %3243 }
0x1784   :  { %v3248_v8 = vmul.f32 %v3244_v7, %v4336_v32 }
0x1786   :  { %v5521_v34 = vsub.f32 %v5498_v23, %v3248_v8 }
0x1788   :  { %v3256_v44 = vmul.f32 %v5521_v34, %v5521_v34 }
0x178a   :  { %v3266_v25 = vsel %vm68_vm1, %v3256_v44, 0.0 }
0x178b   :  { %3267 = vadd.xlane.f32.xlu2 %v3266_v25 }
0x17e5   :  { %v3259_v12 = vpop.xlane.xlu2 %3258 }
0x17e6   :  { %v3269_v14 = vmul.f32 %v3259_v12, %v4336_v32  ;;  %v3551_v12 = vld [vmem:[%s5721_s1 + $0x530] sm:$0xff] }
0x17e7   :  { %3574 = vmatpush.msrb.mxu3 %v3551_v12 }
0x17e8   :  { %v3273_v54 = vadd.f32 1e-05, %v3269_v14 }
0x17ea   :  { %4209 = vrsqrt.f32 %v3273_v54  ;;  %vm3283_vm0 = vweird.f32 %v3273_v54 }
0x17ee   :  { %v3262_v29 = vpop.xlane.xlu0 %3261 }
0x17ef   :  { %v3270_v16 = vmul.f32 %v3262_v29, %v4336_v32 }
0x17f0   :  { %v4210_v22 = vpop.eup %4209 }
0x17f1   :  { %v3278_v3 = vmul.f32 %v4210_v22, %v3273_v54  ;;  %v3274_v2 = vadd.f32 1e-05, %v3270_v16  ;;  %vm3284_vm15 = vweird.f32 %v4210_v22  ;;  %v3550_v16 = vld [vmem:[%s5721_s1 + $0x528] sm:$0xff] }
0x17f2   :  { %vm3285_vm5 = vmor %vm3283_vm0, %vm3284_vm15  ;;  %3575 = vmatpush.msrb.mxu3 %v3550_v16 }
0x17f3   :  { %v3279_v30 = vmul.f32 %v4210_v22, %v3278_v3  ;;  %4211 = vrsqrt.f32 %v3274_v2  ;;  %vm3293_vm8 = vweird.f32 %v3274_v2 }
0x17f5   :  { %v3280_v52 = vmul.f32 0.5, %v3279_v30  ;;  %v3549_v30 = vld [vmem:[%s5721_s1 + $0x520] sm:$0xff] }
0x17f6   :  { %v3265_v17 = vpop.xlane.xlu1 %3264  ;;  %3576 = vmatpush.msrb.mxu3 %v3549_v30 }
0x17f7   :  { %v3281_v18 = vsub.f32 1.5, %v3280_v52  ;;  %v3271_v4 = vmul.f32 %v3265_v17, %v4336_v32 }
0x17f9   :  { %v4212_v15 = vpop.eup %4211  ;;  %v3282_v33 = vmul.f32 %v4210_v22, %v3281_v18  ;;  %v3275_v20 = vadd.f32 1e-05, %v3271_v4 }
0x17fa   :  { %v3288_v35 = vmul.f32 %v4212_v15, %v3274_v2  ;;  %vm3294_vm6 = vweird.f32 %v4212_v15 }
0x17fb   :  { %v3286_v21 = vsel %vm3285_vm5, %v4210_v22, %v3282_v33  ;;  %4213 = vrsqrt.f32 %v3275_v20  ;;  %vm3295_vm9 = vmor %vm3293_vm8, %vm3294_vm6  ;;  %vm3303_vm11 = vweird.f32 %v3275_v20  ;;  %v3548_v33 = vld [vmem:[%s5721_s1 + $0x518] sm:$0xff] }
0x17fc   :  { %v3317_v5 = vmul.f32 %v3286_v21, %v3249_v36  ;;  %v3289_v37 = vmul.f32 %v4212_v15, %v3288_v35  ;;  %3577 = vmatpush.msrb.mxu3 %v3548_v33 }
0x17fe   :  { %v3290_v46 = vmul.f32 0.5, %v3289_v37  ;;  %v3268_v38 = vpop.xlane.xlu2 %3267  ;;  %3996 = vmatmul.msk.f32.vlgmr.msra.gmra.mxu2 %vm68_vm1, %v3317_v5  ;;  %v3547_v37 = vld [vmem:[%s5721_s1 + $0x510] sm:$0xff] }
0x17ff   :  { %v3272_v11 = vmul.f32 %v3268_v38, %v4336_v32  ;;  %3578 = vmatpush.msrb.mxu3 %v3547_v37 }
0x1800   :  { %v3291_v41 = vsub.f32 1.5, %v3290_v46 }
0x1801   :  { %v4214_v56 = vpop.eup %4213  ;;  %v3276_v42 = vadd.f32 1e-05, %v3272_v11 }
0x1802   :  { %v3292_v24 = vmul.f32 %v4212_v15, %v3291_v41  ;;  %v3298_v6 = vmul.f32 %v4214_v56, %v3275_v20  ;;  %vm3304_vm10 = vweird.f32 %v4214_v56 }
0x1803   :  { %4215 = vrsqrt.f32 %v3276_v42  ;;  %vm3305_vm12 = vmor %vm3303_vm11, %vm3304_vm10  ;;  %vm3313_vm14 = vweird.f32 %v3276_v42 }
0x1804   :  { %v3299_v48 = vmul.f32 %v4214_v56, %v3298_v6  ;;  %v3296_v45 = vsel %vm3295_vm9, %v4212_v15, %v3292_v24 }
0x1805   :  { %v3318_v60 = vmul.f32 %v3296_v45, %v5507_v0 }
0x1806   :  { %v3300_v43 = vmul.f32 0.5, %v3299_v48 }
0x1807   :  { %3997 = vmatmul.msk.f32.gmra.mxu2 %vm68_vm1, %v3318_v60 }
0x1808   :  { %v3301_v19 = vsub.f32 1.5, %v3300_v43  ;;  %v3545_v43 = vld [vmem:[%s5721_s1 + $0x500] sm:$0xff] }
0x1809   :  { %v4216_v59 = vpop.eup %4215 }
0x180a   :  { %v3302_v53 = vmul.f32 %v4214_v56, %v3301_v19  ;;  %v3308_v49 = vmul.f32 %v4216_v59, %v3276_v42  ;;  %vm3314_vm13 = vweird.f32 %v4216_v59  ;;  %v3546_v42 = vld [vmem:[%s5721_s1 + $0x508] sm:$0xff] }
0x180b   :  { %vm3315_vm2 = vmor %vm3313_vm14, %vm3314_vm13  ;;  %3579 = vmatpush.msrb.mxu3 %v3546_v42 }
0x180c   :  { %v3309_v62 = vmul.f32 %v4216_v59, %v3308_v49  ;;  %v3306_v36 = vsel %vm3305_vm12, %v4214_v56, %v3302_v53 }
0x180d   :  { %v3319_v61 = vmul.f32 %v3306_v36, %v5514_v58  ;;  %3580 = vmatpush.msrb.mxu3 %v3545_v43  ;;  %v3544_v36 = vld [vmem:[%s5721_s1 + $0x4f8] sm:$0xff] }
0x180e   :  { %v3310_v10 = vmul.f32 0.5, %v3309_v62 }
0x180f   :  { %3998 = vmatmul.msk.f32.gmra.mxu2 %vm68_vm1, %v3319_v61  ;;  %3581 = vmatpush.msrb.mxu3 %v3544_v36 }
0x1810   :  { %v3311_v50 = vsub.f32 1.5, %v3310_v10 }
0x1812   :  { %v3312_v55 = vmul.f32 %v4216_v59, %v3311_v50 }
0x1814   :  { %v3316_v0 = vsel %vm3315_vm2, %v4216_v59, %v3312_v55 }
0x1815   :  { %v3320_v40 = vmul.f32 %v3316_v0, %v5521_v34 }
0x1817   :  { %3999 = vmatmul.msk.f32.gmra.mxu2 %vm68_vm1, %v3320_v40 }
0x1881   :  { %v3356_v28 = vpop.f32.mrf.mxu2 }
0x1882   :  { %v5552_v47 = vadd.f32 %v4044_v63, %v3356_v28 }
0x1884   :  { %v5555_v58 = vmul.f32 0.70710677, %v5552_v47 }
0x1886   :  { %v3376_v1 = vmul.f32 %v5555_v58, %v5555_v58 }
0x1888   :  { %v5559_v31 = vmin.f32 %v3376_v1, 16.0 }
0x188a   :  { %v3378_v7 = vmul.f32 2.1237322e-06, %v5559_v31  ;;  %v3389_v8 = vmul.f32 3.8918573e-05, %v5559_v31  ;;  %v3359_v34 = vpop.f32.mrf.mxu2 }
0x188b   :  { %v5563_v44 = vadd.f32 %v4044_v63, %v3359_v34 }
0x188c   :  { %v3379_v25 = vadd.f32 0.00028619796, %v3378_v7  ;;  %v3390_v13 = vadd.f32 0.001143296, %v3389_v8 }
0x188d   :  { %v5566_v26 = vmul.f32 0.70710677, %v5563_v44 }
0x188e   :  { %v3380_v27 = vmul.f32 %v3379_v25, %v5559_v31  ;;  %v3391_v9 = vmul.f32 %v3390_v13, %v5559_v31 }
0x188f   :  { %v3416_v14 = vmul.f32 %v5566_v26, %v5566_v26 }
0x1890   :  { %v3381_v54 = vadd.f32 0.0036580483, %v3380_v27  ;;  %v3392_v29 = vadd.f32 0.014752088, %v3391_v9 }
0x1891   :  { %v5578_v22 = vmin.f32 %v3416_v14, 16.0 }
0x1892   :  { %v3393_v3 = vmul.f32 %v3392_v29, %v5559_v31  ;;  %v3362_v2 = vpop.f32.mrf.mxu2  ;;  %v3382_v52 = vmul.f32 %v3381_v54, %v5559_v31 }
0x1893   :  { %v3418_v17 = vmul.f32 2.1237322e-06, %v5578_v22  ;;  %v3429_v18 = vmul.f32 3.8918573e-05, %v5578_v22  ;;  %v5587_v4 = vadd.f32 %v4044_v63, %v3362_v2 }
0x1894   :  { %v3394_v15 = vadd.f32 0.112945676, %v3393_v3  ;;  %v3383_v46 = vadd.f32 0.05243302, %v3382_v52 }
0x1895   :  { %v3419_v20 = vadd.f32 0.00028619796, %v3418_v17  ;;  %v3430_v35 = vadd.f32 0.001143296, %v3429_v18  ;;  %v5594_v5 = vmul.f32 0.70710677, %v5587_v4 }
0x1896   :  { %v3395_v21 = vmul.f32 %v3394_v15, %v5559_v31  ;;  %v3384_v19 = vmul.f32 %v3383_v46, %v5559_v31 }
0x1897   :  { %v3420_v38 = vmul.f32 %v3419_v20, %v5578_v22  ;;  %v3431_v11 = vmul.f32 %v3430_v35, %v5578_v22  ;;  %v3456_v56 = vmul.f32 %v5594_v5, %v5594_v5 }
0x1898   :  { %v3396_v41 = vadd.f32 0.4994258, %v3395_v21  ;;  %v3385_v55 = vadd.f32 0.18741608, %v3384_v19 }
0x1899   :  { %v3432_v24 = vadd.f32 0.014752088, %v3431_v11  ;;  %v3421_v48 = vadd.f32 0.0036580483, %v3420_v38  ;;  %v5607_v45 = vmin.f32 %v3456_v56, 16.0 }
0x189a   :  { %v3397_v6 = vmul.f32 %v3396_v41, %v5559_v31  ;;  %v3365_v60 = vpop.f32.mrf.mxu2  ;;  %v3386_v13 = vmul.f32 %v3385_v55, %v5559_v31 }
0x189b   :  { %v3433_v59 = vmul.f32 %v3432_v24, %v5578_v22  ;;  %v3458_v49 = vmul.f32 2.1237322e-06, %v5607_v45  ;;  %v5615_v62 = vadd.f32 %v4044_v63, %v3365_v60  ;;  %v3469_v10 = vmul.f32 3.8918573e-05, %v5607_v45 }
0x189c   :  { %v3398_v53 = vadd.f32 1.0, %v3397_v6  ;;  %v3422_v50 = vmul.f32 %v3421_v48, %v5578_v22  ;;  %v3387_v17 = vadd.f32 1.1283791, %v3386_v13 }
0x189d   :  { %v3434_v61 = vadd.f32 0.112945676, %v3433_v59  ;;  %v3459_v40 = vadd.f32 0.00028619796, %v3458_v49  ;;  %v3470_v28 = vadd.f32 0.001143296, %v3469_v10 }
0x189e   :  { %4217 = vrcp.f32 %v3398_v53  ;;  %v5624_v1 = vmul.f32 0.70710677, %v5615_v62  ;;  %v3423_v8 = vadd.f32 0.05243302, %v3422_v50  ;;  %v3408_v31 = vand.u32 2147483647, %v3398_v53 }
0x189f   :  { %v3435_v0 = vmul.f32 %v3434_v61, %v5578_v22  ;;  %v3460_v7 = vmul.f32 %v3459_v40, %v5607_v45  ;;  %v3471_v34 = vmul.f32 %v3470_v28, %v5607_v45  ;;  %v3410_v15 = vand.u32 2147483648, %v3398_v53 }
0x18a0   :  { %v3496_v25 = vmul.f32 %v5624_v1, %v5624_v1  ;;  %v3424_v3 = vmul.f32 %v3423_v8, %v5578_v22  ;;  %vm3404_vm4 = vweird.f32 %v3398_v53  ;;  %v3388_v42 = vmul.f32 %v3387_v17, %v5555_v58 }
0x18a1   :  { %v3436_v63 = vadd.f32 0.4994258, %v3435_v0  ;;  %v3461_v12 = vadd.f32 0.0036580483, %v3460_v7  ;;  %v3472_v14 = vadd.f32 0.014752088, %v3471_v34 }
0x18a2   :  { %v5632_v54 = vmin.f32 %v3496_v25, 16.0  ;;  %v3425_v46 = vadd.f32 0.18741608, %v3424_v3  ;;  %vm3409_vm0 = vcmp.eq.f32.partialorder %v3408_v31, 8.507059e+37  ;;  %v3411_v24 = vor.u32 1.1754944e-38, %v3410_v15 }
0x18a3   :  { %v3437_v27 = vmul.f32 %v3436_v63, %v5578_v22  ;;  %v3473_v2 = vmul.f32 %v3472_v14, %v5607_v45  ;;  %v3462_v33 = vmul.f32 %v3461_v12, %v5607_v45 }
0x18a4   :  { %v4218_v9 = vpop.eup %4217  ;;  %v3498_v30 = vmul.f32 2.1237322e-06, %v5632_v54  ;;  %v3509_v52 = vmul.f32 3.8918573e-05, %v5632_v54 }
0x18a5   :  { %v3400_v29 = vmul.f32 %v4218_v9, %v3398_v53  ;;  %v3438_v16 = vadd.f32 1.0, %v3437_v27  ;;  %vm3405_vm3 = vweird.f32 %v4218_v9  ;;  %v3474_v35 = vadd.f32 0.112945676, %v3473_v2 }
0x18a6   :  { %v3499_v21 = vadd.f32 0.00028619796, %v3498_v30  ;;  %v3510_v37 = vadd.f32 0.001143296, %v3509_v52  ;;  %vm3406_vm15 = vmor %vm3404_vm4, %vm3405_vm3  ;;  %v3463_v60 = vadd.f32 0.05243302, %v3462_v33  ;;  %v3426_v53 = vmul.f32 %v3425_v46, %v5578_v22 }
0x18a7   :  { %v3401_v18 = vsub.f32 1.0, %v3400_v29  ;;  %4219 = vrcp.f32 %v3438_v16  ;;  %v3475_v11 = vmul.f32 %v3474_v35, %v5607_v45  ;;  %v3450_v55 = vand.u32 2147483648, %v3438_v16 }
0x18a8   :  { %v3500_v41 = vmul.f32 %v3499_v21, %v5632_v54  ;;  %v3511_v56 = vmul.f32 %v3510_v37, %v5632_v54  ;;  %v3464_v40 = vmul.f32 %v3463_v60, %v5607_v45  ;;  %v3427_v7 = vadd.f32 1.1283791, %v3426_v53 }
0x18a9   :  { %v3402_v20 = vmul.f32 %v4218_v9, %v3401_v18  ;;  %v3476_v43 = vadd.f32 0.4994258, %v3475_v11  ;;  %v3448_v34 = vand.u32 2147483647, %v3438_v16  ;;  %v3368_v22 = vmul.f32 0.5, %v5552_v47 }
0x18aa   :  { %v3512_v19 = vadd.f32 0.014752088, %v3511_v56  ;;  %v3501_v10 = vadd.f32 0.0036580483, %v3500_v41  ;;  %vm3444_vm6 = vweird.f32 %v3438_v16  ;;  %v3451_v14 = vor.u32 1.1754944e-38, %v3450_v55 }
0x18ab   :  { %v3403_v38 = vadd.f32 %v4218_v9, %v3402_v20  ;;  %v3477_v61 = vmul.f32 %v3476_v43, %v5607_v45  ;;  %v3465_v29 = vadd.f32 0.18741608, %v3464_v40  ;;  %v3428_v3 = vmul.f32 %v3427_v7, %v5566_v26 }
0x18ac   :  { %v3513_v50 = vmul.f32 %v3512_v19, %v5632_v54  ;;  %v3502_v13 = vmul.f32 %v3501_v10, %v5632_v54  ;;  %vm3449_vm9 = vcmp.eq.f32.partialorder %v3448_v34, 8.507059e+37  ;;  %v3369_v26 = vmul.f32 0.5, %v5563_v44 }
0x18ad   :  { %v4220_v6 = vpop.eup %4219  ;;  %v3407_v48 = vsel %vm3406_vm15, %v4218_v9, %v3403_v38  ;;  %v3478_v28 = vadd.f32 1.0, %v3477_v61 }
0x18ae   :  { %v3412_v59 = vsel %vm3409_vm0, %v3411_v24, %v3407_v48  ;;  %v3440_v49 = vmul.f32 %v4220_v6, %v3438_v16  ;;  %v3514_v63 = vadd.f32 0.112945676, %v3513_v50  ;;  %vm3445_vm5 = vweird.f32 %v4220_v6 }
0x18af   :  { %v3413_v36 = vmul.f32 %v3412_v59, %v3388_v42  ;;  %4221 = vrcp.f32 %v3478_v28  ;;  %vm3446_vm8 = vmor %vm3444_vm6, %vm3445_vm5  ;;  %v3503_v17 = vadd.f32 0.05243302, %v3502_v13  ;;  %v3466_v16 = vmul.f32 %v3465_v29, %v5607_v45 }
0x18b0   :  { %v3441_v58 = vsub.f32 1.0, %v3440_v49  ;;  %v3515_v9 = vmul.f32 %v3514_v63, %v5632_v54  ;;  %v3490_v38 = vand.u32 2147483648, %v3478_v28  ;;  %v3488_v56 = vand.u32 2147483647, %v3478_v28 }
0x18b1   :  { %v4000_v0 = vclamps-f32 %v3413_v36, 1.0  ;;  %v3504_v20 = vmul.f32 %v3503_v17, %v5632_v54  ;;  %v3467_v46 = vadd.f32 1.1283791, %v3466_v16  ;;  %vm3484_vm11 = vweird.f32 %v3478_v28 }
0x18b2   :  { %v3442_v8 = vmul.f32 %v4220_v6, %v3441_v58  ;;  %v3516_v30 = vadd.f32 0.4994258, %v3515_v9  ;;  %v3491_v45 = vor.u32 1.1754944e-38, %v3490_v38  ;;  %vm3489_vm13 = vcmp.eq.f32.partialorder %v3488_v56, 8.507059e+37 }
0x18b3   :  { %v3536_v25 = vadd.f32 1.0, %v4000_v0  ;;  %v3505_v42 = vadd.f32 0.18741608, %v3504_v20  ;;  %v3370_v36 = vmul.f32 0.5, %v5587_v4 }
0x18b4   :  { %v3443_v27 = vadd.f32 %v4220_v6, %v3442_v8  ;;  %v3517_v18 = vmul.f32 %v3516_v30, %v5632_v54  ;;  %v3371_v8 = vmul.f32 0.5, %v5615_v62 }
0x18b5   :  { %v3540_v12 = vmul.f32 %v3536_v25, %v3368_v22  ;;  %v4222_v31 = vpop.eup %4221  ;;  %v3506_v43 = vmul.f32 %v3505_v42, %v5632_v54  ;;  %v4045_v25 = vld [vmem:[%s5721_s1 + $0x538] ss:$0 sm:$0xff] }
0x18b6   :  { %v3447_v2 = vsel %vm3446_vm8, %v4220_v6, %v3443_v27  ;;  %v3480_v33 = vmul.f32 %v4222_v31, %v3478_v28  ;;  %v3518_v35 = vadd.f32 1.0, %v3517_v18  ;;  %vm3485_vm10 = vweird.f32 %v4222_v31 }
0x18b7   :  { %v3452_v52 = vsel %vm3449_vm9, %v3451_v14, %v3447_v2  ;;  %4004 = vmatmul.msk.f32.vlgmr.msrb.gmra.mxu3 %vm1793_vm7, %v3540_v12  ;;  %vm3486_vm12 = vmor %vm3484_vm11, %vm3485_vm10  ;;  %v3468_v6 = vmul.f32 %v3467_v46, %v5594_v5  ;;  %v3507_v61 = vadd.f32 1.1283791, %v3506_v43 }
0x18b8   :  { %v3453_v47 = vmul.f32 %v3452_v52, %v3428_v3  ;;  %v3481_v37 = vsub.f32 1.0, %v3480_v33  ;;  %4223 = vrcp.f32 %v3518_v35  ;;  %v3530_v10 = vand.u32 2147483648, %v3518_v35 }
0x18b9   :  { %v3528_v55 = vand.u32 2147483647, %v3518_v35  ;;  %vm3524_vm2 = vweird.f32 %v3518_v35  ;;  %v3508_v28 = vmul.f32 %v3507_v61, %v5624_v1 }
0x18ba   :  { %v4001_v15 = vclamps-f32 %v3453_v47, 1.0  ;;  %v3482_v41 = vmul.f32 %v4222_v31, %v3481_v37  ;;  %v3531_v40 = vor.u32 1.1754944e-38, %v3530_v10 }
0x18bb   :  { %vm3529_vm4 = vcmp.eq.f32.partialorder %v3528_v55, 8.507059e+37 }
0x18bc   :  { %v3537_v21 = vadd.f32 1.0, %v4001_v15  ;;  %v3483_v24 = vadd.f32 %v4222_v31, %v3482_v41 }
0x18be   :  { %v3541_v11 = vmul.f32 %v3537_v21, %v3369_v26  ;;  %v3487_v48 = vsel %vm3486_vm12, %v4222_v31, %v3483_v24  ;;  %v4224_v44 = vpop.eup %4223 }
0x18bf   :  { %v3492_v60 = vsel %vm3489_vm13, %v3491_v45, %v3487_v48  ;;  %v3520_v59 = vmul.f32 %v4224_v44, %v3518_v35  ;;  %vm3525_vm14 = vweird.f32 %v4224_v44  ;;  %v3689_v48 = vld [vmem:[%s5721_s1 + $0x550] sm:$0xff] }
0x18c0   :  { %4005 = vmatmul.msk.f32.gmra.mxu3 %vm1793_vm7, %v3541_v11  ;;  %v3493_v19 = vmul.f32 %v3492_v60, %v3468_v6  ;;  %vm3526_vm3 = vmor %vm3524_vm2, %vm3525_vm14  ;;  %v3690_v6 = vld [vmem:[%s5721_s1 + $0x558] sm:$0xff]  ;;  %v3687_v60 = vld [vmem:[%s5721_s1 + $0x540] sm:$0xff] }
0x18c1   :  { %v3521_v49 = vsub.f32 1.0, %v3520_v59  ;;  %3717 = vmatpush.msrb.mxu0 %v3690_v6 }
0x18c2   :  { %v4002_v53 = vclamps-f32 %v3493_v19, 1.0 }
0x18c3   :  { %v3522_v58 = vmul.f32 %v4224_v44, %v3521_v49  ;;  %3718 = vmatpush.msrb.mxu0 %v3689_v48 }
0x18c4   :  { %v3538_v50 = vadd.f32 1.0, %v4002_v53 }
0x18c5   :  { %v3523_v5 = vadd.f32 %v4224_v44, %v3522_v58 }
0x18c6   :  { %v3542_v0 = vmul.f32 %v3538_v50, %v3370_v36 }
0x18c7   :  { %v3527_v54 = vsel %vm3526_vm3, %v4224_v44, %v3523_v5  ;;  %v3688_v44 = vld [vmem:[%s5721_s1 + $0x548] sm:$0xff] }
0x18c8   :  { %4006 = vmatmul.msk.f32.gmra.mxu3 %vm1793_vm7, %v3542_v0  ;;  %v3532_v63 = vsel %vm3529_vm4, %v3531_v40, %v3527_v54  ;;  %3719 = vmatpush.msrb.mxu0 %v3688_v44 }
0x18c9   :  { %v3533_v7 = vmul.f32 %v3532_v63, %v3508_v28 }
0x18ca   :  { %3720 = vmatpush.msrb.mxu0 %v3687_v60 }
0x18cb   :  { %v4003_v4 = vclamps-f32 %v3533_v7, 1.0 }
0x18cd   :  { %v3539_v34 = vadd.f32 1.0, %v4003_v4 }
0x18cf   :  { %v3543_v22 = vmul.f32 %v3539_v34, %v3371_v8 }
0x18d1   :  { %4007 = vmatmul.msk.f32.gmra.mxu3 %vm1793_vm7, %v3543_v22 }
0x193a   :  { %v3583_v13 = vpop.f32.mrf.mxu3 }
0x193b   :  { %v3584_v27 = vadd.f32 %v4045_v25, %v3583_v13 }
0x193d   :  { %v3595_v1 = vadd.f32 %v3584_v27, %v5480_v39 }
0x193f   :  { %v3599_v9 = vsel %vm68_vm1, %v3595_v1, 0.0 }
0x1940   :  { %3600 = vadd.xlane.f32.xlu0 %v3599_v9 }
0x1943   :  { %v3586_v12 = vpop.f32.mrf.mxu3 }
0x1944   :  { %v3587_v14 = vadd.f32 %v4045_v25, %v3586_v12 }
0x1946   :  { %v3596_v29 = vadd.f32 %v3587_v14, %v5486_v51 }
0x1948   :  { %v3602_v62 = vsel %vm68_vm1, %v3596_v29, 0.0 }
0x1949   :  { %3603 = vadd.xlane.f32.xlu1 %v3602_v62 }
0x194b   :  { %v3589_v3 = vpop.f32.mrf.mxu3 }
0x194c   :  { %v3590_v2 = vadd.f32 %v4045_v25, %v3589_v3 }
0x194e   :  { %v3597_v30 = vadd.f32 %v3590_v2, %v5492_v57 }
0x1950   :  { %v3605_v52 = vsel %vm68_vm1, %v3597_v30, 0.0 }
0x1951   :  { %3606 = vadd.xlane.f32.xlu2 %v3605_v52 }
0x1954   :  { %v3592_v17 = vpop.f32.mrf.mxu3 }
0x1955   :  { %v3593_v47 = vadd.f32 %v4045_v25, %v3592_v17 }
0x1957   :  { %v3598_v39 = vadd.f32 %v3593_v47, %v5498_v23 }
0x1959   :  { %v3608_v18 = vsel %vm68_vm1, %v3598_v39, 0.0 }
0x195a   :  { %3609 = vadd.xlane.f32.xlu0 %v3608_v18 }
0x19b3   :  { %v3601_v31 = vpop.xlane.xlu0 %3600 }
0x19b4   :  { %v3611_v51 = vmul.f32 %v3601_v31, %v4336_v32 }
0x19b6   :  { %v3615_v16 = vsub.f32 %v3595_v1, %v3611_v51 }
0x19b8   :  { %v3619_v15 = vmul.f32 %v3615_v16, %v3615_v16 }
0x19ba   :  { %v3623_v33 = vsel %vm68_vm1, %v3619_v15, 0.0 }
0x19bb   :  { %3624 = vadd.xlane.f32.xlu1 %v3623_v33  ;;  %v4046_v33 = vld [vmem:[%s5721_s1 + $0x560] ss:$0 sm:$0xff]  ;;  %s4261_s1 = smov 128  }
0x19bc   :  { %v3604_v20 = vpop.xlane.xlu1 %3603 }
0x19bd   :  { %v3612_v57 = vmul.f32 %v3604_v20, %v4336_v32 }
0x19bf   :  { %v3616_v35 = vsub.f32 %v3596_v29, %v3612_v57 }
0x19c1   :  { %v3620_v26 = vmul.f32 %v3616_v35, %v3616_v35 }
0x19c3   :  { %v3626_v21 = vsel %vm68_vm1, %v3620_v26, 0.0 }
0x19c4   :  { %3627 = vadd.xlane.f32.xlu2 %v3626_v21  ;;  %v3607_v23 = vpop.xlane.xlu2 %3606 }
0x19c5   :  { %v3613_v37 = vmul.f32 %v3607_v23, %v4336_v32 }
0x19c7   :  { %v5681_v46 = vsub.f32 %v3597_v30, %v3613_v37 }
0x19c9   :  { %v3621_v38 = vmul.f32 %v5681_v46, %v5681_v46 }
0x19cb   :  { %v3629_v11 = vsel %vm68_vm1, %v3621_v38, 0.0 }
0x19cc   :  { %3630 = vadd.xlane.f32.xlu0 %v3629_v11 }
0x19cd   :  { %v3610_v41 = vpop.xlane.xlu0 %3609 }
0x19ce   :  { %v3614_v56 = vmul.f32 %v3610_v41, %v4336_v32 }
0x19d0   :  { %v5687_v42 = vsub.f32 %v3598_v39, %v3614_v56 }
0x19d2   :  { %v3622_v24 = vmul.f32 %v5687_v42, %v5687_v42 }
0x19d4   :  { %v3632_v45 = vsel %vm68_vm1, %v3622_v24, 0.0 }
0x19d5   :  { %3633 = vadd.xlane.f32.xlu1 %v3632_v45 }
0x1a2e   :  { %v3625_v43 = vpop.xlane.xlu1 %3624 }
0x1a2f   :  { %v3635_v19 = vmul.f32 %v3625_v43, %v4336_v32 }
0x1a31   :  { %v3639_v59 = vadd.f32 1e-05, %v3635_v19 }
0x1a33   :  { %4225 = vrsqrt.f32 %v3639_v59  ;;  %vm3649_vm15 = vweird.f32 %v3639_v59 }
0x1a37   :  { %v3628_v53 = vpop.xlane.xlu2 %3627 }
0x1a38   :  { %v3636_v49 = vmul.f32 %v3628_v53, %v4336_v32 }
0x1a39   :  { %v4226_v36 = vpop.eup %4225 }
0x1a3a   :  { %v3644_v61 = vmul.f32 %v4226_v36, %v3639_v59  ;;  %v3640_v10 = vadd.f32 1e-05, %v3636_v49  ;;  %vm3650_vm7 = vweird.f32 %v4226_v36 }
0x1a3b   :  { %vm3651_vm0 = vmor %vm3649_vm15, %vm3650_vm7 }
0x1a3c   :  { %v3645_v50 = vmul.f32 %v4226_v36, %v3644_v61  ;;  %4227 = vrsqrt.f32 %v3640_v10  ;;  %vm3659_vm6 = vweird.f32 %v3640_v10 }
0x1a3e   :  { %v3646_v58 = vmul.f32 0.5, %v3645_v50 }
0x1a3f   :  { %v3631_v28 = vpop.xlane.xlu0 %3630 }
0x1a40   :  { %v3647_v55 = vsub.f32 1.5, %v3646_v58  ;;  %v3637_v63 = vmul.f32 %v3631_v28, %v4336_v32 }
0x1a42   :  { %v4228_v0 = vpop.eup %4227  ;;  %v3648_v5 = vmul.f32 %v4226_v36, %v3647_v55  ;;  %v3641_v8 = vadd.f32 1e-05, %v3637_v63 }
0x1a43   :  { %v3654_v40 = vmul.f32 %v4228_v0, %v3640_v10  ;;  %vm3660_vm5 = vweird.f32 %v4228_v0 }
0x1a44   :  { %v3652_v54 = vsel %vm3651_vm0, %v4226_v36, %v3648_v5  ;;  %4229 = vrsqrt.f32 %v3641_v8  ;;  %vm3661_vm8 = vmor %vm3659_vm6, %vm3660_vm5  ;;  %vm3669_vm10 = vweird.f32 %v3641_v8 }
0x1a45   :  { %v3683_v7 = vmul.f32 %v3652_v54, %v3615_v16  ;;  %v3655_v4 = vmul.f32 %v4228_v0, %v3654_v40 }
0x1a47   :  { %v3656_v34 = vmul.f32 0.5, %v3655_v4  ;;  %4008 = vmatmul.msk.f32.vlgmr.msrb.gmra.mxu0 %vm68_vm1, %v3683_v7 }
0x1a48   :  { %v3634_v13 = vpop.xlane.xlu1 %3633 }
0x1a49   :  { %v3657_v22 = vsub.f32 1.5, %v3656_v34  ;;  %v3638_v9 = vmul.f32 %v3634_v13, %v4336_v32 }
0x1a4a   :  { %v4230_v1 = vpop.eup %4229 }
0x1a4b   :  { %v3658_v25 = vmul.f32 %v4228_v0, %v3657_v22  ;;  %v3664_v14 = vmul.f32 %v4230_v1, %v3641_v8  ;;  %v3642_v29 = vadd.f32 1e-05, %v3638_v9  ;;  %vm3670_vm9 = vweird.f32 %v4230_v1 }
0x1a4c   :  { %vm3671_vm11 = vmor %vm3669_vm10, %vm3670_vm9 }
0x1a4d   :  { %v3662_v27 = vsel %vm3661_vm8, %v4228_v0, %v3658_v25  ;;  %v3665_v62 = vmul.f32 %v4230_v1, %v3664_v14  ;;  %4231 = vrsqrt.f32 %v3642_v29  ;;  %vm3679_vm13 = vweird.f32 %v3642_v29 }
0x1a4e   :  { %v3684_v12 = vmul.f32 %v3662_v27, %v3616_v35 }
0x1a4f   :  { %v3666_v3 = vmul.f32 0.5, %v3665_v62 }
0x1a50   :  { %4009 = vmatmul.msk.f32.gmra.mxu0 %vm68_vm1, %v3684_v12 }
0x1a51   :  { %v3667_v2 = vsub.f32 1.5, %v3666_v3 }
0x1a53   :  { %v3668_v30 = vmul.f32 %v4230_v1, %v3667_v2  ;;  %v4232_v52 = vpop.eup %4231 }
0x1a54   :  { %v3674_v17 = vmul.f32 %v4232_v52, %v3642_v29  ;;  %vm3680_vm12 = vweird.f32 %v4232_v52 }
0x1a55   :  { %v3672_v47 = vsel %vm3671_vm11, %v4230_v1, %v3668_v30  ;;  %vm3681_vm14 = vmor %vm3679_vm13, %vm3680_vm12 }
0x1a56   :  { %v3685_v39 = vmul.f32 %v3672_v47, %v5681_v46  ;;  %v3675_v18 = vmul.f32 %v4232_v52, %v3674_v17 }
0x1a58   :  { %4010 = vmatmul.msk.f32.gmra.mxu0 %vm68_vm1, %v3685_v39  ;;  %v3676_v32 = vmul.f32 0.5, %v3675_v18 }
0x1a5a   :  { %v3677_v31 = vsub.f32 1.5, %v3676_v32 }
0x1a5c   :  { %v3678_v51 = vmul.f32 %v4232_v52, %v3677_v31 }
0x1a5e   :  { %v3682_v16 = vsel %vm3681_vm14, %v4232_v52, %v3678_v51 }
0x1a5f   :  { %v3686_v15 = vmul.f32 %v3682_v16, %v5687_v42 }
0x1a61   :  { %4011 = vmatmul.msk.f32.gmra.mxu0 %vm68_vm1, %v3686_v15 }
0x1ac4   :  { %v3722_v20 = vpop.f32.mrf.mxu0 }
0x1ac5   :  { %v3723_v57 = vadd.f32 %v4046_v33, %v3722_v20 }
0x1ac7   :  { %3734 = vst [vmem:[#allocation2] sm:$0xff] %v3723_v57 }
0x1acd   :  { %v3725_v35 = vpop.f32.mrf.mxu0 }
0x1ace   :  { %v3726_v26 = vadd.f32 %v4046_v33, %v3725_v35 }
0x1ad0   :  { %3735 = vst [vmem:[#allocation2 + $0x8] sm:$0xff] %v3726_v26 }
0x1ad5   :  { %v3728_v21 = vpop.f32.mrf.mxu0 }
0x1ad6   :  { %v3729_v23 = vadd.f32 %v4046_v33, %v3728_v21 }
0x1ad8   :  { %3736 = vst [vmem:[#allocation2 + $0x10] sm:$0xff] %v3729_v23 }
0x1ade   :  { %v3731_v37 = vpop.f32.mrf.mxu0 }
0x1adf   :  { %v3732_v46 = vadd.f32 %v4046_v33, %v3731_v37 }
0x1ae1   :  { %3737 = vst [vmem:[#allocation2 + $0x18] sm:$0xff] %v3732_v46 }
0x1ae2   :  { %3750 = dma.vmem_to_hbm [thread:$0]  %s3743_s16, 512, %s3745_s19, [#allocation3], %s4261_s1, %s4261_s1, %s4262_s20  }
0x1ae3   :  { %4257 = dma.done.wait [#allocation3], 512  }
0x1ae4   :  { %4258 = vsyncadd [#allocation3], 4294966784 }
0x1ae5   :  { %3755 = vsyncpa [#allocation3], 1 }

</bundles_post_ra>
